<compile_context>
chip_gen: v7x
topology: tpu7x:2x2x1
jax: 0.10.0
libtpu: 0.0.40
codegen_flags: <defaults>
</compile_context>

<pallas_src>
import functools

import jax
import jax.numpy as jnp
from jax import lax
from jax.experimental import pallas as pl
from jax.experimental.pallas import tpu as pltpu


def _basic_block_kernel(xflat_ref, mask_ref, w1_ref, w2_ref, b1_ref, b2_ref,
                        out_ref, hpad_ref, *, H, W):
    """One grid step = one image (batch axis is the grid, "parallel").

    Flat "garbage-column" layout: the spatially padded image (Hp, Wp, Cp) is
    flattened to (Hp*Wp, Cp) so every 3x3 tap is a contiguous row-range slice
    (pure sublane offset - no strided 2-D window copies / reshapes).  Matmul
    rows L = H*Wp - 2 cover all valid output pixels; the 2 garbage columns per
    image row are masked to zero before the intermediate store (they land
    exactly on its left/right halo columns, which must be zero for conv2).

    xflat_ref : (1, Hp*Wp, Cp) bf16  zero-padded input (spatial halo + lane pad)
    mask_ref  : (L, 1)         f32   1.0 on valid rows, 0.0 on garbage rows
    w1_ref    : (3, 3*Cp, Cp)  bf16  conv1 weights per dy, dx stacked on K (BN1 scale folded)
    w2_ref    : (3, 3*Cp, Cp)  bf16  conv2 weights (BN2 scale folded)
    b1_ref/b2_ref : (1, Cp)    f32   folded BN biases
    out_ref   : (1, L, Cp)     f32   flat output (valid rows extracted in wrapper)
    hpad_ref  : VMEM (Hp*Wp, Cp) bf16  zero-bordered intermediate activation
    """
    Wp = W + 2
    L = H * Wp - 2
    Cp = xflat_ref.shape[-1]
    cdt = w1_ref.dtype

    def conv3x3(read_rows, w_ref):
        # 3x3 conv as 3 MXU matmuls with K = 3*Cp (dx taps fused on the
        # contraction axis); f32 accumulation chained as values (no VMEM RMW).
        def slab(dy):
            base = dy * Wp
            return jnp.concatenate(
                [read_rows(base + dx) for dx in range(3)], axis=-1)
        acc = jnp.dot(slab(0), w_ref[0], preferred_element_type=jnp.float32)
        acc = acc + jnp.dot(slab(1), w_ref[1], preferred_element_type=jnp.float32)
        acc = acc + jnp.dot(slab(2), w_ref[2], preferred_element_type=jnp.float32)
        return acc

    x_rows = lambda s: xflat_ref[0, s:s + L, :]
    h_rows = lambda s: hpad_ref[s:s + L, :]

    # Zero only the top/bottom halo chunks of the intermediate; the left/right
    # halo columns are zeroed by the masked interior store below.  The three
    # stores together cover the whole scratch every step, so the kernel stays
    # correct when the batch axis is megacore-sharded (no stale VMEM anywhere).
    zchunk = jnp.zeros((Wp + 1, Cp), cdt)
    hpad_ref[0:Wp + 1, :] = zchunk
    hpad_ref[(H + 1) * Wp - 1:(H + 2) * Wp, :] = zchunk

    # ---- conv1 -> bn1 bias -> relu -> mask garbage rows -> bf16 intermediate
    h1 = jnp.maximum(conv3x3(x_rows, w1_ref) + b1_ref[...], 0.0) * mask_ref[...]
    hpad_ref[Wp + 1:Wp + 1 + L, :] = h1.astype(cdt)

    # ---- conv2 -> bn2 bias -> identity residual -> relu -----------------
    residual = xflat_ref[0, Wp + 1:Wp + 1 + L, :].astype(jnp.float32)
    out = jnp.maximum(conv3x3(h_rows, w2_ref) + b2_ref[...] + residual, 0.0)
    out_ref[0, :, :] = out.astype(out_ref.dtype)


def basic_block_forward(x_nchw, w1, w2, s1, b1, s2, b2,
                        *, compute_dtype=jnp.bfloat16):
    """Fused BasicBlock forward.

    x_nchw: (N, C, H, W) f32 (PyTorch layout); w1/w2: (3,3,Cin,Cout) HWIO;
    s*/b*: (1, C) folded BatchNorm scale/bias.  Returns (N, C, H, W) f32.
    Conv matmuls use bf16 operands on the MXU with f32 accumulation; the
    bias / ReLU / residual epilogue stays in f32.
    """
    x = jnp.transpose(x_nchw, (0, 2, 3, 1))                      # NHWC
    N, H, W, C = x.shape
    kh, kw, cin, cout = w1.shape
    assert (kh, kw) == (3, 3) and cin == C and cout == C, \
        "identity residual path requires stride=1 and inplanes == planes"
    # TODO(synk): stride>1 / downsample residual branch of BasicBlock is not
    # implemented (module default downsample=None forces this config).

    Hp, Wp = H + 2, W + 2
    L = H * Wp - 2                       # matmul rows (valid + 2 garbage cols/row)
    Cp = max(128, ((C + 127) // 128) * 128)
    pc = Cp - C

    # Activation: cast to bf16 ONCE (halves DMA bytes, removes in-kernel casts),
    # pad (1-px halo + lane pad) and flatten the spatial dims.
    xflat = jnp.pad(x.astype(compute_dtype),
                    ((0, 0), (1, 1), (1, 1), (0, pc))).reshape(N, Hp * Wp, Cp)
    # TODO(synk): for tiny C (large lane-pad read amplification) move the halo +
    # lane padding into the kernel from an unpadded (N, H, W, C) block.

    # Fold BN scales into the conv weights; stack the 3 dx taps on the
    # contraction axis -> per-dy (3*Cp, Cp) matrices (K = 3*Cp fills the MXU).
    w1f = w1.astype(jnp.float32) * s1.reshape(1, 1, 1, -1)
    w2f = w2.astype(jnp.float32) * s2.reshape(1, 1, 1, -1)
    w1p = jnp.pad(w1f, ((0, 0), (0, 0), (0, pc), (0, pc))) \
             .reshape(3, 3 * Cp, Cp).astype(compute_dtype)
    w2p = jnp.pad(w2f, ((0, 0), (0, 0), (0, pc), (0, pc))) \
             .reshape(3, 3 * Cp, Cp).astype(compute_dtype)
    b1p = jnp.pad(b1.reshape(1, -1).astype(jnp.float32), ((0, 0), (0, pc)))
    b2p = jnp.pad(b2.reshape(1, -1).astype(jnp.float32), ((0, 0), (0, pc)))

    # Row-validity mask for the flat layout (zeros the 2 garbage columns/row).
    mask = (jnp.arange(L) % Wp < W).astype(jnp.float32).reshape(L, 1)

    # VMEM budget: ~3/4 of the chip's VMEM, capped at 96 MiB
    # (=> 96 MiB on 128 MiB v5e/v6e, 48 MiB on 64 MiB v7x).
    try:
        vmem_cap = int(pltpu.get_tpu_info().vmem_capacity_bytes)
    except Exception:
        vmem_cap = 128 * 1024 * 1024
    vmem_limit = int(min(96 * 1024 * 1024, (vmem_cap * 3) // 4))

    out_flat = pl.pallas_call(
        functools.partial(_basic_block_kernel, H=H, W=W),
        out_shape=jax.ShapeDtypeStruct((N, L, Cp), jnp.float32),
        grid=(N,),
        in_specs=[
            pl.BlockSpec((1, Hp * Wp, Cp), lambda n: (n, 0, 0)),   # activation
            pl.BlockSpec((L, 1), lambda n: (0, 0)),                # row mask (resident)
            pl.BlockSpec((3, 3 * Cp, Cp), lambda n: (0, 0, 0)),    # w1 (resident)
            pl.BlockSpec((3, 3 * Cp, Cp), lambda n: (0, 0, 0)),    # w2 (resident)
            pl.BlockSpec((1, Cp), lambda n: (0, 0)),               # b1
            pl.BlockSpec((1, Cp), lambda n: (0, 0)),               # b2
        ],
        out_specs=pl.BlockSpec((1, L, Cp), lambda n: (n, 0, 0)),
        scratch_shapes=[pltpu.VMEM((Hp * Wp, Cp), compute_dtype)],  # intermediate
        compiler_params=pltpu.CompilerParams(
            dimension_semantics=("parallel",),        # megacore over batch (v7x)
            vmem_limit_bytes=vmem_limit),
    )(xflat, mask, w1p, w2p, b1p, b2p)
    # TODO(synk): single-buffer the resident weight blocks (pipeline_mode=
    # pl.Buffered(1)) and block several images per grid step for
    # small-spatial / large-Cp layers (late ResNet stages).

    # Recover (N, C, H, W): re-append the 2 dropped rows, un-flatten, drop
    # garbage columns + channel lane-pad, transpose back to NCHW.
    out = jnp.pad(out_flat, ((0, 0), (0, 2), (0, 0))).reshape(N, H, Wp, Cp)
    return jnp.transpose(out[:, :, :W, :C], (0, 3, 1, 2))


def _reference_nchw(x_nchw, w1, w2, s1, b1, s2, b2, compute_dtype=jnp.bfloat16):
    """Pure-JAX reference with identical numerics (bf16 operands, f32 acc)."""
    x = jnp.transpose(x_nchw, (0, 2, 3, 1))
    xq = x.astype(compute_dtype)
    w1f = (w1.astype(jnp.float32) * s1.reshape(1, 1, 1, -1)).astype(compute_dtype)
    w2f = (w2.astype(jnp.float32) * s2.reshape(1, 1, 1, -1)).astype(compute_dtype)
    dn = ("NHWC", "HWIO", "NHWC")
    y = lax.conv_general_dilated(xq, w1f, (1, 1), ((1, 1), (1, 1)),
                                 dimension_numbers=dn,
                                 preferred_element_type=jnp.float32)
    y = jnp.maximum(y + b1.reshape(1, 1, 1, -1), 0.0)
    y = lax.conv_general_dilated(y.astype(compute_dtype), w2f, (1, 1),
                                 ((1, 1), (1, 1)), dimension_numbers=dn,
                                 preferred_element_type=jnp.float32)
    y = jnp.maximum(y + b2.reshape(1, 1, 1, -1) + xq.astype(jnp.float32), 0.0)
    return jnp.transpose(y, (0, 3, 1, 2))


def _fold_bn(gamma, beta, mean, var, eps=1e-5):
    scale = gamma / jnp.sqrt(var + eps)
    bias = beta - mean * scale
    return scale.reshape(1, -1), bias.reshape(1, -1)


if __name__ == "__main__":
    # Small deterministic setup: inplanes = planes = 8, stride = 1.
    N, C, H, W = 2, 8, 16, 16
    key = jax.random.PRNGKey(0)
    keys = jax.random.split(key, 12)

    x = jax.random.normal(keys[0], (N, C, H, W), jnp.float32)        # NCHW input

    # conv weights (HWIO), deterministic synthetic init
    w1 = 0.2 * jax.random.normal(keys[1], (3, 3, C, C), jnp.float32)
    w2 = 0.2 * jax.random.normal(keys[2], (3, 3, C, C), jnp.float32)

    # BatchNorm parameters (inference mode), folded into scale/bias
    g1 = 0.5 + jax.random.uniform(keys[3], (C,), jnp.float32)
    be1 = 0.1 * jax.random.normal(keys[4], (C,), jnp.float32)
    m1 = 0.1 * jax.random.normal(keys[5], (C,), jnp.float32)
    v1 = 0.5 + jax.random.uniform(keys[6], (C,), jnp.float32)
    g2 = 0.5 + jax.random.uniform(keys[7], (C,), jnp.float32)
    be2 = 0.1 * jax.random.normal(keys[8], (C,), jnp.float32)
    m2 = 0.1 * jax.random.normal(keys[9], (C,), jnp.float32)
    v2 = 0.5 + jax.random.uniform(keys[10], (C,), jnp.float32)

    s1, b1 = _fold_bn(g1, be1, m1, v1)
    s2, b2 = _fold_bn(g2, be2, m2, v2)

    out = jax.block_until_ready(basic_block_forward(x, w1, w2, s1, b1, s2, b2))
    ref = jax.block_until_ready(_reference_nchw(x, w1, w2, s1, b1, s2, b2))

    assert out.shape == (N, C, H, W)
    max_diff = float(jnp.max(jnp.abs(out - ref)))
    assert jnp.allclose(out, ref, atol=3e-3, rtol=3e-3), \
        f"mismatch vs reference, max abs diff = {max_diff}"

    print("KERNEL_OK")
</pallas_src>

<mosaic_0001>
module attributes {stable_mosaic.version = 11 : i64} {
  func.func @_basic_block_kernel(%arg0: i32, %arg1: memref<1x324x128xbf16, #tpu.memory_space<vmem>>, %arg2: memref<286x1xf32, #tpu.memory_space<vmem>>, %arg3: memref<3x384x128xbf16, #tpu.memory_space<vmem>>, %arg4: memref<3x384x128xbf16, #tpu.memory_space<vmem>>, %arg5: memref<1x128xf32, #tpu.memory_space<vmem>>, %arg6: memref<1x128xf32, #tpu.memory_space<vmem>>, %arg7: memref<1x286x128xf32, #tpu.memory_space<vmem>>, %arg8: memref<324x128xbf16, #tpu.memory_space<vmem>>) attributes {dimension_semantics = [#tpu.dimension_semantics<parallel>], iteration_bounds = array<i64: 2>, scalar_prefetch = 0 : i64, scratch_operands = 1 : i64, tpu.core_type = #tpu.core_type<tc>, window_params = [{transform_indices = @transform_0, window_bounds = array<i64: 1, 324, 128>}, {pipeline_mode = #tpu.pipeline_mode<synchronous>, transform_indices = @transform_1, window_bounds = array<i64: 286, 1>}, {pipeline_mode = #tpu.pipeline_mode<synchronous>, transform_indices = @transform_2, window_bounds = array<i64: 3, 384, 128>}, {pipeline_mode = #tpu.pipeline_mode<synchronous>, transform_indices = @transform_3, window_bounds = array<i64: 3, 384, 128>}, {pipeline_mode = #tpu.pipeline_mode<synchronous>, transform_indices = @transform_4, window_bounds = array<i64: 1, 128>}, {pipeline_mode = #tpu.pipeline_mode<synchronous>, transform_indices = @transform_5, window_bounds = array<i64: 1, 128>}, {transform_indices = @transform_6, window_bounds = array<i64: 1, 286, 128>}]} {
    %cst = arith.constant 0.000000e+00 : bf16
    %0 = vector.broadcast %cst : bf16 to vector<19x128xbf16>
    %c0 = arith.constant 0 : index
    %c0_0 = arith.constant 0 : index
    %1 = vector.load %arg8[%c0, %c0_0] : memref<324x128xbf16, #tpu.memory_space<vmem>>, vector<19x128xbf16>
    tpu.vector_store %arg8[%c0, %c0_0], %0 {strides = array<i32>} : memref<324x128xbf16, #tpu.memory_space<vmem>>, vector<19x128xbf16>,
    %c305 = arith.constant 305 : index
    %c0_1 = arith.constant 0 : index
    %2 = vector.load %arg8[%c305, %c0_1] : memref<324x128xbf16, #tpu.memory_space<vmem>>, vector<19x128xbf16>
    tpu.vector_store %arg8[%c305, %c0_1], %0 {strides = array<i32>} : memref<324x128xbf16, #tpu.memory_space<vmem>>, vector<19x128xbf16>,
    %c0_2 = arith.constant 0 : index
    %c0_3 = arith.constant 0 : index
    %c0_4 = arith.constant 0 : index
    %3 = vector.load %arg1[%c0_2, %c0_3, %c0_4] : memref<1x324x128xbf16, #tpu.memory_space<vmem>>, vector<1x286x128xbf16>
    %4 = vector.shape_cast %3 : vector<1x286x128xbf16> to vector<286x128xbf16>
    %c0_5 = arith.constant 0 : index
    %c1 = arith.constant 1 : index
    %c0_6 = arith.constant 0 : index
    %5 = vector.load %arg1[%c0_5, %c1, %c0_6] : memref<1x324x128xbf16, #tpu.memory_space<vmem>>, vector<1x286x128xbf16>
    %6 = vector.shape_cast %5 : vector<1x286x128xbf16> to vector<286x128xbf16>
    %c0_7 = arith.constant 0 : index
    %c2 = arith.constant 2 : index
    %c0_8 = arith.constant 0 : index
    %7 = vector.load %arg1[%c0_7, %c2, %c0_8] : memref<1x324x128xbf16, #tpu.memory_space<vmem>>, vector<1x286x128xbf16>
    %8 = vector.shape_cast %7 : vector<1x286x128xbf16> to vector<286x128xbf16>
    %9 = tpu.concatenate %4, %6, %8 in 1 : vector<286x128xbf16>, vector<286x128xbf16>, vector<286x128xbf16> -> vector<286x384xbf16>
    %c0_9 = arith.constant 0 : index
    %c0_10 = arith.constant 0 : index
    %c0_11 = arith.constant 0 : index
    %10 = vector.load %arg3[%c0_9, %c0_10, %c0_11] : memref<3x384x128xbf16, #tpu.memory_space<vmem>>, vector<1x384x128xbf16>
    %11 = vector.shape_cast %10 : vector<1x384x128xbf16> to vector<384x128xbf16>
    %cst_12 = arith.constant dense<0.000000e+00> : vector<286x128xf32>
    %12 = tpu.matmul %9, %11, %cst_12 {dimension_numbers = #tpu.dot_dimension_numbers<[1], [0], [0], [1], [0, 0, 1, 1], [], []>} : vector<286x384xbf16>, vector<384x128xbf16>, vector<286x128xf32> -> vector<286x128xf32>
    %c0_13 = arith.constant 0 : index
    %c18 = arith.constant 18 : index
    %c0_14 = arith.constant 0 : index
    %13 = vector.load %arg1[%c0_13, %c18, %c0_14] : memref<1x324x128xbf16, #tpu.memory_space<vmem>>, vector<1x286x128xbf16>
    %14 = vector.shape_cast %13 : vector<1x286x128xbf16> to vector<286x128xbf16>
    %c0_15 = arith.constant 0 : index
    %c19 = arith.constant 19 : index
    %c0_16 = arith.constant 0 : index
    %15 = vector.load %arg1[%c0_15, %c19, %c0_16] : memref<1x324x128xbf16, #tpu.memory_space<vmem>>, vector<1x286x128xbf16>
    %16 = vector.shape_cast %15 : vector<1x286x128xbf16> to vector<286x128xbf16>
    %c0_17 = arith.constant 0 : index
    %c20 = arith.constant 20 : index
    %c0_18 = arith.constant 0 : index
    %17 = vector.load %arg1[%c0_17, %c20, %c0_18] : memref<1x324x128xbf16, #tpu.memory_space<vmem>>, vector<1x286x128xbf16>
    %18 = vector.shape_cast %17 : vector<1x286x128xbf16> to vector<286x128xbf16>
    %19 = tpu.concatenate %14, %16, %18 in 1 : vector<286x128xbf16>, vector<286x128xbf16>, vector<286x128xbf16> -> vector<286x384xbf16>
    %c1_19 = arith.constant 1 : index
    %c0_20 = arith.constant 0 : index
    %c0_21 = arith.constant 0 : index
    %20 = vector.load %arg3[%c1_19, %c0_20, %c0_21] : memref<3x384x128xbf16, #tpu.memory_space<vmem>>, vector<1x384x128xbf16>
    %21 = vector.shape_cast %20 : vector<1x384x128xbf16> to vector<384x128xbf16>
    %cst_22 = arith.constant dense<0.000000e+00> : vector<286x128xf32>
    %22 = tpu.matmul %19, %21, %cst_22 {dimension_numbers = #tpu.dot_dimension_numbers<[1], [0], [0], [1], [0, 0, 1, 1], [], []>} : vector<286x384xbf16>, vector<384x128xbf16>, vector<286x128xf32> -> vector<286x128xf32>
    %23 = arith.addf %12, %22 : vector<286x128xf32>
    %c0_23 = arith.constant 0 : index
    %c36 = arith.constant 36 : index
    %c0_24 = arith.constant 0 : index
    %24 = vector.load %arg1[%c0_23, %c36, %c0_24] : memref<1x324x128xbf16, #tpu.memory_space<vmem>>, vector<1x286x128xbf16>
    %25 = vector.shape_cast %24 : vector<1x286x128xbf16> to vector<286x128xbf16>
    %c0_25 = arith.constant 0 : index
    %c37 = arith.constant 37 : index
    %c0_26 = arith.constant 0 : index
    %26 = vector.load %arg1[%c0_25, %c37, %c0_26] : memref<1x324x128xbf16, #tpu.memory_space<vmem>>, vector<1x286x128xbf16>
    %27 = vector.shape_cast %26 : vector<1x286x128xbf16> to vector<286x128xbf16>
    %c0_27 = arith.constant 0 : index
    %c38 = arith.constant 38 : index
    %c0_28 = arith.constant 0 : index
    %28 = vector.load %arg1[%c0_27, %c38, %c0_28] : memref<1x324x128xbf16, #tpu.memory_space<vmem>>, vector<1x286x128xbf16>
    %29 = vector.shape_cast %28 : vector<1x286x128xbf16> to vector<286x128xbf16>
    %30 = tpu.concatenate %25, %27, %29 in 1 : vector<286x128xbf16>, vector<286x128xbf16>, vector<286x128xbf16> -> vector<286x384xbf16>
    %c2_29 = arith.constant 2 : index
    %c0_30 = arith.constant 0 : index
    %c0_31 = arith.constant 0 : index
    %31 = vector.load %arg3[%c2_29, %c0_30, %c0_31] : memref<3x384x128xbf16, #tpu.memory_space<vmem>>, vector<1x384x128xbf16>
    %32 = vector.shape_cast %31 : vector<1x384x128xbf16> to vector<384x128xbf16>
    %cst_32 = arith.constant dense<0.000000e+00> : vector<286x128xf32>
    %33 = tpu.matmul %30, %32, %cst_32 {dimension_numbers = #tpu.dot_dimension_numbers<[1], [0], [0], [1], [0, 0, 1, 1], [], []>} : vector<286x384xbf16>, vector<384x128xbf16>, vector<286x128xf32> -> vector<286x128xf32>
    %34 = arith.addf %23, %33 : vector<286x128xf32>
    %c0_33 = arith.constant 0 : index
    %c0_34 = arith.constant 0 : index
    %35 = vector.load %arg5[%c0_33, %c0_34] : memref<1x128xf32, #tpu.memory_space<vmem>>, vector<1x128xf32>
    %36 = vector.broadcast %35 : vector<1x128xf32> to vector<286x128xf32>
    %37 = arith.addf %34, %36 : vector<286x128xf32>
    %cst_35 = arith.constant 0.000000e+00 : f32
    %38 = vector.broadcast %cst_35 : f32 to vector<286x128xf32>
    %39 = arith.maximumf %37, %38 : vector<286x128xf32>
    %c0_36 = arith.constant 0 : index
    %c0_37 = arith.constant 0 : index
    %40 = vector.load %arg2[%c0_36, %c0_37] : memref<286x1xf32, #tpu.memory_space<vmem>>, vector<286x1xf32>
    %41 = vector.broadcast %40 : vector<286x1xf32> to vector<286x128xf32>
    %42 = arith.mulf %39, %41 : vector<286x128xf32>
    %43 = arith.truncf %42 : vector<286x128xf32> to vector<286x128xbf16>
    %c19_38 = arith.constant 19 : index
    %c0_39 = arith.constant 0 : index
    %44 = vector.load %arg8[%c19_38, %c0_39] : memref<324x128xbf16, #tpu.memory_space<vmem>>, vector<286x128xbf16>
    tpu.vector_store %arg8[%c19_38, %c0_39], %43 {strides = array<i32>} : memref<324x128xbf16, #tpu.memory_space<vmem>>, vector<286x128xbf16>,
    %c0_40 = arith.constant 0 : index
    %c19_41 = arith.constant 19 : index
    %c0_42 = arith.constant 0 : index
    %45 = vector.load %arg1[%c0_40, %c19_41, %c0_42] : memref<1x324x128xbf16, #tpu.memory_space<vmem>>, vector<1x286x128xbf16>
    %46 = vector.shape_cast %45 : vector<1x286x128xbf16> to vector<286x128xbf16>
    %47 = arith.extf %46 : vector<286x128xbf16> to vector<286x128xf32>
    %c0_43 = arith.constant 0 : index
    %c0_44 = arith.constant 0 : index
    %48 = vector.load %arg8[%c0_43, %c0_44] : memref<324x128xbf16, #tpu.memory_space<vmem>>, vector<286x128xbf16>
    %c1_45 = arith.constant 1 : index
    %c0_46 = arith.constant 0 : index
    %49 = vector.load %arg8[%c1_45, %c0_46] : memref<324x128xbf16, #tpu.memory_space<vmem>>, vector<286x128xbf16>
    %c2_47 = arith.constant 2 : index
    %c0_48 = arith.constant 0 : index
    %50 = vector.load %arg8[%c2_47, %c0_48] : memref<324x128xbf16, #tpu.memory_space<vmem>>, vector<286x128xbf16>
    %51 = tpu.concatenate %48, %49, %50 in 1 : vector<286x128xbf16>, vector<286x128xbf16>, vector<286x128xbf16> -> vector<286x384xbf16>
    %c0_49 = arith.constant 0 : index
    %c0_50 = arith.constant 0 : index
    %c0_51 = arith.constant 0 : index
    %52 = vector.load %arg4[%c0_49, %c0_50, %c0_51] : memref<3x384x128xbf16, #tpu.memory_space<vmem>>, vector<1x384x128xbf16>
    %53 = vector.shape_cast %52 : vector<1x384x128xbf16> to vector<384x128xbf16>
    %cst_52 = arith.constant dense<0.000000e+00> : vector<286x128xf32>
    %54 = tpu.matmul %51, %53, %cst_52 {dimension_numbers = #tpu.dot_dimension_numbers<[1], [0], [0], [1], [0, 0, 1, 1], [], []>} : vector<286x384xbf16>, vector<384x128xbf16>, vector<286x128xf32> -> vector<286x128xf32>
    %c18_53 = arith.constant 18 : index
    %c0_54 = arith.constant 0 : index
    %55 = vector.load %arg8[%c18_53, %c0_54] : memref<324x128xbf16, #tpu.memory_space<vmem>>, vector<286x128xbf16>
    %c19_55 = arith.constant 19 : index
    %c0_56 = arith.constant 0 : index
    %56 = vector.load %arg8[%c19_55, %c0_56] : memref<324x128xbf16, #tpu.memory_space<vmem>>, vector<286x128xbf16>
    %c20_57 = arith.constant 20 : index
    %c0_58 = arith.constant 0 : index
    %57 = vector.load %arg8[%c20_57, %c0_58] : memref<324x128xbf16, #tpu.memory_space<vmem>>, vector<286x128xbf16>
    %58 = tpu.concatenate %55, %56, %57 in 1 : vector<286x128xbf16>, vector<286x128xbf16>, vector<286x128xbf16> -> vector<286x384xbf16>
    %c1_59 = arith.constant 1 : index
    %c0_60 = arith.constant 0 : index
    %c0_61 = arith.constant 0 : index
    %59 = vector.load %arg4[%c1_59, %c0_60, %c0_61] : memref<3x384x128xbf16, #tpu.memory_space<vmem>>, vector<1x384x128xbf16>
    %60 = vector.shape_cast %59 : vector<1x384x128xbf16> to vector<384x128xbf16>
    %cst_62 = arith.constant dense<0.000000e+00> : vector<286x128xf32>
    %61 = tpu.matmul %58, %60, %cst_62 {dimension_numbers = #tpu.dot_dimension_numbers<[1], [0], [0], [1], [0, 0, 1, 1], [], []>} : vector<286x384xbf16>, vector<384x128xbf16>, vector<286x128xf32> -> vector<286x128xf32>
    %62 = arith.addf %54, %61 : vector<286x128xf32>
    %c36_63 = arith.constant 36 : index
    %c0_64 = arith.constant 0 : index
    %63 = vector.load %arg8[%c36_63, %c0_64] : memref<324x128xbf16, #tpu.memory_space<vmem>>, vector<286x128xbf16>
    %c37_65 = arith.constant 37 : index
    %c0_66 = arith.constant 0 : index
    %64 = vector.load %arg8[%c37_65, %c0_66] : memref<324x128xbf16, #tpu.memory_space<vmem>>, vector<286x128xbf16>
    %c38_67 = arith.constant 38 : index
    %c0_68 = arith.constant 0 : index
    %65 = vector.load %arg8[%c38_67, %c0_68] : memref<324x128xbf16, #tpu.memory_space<vmem>>, vector<286x128xbf16>
    %66 = tpu.concatenate %63, %64, %65 in 1 : vector<286x128xbf16>, vector<286x128xbf16>, vector<286x128xbf16> -> vector<286x384xbf16>
    %c2_69 = arith.constant 2 : index
    %c0_70 = arith.constant 0 : index
    %c0_71 = arith.constant 0 : index
    %67 = vector.load %arg4[%c2_69, %c0_70, %c0_71] : memref<3x384x128xbf16, #tpu.memory_space<vmem>>, vector<1x384x128xbf16>
    %68 = vector.shape_cast %67 : vector<1x384x128xbf16> to vector<384x128xbf16>
    %cst_72 = arith.constant dense<0.000000e+00> : vector<286x128xf32>
    %69 = tpu.matmul %66, %68, %cst_72 {dimension_numbers = #tpu.dot_dimension_numbers<[1], [0], [0], [1], [0, 0, 1, 1], [], []>} : vector<286x384xbf16>, vector<384x128xbf16>, vector<286x128xf32> -> vector<286x128xf32>
    %70 = arith.addf %62, %69 : vector<286x128xf32>
    %c0_73 = arith.constant 0 : index
    %c0_74 = arith.constant 0 : index
    %71 = vector.load %arg6[%c0_73, %c0_74] : memref<1x128xf32, #tpu.memory_space<vmem>>, vector<1x128xf32>
    %72 = vector.broadcast %71 : vector<1x128xf32> to vector<286x128xf32>
    %73 = arith.addf %70, %72 : vector<286x128xf32>
    %74 = arith.addf %73, %47 : vector<286x128xf32>
    %cst_75 = arith.constant 0.000000e+00 : f32
    %75 = vector.broadcast %cst_75 : f32 to vector<286x128xf32>
    %76 = arith.maximumf %74, %75 : vector<286x128xf32>
    %c0_76 = arith.constant 0 : index
    %c0_77 = arith.constant 0 : index
    %c0_78 = arith.constant 0 : index
    %77 = vector.load %arg7[%c0_76, %c0_77, %c0_78] : memref<1x286x128xf32, #tpu.memory_space<vmem>>, vector<1x286x128xf32>
    %78 = vector.shape_cast %77 : vector<1x286x128xf32> to vector<286x128xf32>
    %79 = vector.shape_cast %76 : vector<286x128xf32> to vector<1x286x128xf32>
    tpu.vector_store %arg7[%c0_76, %c0_77, %c0_78], %79 {strides = array<i32>} : memref<1x286x128xf32, #tpu.memory_space<vmem>>, vector<1x286x128xf32>,
    return
  }
  func.func @transform_0(%arg0: i32) -> (i32, i32, i32) {
    %c0_i32 = arith.constant 0 : i32
    %c0_i32_0 = arith.constant 0 : i32
    %c0_i32_1 = arith.constant 0 : i32
    return %arg0, %c0_i32, %c0_i32_0 : i32, i32, i32
  }
  func.func @transform_1(%arg0: i32) -> (i32, i32) {
    %c0_i32 = arith.constant 0 : i32
    %c0_i32_0 = arith.constant 0 : i32
    %c0_i32_1 = arith.constant 0 : i32
    return %c0_i32, %c0_i32_0 : i32, i32
  }
  func.func @transform_2(%arg0: i32) -> (i32, i32, i32) {
    %c0_i32 = arith.constant 0 : i32
    %c0_i32_0 = arith.constant 0 : i32
    %c0_i32_1 = arith.constant 0 : i32
    %c0_i32_2 = arith.constant 0 : i32
    return %c0_i32, %c0_i32_0, %c0_i32_1 : i32, i32, i32
  }
  func.func @transform_3(%arg0: i32) -> (i32, i32, i32) {
    %c0_i32 = arith.constant 0 : i32
    %c0_i32_0 = arith.constant 0 : i32
    %c0_i32_1 = arith.constant 0 : i32
    %c0_i32_2 = arith.constant 0 : i32
    return %c0_i32, %c0_i32_0, %c0_i32_1 : i32, i32, i32
  }
  func.func @transform_4(%arg0: i32) -> (i32, i32) {
    %c0_i32 = arith.constant 0 : i32
    %c0_i32_0 = arith.constant 0 : i32
    %c0_i32_1 = arith.constant 0 : i32
    return %c0_i32, %c0_i32_0 : i32, i32
  }
  func.func @transform_5(%arg0: i32) -> (i32, i32) {
    %c0_i32 = arith.constant 0 : i32
    %c0_i32_0 = arith.constant 0 : i32
    %c0_i32_1 = arith.constant 0 : i32
    return %c0_i32, %c0_i32_0 : i32, i32
  }
  func.func @transform_6(%arg0: i32) -> (i32, i32, i32) {
    %c0_i32 = arith.constant 0 : i32
    %c0_i32_0 = arith.constant 0 : i32
    %c0_i32_1 = arith.constant 0 : i32
    return %arg0, %c0_i32, %c0_i32_0 : i32, i32, i32
  }
}

</mosaic_0001>

<bundles_post_ra>
// kernel: tpu_custom_call.1
= control target key start
LH: loop header
LB: loop body
LE: loop exit
PB: predicated region body
PF: predicated region fallthrough
CT: control target
= control target key end

     0   :  { %11 = vsyncpa [#allocation4], 0  ;;  %s11715_s0 = inlined_call_operand.hbm [shape: bf16[2,324,128], index: 0, kind: input, shape index: {}]   ;;  %s11716_s1 = inlined_call_operand.hbm [shape: f32[286,1], index: 1, kind: input, shape index: {}]   ;;  %s11717_s2 = inlined_call_operand.hbm [shape: bf16[3,384,128], index: 2, kind: input, shape index: {}]   ;;  %s11718_s3 = inlined_call_operand.hbm [shape: bf16[3,384,128], index: 3, kind: input, shape index: {}]   ;;  %s11719_s4 = inlined_call_operand.hbm [shape: f32[1,128], index: 4, kind: input, shape index: {}]   ;;  %s11720_s5 = inlined_call_operand.hbm [shape: f32[1,128], index: 5, kind: input, shape index: {}]   ;;  %s11721_s6 = inlined_call_operand.hbm [shape: f32[2,286,128], index: 6, kind: output, shape index: {}]  }
   0x1   :  { %13 = vsyncpa [#allocation4 + $0x1], 0 }
   0x2   :  { %14 = vsyncpa [#allocation7], 0 }
   0x3   :  { %15 = vsyncpa [#allocation10], 0 }
   0x4   :  { %16 = vsyncpa [#allocation13], 0 }
   0x5   :  { %17 = vsyncpa [#allocation5], 0 }
   0x6   :  { %19 = vsyncpa [#allocation5 + $0x1], 0  ;;  %s8681_s21 = smov 0   ;;  %s8683_s22 = smov 0  }
   0x7   :  { %s8685_s23 = smov 0   ;;  %s8687_s24 = smov 0  }
   0x8 LB: > { %s8632_s25 = smov [#allocation6]   ;;  %s8702_s27 = sadd.s32 4294967295, %s8630_s24   ;;  %s8630_s24 = sphi %s8687_s24, %s11828_s24   ;;  %s8626_s23 = sphi %s8685_s23, %s11827_s23   ;;  %s8622_s22 = sphi %s8683_s22, %s11826_s22   ;;  %s8618_s21 = sphi %s8681_s21, %s11825_s21  }
   0x9   : > { %s199_s26 = sshll.u32 %s8632_s25, 4  ;;  %p7131_p0 = scmp.ge.s32.totalorder %s8630_s24, 1  ;;  %s8707_s26 = int_to_ptr.vmem [resolvable:$true] %s199_s26 }
   0xa   : > { %p11722_p1 = scmp.eq.s32.totalorder %s8702_s27, 0  ;;  %p187_p2 = scmp.lt.s32.totalorder %s8630_s24, 3 }
   0xb   : > { %s8633_s30 = smov [#allocation9]   ;;  %s8634_s8 = smov [#allocation8]  }
   0xc   : > { %p8709_p3 = pnand %p7131_p0, %p187_p2  ;;  %s225_s7 = sshll.u32 %s8633_s30, 4  ;;  %s8722_s7 = int_to_ptr.vmem [resolvable:$true] %s225_s7 }
   0xd   : > { %s8724_s9 = sshll.u32 %s8634_s8, 4  ;;  %s8382_s12 = scalar_lea.hbm %s11716_s1, 4608  ;;  %s213_s9 = int_to_ptr.vmem [resolvable:$true] %s8724_s9 }
   0xe   : > { %s11738_s28 = scalar_select %p8709_p3, 1, 0 }
   0xf   : > { %p8038_p5 = pneg %p8709_p3  ;;  %p8383_p7 = scmp.ne.s32.totalorder %s11716_s1, %s8382_s12 }
  0x10   : > { %p8389_p11 = scmp.lt.u32.totalorder %s8382_s12, %s11716_s1 }
  0x11   : > { %p8718_p6 = pnand %p8038_p5, %p11722_p1 }
  0x13   : > { %p8734_p8 = pneg %p8718_p6 }
  0x15   : > { %p8385_p9 = pnand %p8734_p8, %p8383_p7 }
  0x17   : > { %p8386_p10 = pneg %p8385_p9 }
  0x19   : > { %p8391_p12 = pnand %p8389_p11, %p8386_p10 }
  0x1b   : > { %8394 = shalt.err (!%p8391_p12)
}
  0x1c   : > { %s8395_s18 = scalar_lea.vmem %s8707_s26, 4608  ;;  %p8403_p5 = scmp.lt.s32.totalorder %s8707_s26, %s8707_s26 }
  0x1d   : > { %p8396_p13 = scmp.ne.s32.totalorder %s8707_s26, %s8395_s18  ;;  %p8404_p4 = scmp.lt.s32.totalorder %s8395_s18, %s8395_s18 }
  0x1f   : > { %p8398_p0 = pnand %p8396_p13, %p8734_p8  ;;  %p8405_p7 = por %p8404_p4, %p8403_p5 }
  0x21   : > { %p8399_p2 = pneg %p8398_p0 }
  0x23   : > { %p8406_p9 = pnand %p8405_p7, %p8399_p2 }
  0x25   : > { %8409 = shalt.err (!%p8406_p9)
}
  0x26   : > { %s8635_s19 = smov 128   ;;  %s8636_s20 = smov 8  }
  0x27   : > { %8041 = dma.hbm_to_vmem [thread:$0]  (!%p8718_p6), %s11716_s1, 4608, %s8707_s26, [#allocation7], %s8635_s19, %s8635_s19, %s8636_s20  }
  0x28   : > { %s8410_s11 = scalar_lea.hbm %s11718_s3, 9216 }
  0x29   : > { %p8411_p4 = scmp.ne.s32.totalorder %s11718_s3, %s8410_s11  ;;  %p8417_p12 = scmp.lt.u32.totalorder %s8410_s11, %s11718_s3 }
  0x2b   : > { %p8413_p10 = pnand %p8411_p4, %p8734_p8 }
  0x2d   : > { %p8414_p11 = pneg %p8413_p10 }
  0x2f   : > { %p8419_p13 = pnand %p8417_p12, %p8414_p11 }
  0x31   : > { %8422 = shalt.err (!%p8419_p13)
}
  0x32   : > { %s8423_s26 = scalar_lea.vmem %s8722_s7, 9216  ;;  %p8431_p7 = scmp.lt.s32.totalorder %s8722_s7, %s8722_s7 }
  0x33   : > { %p8424_p0 = scmp.ne.s32.totalorder %s8722_s7, %s8423_s26  ;;  %p8432_p9 = scmp.lt.s32.totalorder %s8423_s26, %s8423_s26 }
  0x35   : > { %p8426_p2 = pnand %p8424_p0, %p8734_p8  ;;  %p8433_p4 = por %p8432_p9, %p8431_p7 }
  0x37   : > { %p8427_p5 = pneg %p8426_p2 }
  0x39   : > { %p8434_p10 = pnand %p8433_p4, %p8427_p5 }
  0x3b   : > { %8437 = shalt.err (!%p8434_p10)
}
  0x3c   : > { %s11724_s17 = smov 64   ;;  %s11725_s18 = smov 4  }
  0x3d   : > { %8047 = dma.hbm_to_vmem [thread:$0]  (!%p8718_p6), %s11718_s3, 9216, %s8722_s7, [#allocation10], %s11724_s17, %s11724_s17, %s11725_s18  }
  0x3e   : > { %s8438_s8 = scalar_lea.hbm %s11717_s2, 9216 }
  0x3f   : > { %p8439_p11 = scmp.ne.s32.totalorder %s11717_s2, %s8438_s8  ;;  %p8445_p0 = scmp.lt.u32.totalorder %s8438_s8, %s11717_s2 }
  0x41   : > { %p8441_p12 = pnand %p8439_p11, %p8734_p8 }
  0x43   : > { %p8442_p13 = pneg %p8441_p12 }
  0x45   : > { %p8447_p2 = pnand %p8445_p0, %p8442_p13 }
  0x47   : > { %8450 = shalt.err (!%p8447_p2)
}
  0x48   : > { %s8451_s14 = scalar_lea.vmem %s213_s9, 9216  ;;  %p8459_p4 = scmp.lt.s32.totalorder %s213_s9, %s213_s9 }
  0x49   : > { %p8452_p5 = scmp.ne.s32.totalorder %s213_s9, %s8451_s14  ;;  %p8460_p10 = scmp.lt.s32.totalorder %s8451_s14, %s8451_s14 }
  0x4b   : > { %p8454_p7 = pnand %p8452_p5, %p8734_p8  ;;  %p8461_p1 = por %p8460_p10, %p8459_p4 }
  0x4d   : > { %p8455_p9 = pneg %p8454_p7 }
  0x4f   : > { %p8462_p3 = pnand %p8461_p1, %p8455_p9 }
  0x51   : > { %8465 = shalt.err (!%p8462_p3)
}
  0x52   : > { %8044 = dma.hbm_to_vmem [thread:$0]  (!%p8718_p6), %s11717_s2, 9216, %s213_s9, [#allocation7], %s11724_s17, %s11724_s17, %s11725_s18  }
  0x53   : > { %s8639_s26 = smov [#allocation11]   ;;  %s8640_s20 = smov [#allocation12]  }
  0x54   : > { %s239_s19 = sshll.u32 %s8639_s26, 4  ;;  %s250_s25 = sshll.u32 %s8640_s20, 4  ;;  %s240_s19 = int_to_ptr.vmem [resolvable:$true] %s239_s19  ;;  %s251_s25 = int_to_ptr.vmem [resolvable:$true] %s250_s25 }
  0x55   : > { %s8466_s10 = scalar_lea.hbm %s11719_s4, 16 }
  0x56   : > { %p8467_p1 = scmp.ne.s32.totalorder %s11719_s4, %s8466_s10  ;;  %p8473_p12 = scmp.lt.u32.totalorder %s8466_s10, %s11719_s4 }
  0x58   : > { %p8469_p3 = pnand %p8467_p1, %p8734_p8 }
  0x5a   : > { %p8470_p11 = pneg %p8469_p3 }
  0x5c   : > { %p8475_p13 = pnand %p8473_p12, %p8470_p11 }
  0x5e   : > { %8478 = shalt.err (!%p8475_p13)
}
  0x5f   : > { %s8479_s9 = scalar_lea.vmem %s240_s19, 16  ;;  %s8486_s7 = scalar_lea.vmem %s240_s19, 32 }
  0x60   : > { %p8480_p0 = scmp.ne.s32.totalorder %s240_s19, %s8479_s9  ;;  %p8487_p7 = scmp.lt.s32.totalorder %s240_s19, %s240_s19 }
  0x61   : > { %p8488_p9 = scmp.lt.s32.totalorder %s8486_s7, %s8479_s9 }
  0x62   : > { %p8482_p2 = pnand %p8480_p0, %p8734_p8 }
  0x63   : > { %p8489_p4 = por %p8488_p9, %p8487_p7 }
  0x64   : > { %p8483_p5 = pneg %p8482_p2 }
  0x66   : > { %p8490_p10 = pnand %p8489_p4, %p8483_p5 }
  0x68   : > { %8493 = shalt.err (!%p8490_p10)
}
  0x69   : > { %8050 = dma.hbm_to_vmem [thread:$0]  (!%p8718_p6), %s11719_s4, 16, %s240_s19, [#allocation10]  }
  0x6a   : > { %s8494_s8 = scalar_lea.hbm %s11720_s5, 16 }
  0x6b   : > { %p8495_p1 = scmp.ne.s32.totalorder %s11720_s5, %s8494_s8  ;;  %p8501_p12 = scmp.lt.u32.totalorder %s8494_s8, %s11720_s5 }
  0x6d   : > { %p8497_p3 = pnand %p8495_p1, %p8734_p8 }
  0x6f   : > { %p8498_p11 = pneg %p8497_p3 }
  0x71   : > { %p8503_p13 = pnand %p8501_p12, %p8498_p11 }
  0x73   : > { %8506 = shalt.err (!%p8503_p13)
}
  0x74   : > { %s8507_s14 = scalar_lea.vmem %s251_s25, 16  ;;  %s8514_s19 = scalar_lea.vmem %s251_s25, 32 }
  0x75   : > { %p8508_p0 = scmp.ne.s32.totalorder %s251_s25, %s8507_s14  ;;  %p8515_p7 = scmp.lt.s32.totalorder %s251_s25, %s251_s25 }
  0x76   : > { %p8516_p9 = scmp.lt.s32.totalorder %s8514_s19, %s8507_s14 }
  0x77   : > { %p8510_p2 = pnand %p8508_p0, %p8734_p8 }
  0x78   : > { %p8517_p4 = por %p8516_p9, %p8515_p7 }
  0x79   : > { %p8511_p5 = pneg %p8510_p2 }
  0x7b   : > { %p8518_p10 = pnand %p8517_p4, %p8511_p5 }
  0x7d   : > { %8521 = shalt.err (!%p8518_p10)
}
  0x7e   : > { %8053 = dma.hbm_to_vmem [thread:$0]  (!%p8718_p6), %s11720_s5, 16, %s251_s25, [#allocation13]  }
  0x7f   : > { %s7130_s15 = sadd.s32 4294967294, %s8630_s24   ;;  %s8841_s29 = sadd.s32 1, %s8630_s24  }
  0x80   : > { %s32_s16 = sadd.s32 1, %s8626_s23  ;;  %s29_s26 = ssub.s32 %s8630_s24, %s8841_s29 }
  0x81   : > { %p39_p8 = scmp.ne.s32.totalorder %s8626_s23, %s8622_s22  ;;  %p30_p1 = scmp.eq.s32.totalorder %s29_s26, 0 }
  0x82   : > { %p40_p3 = scmp.eq.s32.totalorder %s8630_s24, 0  ;;  %p45_p11 = scmp.ne.s32.totalorder %s8622_s22, %s8618_s21 }
  0x83   : > { %p174_p12 = scmp.eq.s32.totalorder %s8702_s27, 1  ;;  %p11741_p0 = scmp.eq.s32.totalorder %s8702_s27, 0 }
  0x84   : > { %s8853_s20 = scalar_select %p30_p1, %s8626_s23, %s32_s16  }
  0x85   : > { %p41_p13 = por %p40_p3, %p39_p8  ;;  %p8857_p2 = por %p11741_p0, %p45_p11 }
  0x86   : > { %p8861_p6 = por %p174_p12, %p39_p8  ;;  %p180_p5 = scmp.eq.s32.totalorder %s7130_s15, 1 }
  0x87   : > { %p8067_p7 = scmp.lt.s32.totalorder %s8630_s24, 2  ;;  %s261_s8 = sand.u32 1, %s8626_s23  }
  0x88   : > { %s11743_s25 = scalar_select %p8861_p6, 1, 0 }
  0x89   : > { %p8867_p9 = por %p180_p5, %p45_p11  ;;  %s8009_s11 = smul.u32 164, %s261_s8 }
  0x8a   : > { %p8871_p4 = pnand %p8067_p7, %p41_p13  ;;  %s8010_s13 = smul.u32 2624, %s8630_s24 }
  0x8b   : > { %s11744_s10 = scalar_select %p8867_p9, 1, 0 }
  0x8c   : > { %s8879_s9 = scalar_lea.hbm %s11715_s0, %s8010_s13  ;;  %s265_s7 = scalar_lea.vmem [#allocation3], %s8009_s11 }
  0x8d   : > { %s272_s15 = sshll.u32 %s265_s7, 4  ;;  %s8883_s16 = scalar_lea.sflag [#allocation4], %s261_s8  ;;  %s8881_s15 = int_to_ptr.vmem [resolvable:$true] %s272_s15 }
  0x8e   : > { %s8522_s26 = scalar_lea.hbm %s8879_s9, 2624  ;;  %p8524_p8 = pneg %p8871_p4 }
  0x8f   : > { %p8523_p10 = scmp.ne.s32.totalorder %s8879_s9, %s8522_s26  ;;  %s8527_s19 = scalar_lea.hbm %s11715_s0, 5248 }
  0x90   : > { %p8528_p11 = scmp.lt.u32.totalorder %s8879_s9, %s11715_s0  ;;  %p8529_p12 = scmp.lt.u32.totalorder %s8527_s19, %s8522_s26 }
  0x91   : > { %p8525_p1 = pnand %p8524_p8, %p8523_p10  ;;  %p8531_p0 = scmp.lt.u32.totalorder %s8522_s26, %s8879_s9 }
  0x92   : > { %p8530_p13 = por %p8529_p12, %p8528_p11 }
  0x93   : > { %p8526_p3 = pneg %p8525_p1 }
  0x94   : > { %p8532_p5 = por %p8531_p0, %p8530_p13 }
  0x96   : > { %p8533_p7 = pnand %p8532_p5, %p8526_p3 }
  0x98   : > { %8536 = shalt.err (!%p8533_p7)
}
  0x99   : > { %s8537_s8 = scalar_lea.vmem %s8881_s15, 2624  ;;  %s8641_s11 = smov [#allocation3]  }
  0x9a   : > { %p8538_p10 = scmp.ne.s32.totalorder %s8881_s15, %s8537_s8  ;;  %s8542_s7 = sshll.u32 %s8641_s11, 4  ;;  %s8543_s7 = int_to_ptr.vmem [resolvable:$false] %s8542_s7 }
  0x9b   : > { %s8544_s17 = scalar_lea.vmem %s8543_s7, 5248  ;;  %p8545_p6 = scmp.lt.s32.totalorder %s8881_s15, %s8543_s7 }
  0x9c   : > { %p8540_p1 = pnand %p8538_p10, %p8524_p8  ;;  %p8546_p11 = scmp.lt.s32.totalorder %s8544_s17, %s8537_s8 }
  0x9e   : > { %p8541_p9 = pneg %p8540_p1  ;;  %p8547_p12 = por %p8546_p11, %p8545_p6 }
  0xa0   : > { %p8548_p13 = pnand %p8547_p12, %p8541_p9 }
  0xa2   : > { %8551 = shalt.err (!%p8548_p13)
}
  0xa3   : > { %s11746_s18 = smov 4   ;;  %s11747_s26 = smov 64  }
  0xa4   : > { %8057 = dma.hbm_to_vmem [thread:$0]  (!%p8871_p4), %s8879_s9, 2624, %s8881_s15, %s8883_s16, %s11747_s26, %s11747_s26, %s11746_s18  }
  0xa5   : > { %p11748_p8 = scmp.ne.s32.totalorder %s11738_s28, 0 }
  0xa7   : > { %284 = sbr.rel (%p11748_p8) target bundleno = 1363 (0x553), region = 44 }
  0xae   : > { %s8917_s13 = sand.u32 1, %s8622_s22  }
  0xaf   : > { %s8011_s14 = smul.u32 164, %s8917_s13  ;;  %s287_s19 = scalar_lea.sflag [#allocation4], %s8917_s13 }
  0xb1   : > { %s8921_s8 = scalar_lea.vmem [#allocation3], %s8011_s14 }
  0xb2   : > { %8597 = dma.done.wait (%p8857_p2), %s287_s19, 2624  }
  0xb3   : > { %8599 = vsyncadd (%p8857_p2), %s287_s19, 4294964672  ;;  %p11749_p6 = scmp.eq.s32.totalorder %s8702_s27, 0 }
  0xb5   : > { %8601 = dma.done.wait (%p11749_p6), [#allocation7], 13824   ;;  %p11750_p9 = pmov %p11749_p6 }
  0xb6   : > { %p11751_p4 = pmov %p11749_p6 }
  0xb7   : > { %8603 = vsyncadd (%p11750_p9), [#allocation7], 4294953472 }
  0xb8   : > { %8605 = dma.done.wait (%p11751_p4), [#allocation10], 9232   ;;  %p11752_p3 = pmov %p11751_p4 }
  0xba   : > { %8607 = vsyncadd (%p11752_p3), [#allocation10], 4294958064  ;;  %p11753_p0 = pmov %p11752_p3 }
  0xbc   : > { %8609 = dma.done.wait (%p11753_p0), [#allocation13], 16   ;;  %p11754_p5 = pmov %p11753_p0 }
  0xbd   : > { %v11729_v0 = vmov 0   ;;  %v8120_v1 = vld [vmem:[#allocation8 + $0xc0] sm:$0xff]   ;;  %v8122_v3 = vld [vmem:[#allocation8 + $0xc8] sm:$0xff]   ;;  %v8125_v5 = vld [vmem:[#allocation8 + $0x150] sm:$0xff]   ;;  %vm670_vm0 = vcmask 1046528   ;;  %vm2349_vm2 = vcmask 1045504  }
  0xbe   : > { %8611 = vsyncadd (%p11754_p5), [#allocation13], 4294967280  ;;  %1122 = vmatprep.subr.bf16.mxu0 %v11729_v0  ;;  %340 = vst [vmem:[#allocation2] sm:$0xf] %v11729_v0  ;;  %8118 = vset.pattern.permute.xlu0 %v11729_v0  ;;  %v8121_v2 = vld [vmem:[#allocation8 + $0x140] sm:$0xff]   ;;  %v8123_v4 = vld [vmem:[#allocation8 + $0x148] sm:$0xff]  }
  0xbf   : > { %341 = vst [vmem:[#allocation2 + $0x4] sm:$0xf] %v11729_v0  ;;  %354 = vst [vmem:[#allocation2 + $0x9c] sm:$0xf] %v11729_v0  ;;  %8119 = vset.pattern.permute.xlu1 %v11729_v0  ;;  %1123 = vmatpush1.bf16.msra.mxu0 %v8120_v1  ;;  %v8124_v6 = vld [vmem:[#allocation8 + $0xd0] sm:$0xff]   ;;  %v8127_v7 = vld [vmem:[#allocation8 + $0x158] sm:$0xff]  }
  0xc0   : > { %355 = vst [vmem:[#allocation2 + $0xa0] sm:$0x3] %v11729_v0  ;;  %7697 = vmatprep.subr.bf16.mxu1 %v8121_v2  ;;  %1124 = vmatprep.subr.bf16.mxu0 %v11729_v0  ;;  %v8126_v8 = vld [vmem:[#allocation8 + $0xd8] sm:$0xff]   ;;  %v8129_v9 = vld [vmem:[#allocation8 + $0x160] sm:$0xff]   ;;  %v8131_v11 = vld [vmem:[#allocation8 + $0x168] sm:$0xff]   ;;  %vm342_vm3 = vcmask 1041408  }
  0xc1   : > { %7698 = vmatpush3.bf16.msra.mxu1 %v8121_v2  ;;  %v8128_v10 = vld [vmem:[#allocation8 + $0xe0] sm:$0xff]   ;;  %v8130_v13 = vld [vmem:[#allocation8 + $0xe8] sm:$0xff]   ;;  %v8957_v15 = vld [vmem:[%s8921_s8 + $0x18] sm:$0xff]   ;;  %vm505_vm1 = vsmask.f32 7424  ;;  %vm3886_vm7 = vcmask 1043457  }
  0xc2   : > { %7699 = vmatprep.subr.bf16.mxu1 %v8123_v4  ;;  %v8951_v12 = vld [vmem:[%s8921_s8 + $0xc] sm:$0xf]  ;;  %v8954_v14 = vld [vmem:[%s8921_s8 + $0x10] sm:$0xff]   ;;  %v776_v16 = vld [vmem:[%s8921_s8 + $0x8] sm:$0xc]  ;;  %v676_v19 = vrot.slane %v8957_v15, 1 }
  0xc3   : > { %1125 = vmatpush1.bf16.msra.mxu0 %v8122_v3  ;;  %v8133_v17 = vld [vmem:[#allocation8 + $0x170] sm:$0xff]   ;;  %v8962_v18 = vrot.slane %v8954_v14, 1  ;;  %v7168_v20 = vcombine.low %v776_v16, %v8951_v12  ;;  %v8967_v21 = vld [vmem:[%s8921_s8 + $0x20] sm:$0xff]   ;;  %v8975_v26 = vld [vmem:[%s8921_s8 + $0x28] sm:$0xff]   ;;  %v522_v42 = vshll.u32 %v8954_v14, 16  ;;  %v526_v53 = vshrl.u32 %v8954_v14, 16 }
  0xc4   : > { %1126 = vmatprep.subr.bf16.mxu0 %v11729_v0  ;;  %v8132_v22 = vld [vmem:[#allocation8 + $0xf0] sm:$0xff]   ;;  %v678_v25 = vrot.slane %v8967_v21, 1  ;;  %v680_v29 = vrot.slane %v8975_v26, 1  ;;  %v8135_v31 = vld [vmem:[#allocation8 + $0x178] sm:$0xff]   ;;  %v8141_v41 = vld [vmem:[#allocation8 + $0x100] sm:$0xff]   ;;  %v530_v55 = vshll.u32 %v8957_v15, 16 }
  0xc5   : > { %7700 = vmatpush3.bf16.msra.mxu1 %v8123_v4  ;;  %11755 = vst [vmem:[#allocation20_spill] sm:$0xff] %v8962_v18  ;;  %v8971_v23 = vsel %vm670_vm0, %v8962_v18, %v676_v19  ;;  %v812_v24 = vrot.slane %v7168_v20, 1  ;;  %v8983_v30 = vld [vmem:[%s8921_s8 + $0x30] sm:$0xff]   ;;  %v8134_v34 = vld [vmem:[#allocation8 + $0xf8] sm:$0xff]   ;;  %v772_v43 = vld [vmem:[%s8921_s8 + $0x8] sm:$0xe] }
  0xc6   : > { %7701 = vmatprep.subr.bf16.mxu1 %v8125_v5  ;;  %11756 = vst [vmem:[#allocation21_spill] sm:$0xff] %v8971_v23  ;;  %v873_v27 = vrot.slane %v8971_v23, 1  ;;  %v8986_v33 = vsel %vm670_vm0, %v676_v19, %v678_v25  ;;  %v8989_v35 = vsel %vm670_vm0, %v678_v25, %v680_v29  ;;  %v682_v38 = vrot.slane %v8983_v30, 1  ;;  %v8997_v40 = vld [vmem:[%s8921_s8 + $0x38] sm:$0xff]   ;;  %v8143_v46 = vld [vmem:[#allocation8 + $0x108] sm:$0xff]   ;;  %v8147_v47 = vld [vmem:[#allocation8] sm:$0xff]  }
  0xc7   : > { %1127 = vmatpush1.bf16.msra.mxu0 %v8124_v6  ;;  %v813_v28 = vsel %vm670_vm0, %v812_v24, %v8962_v18  ;;  %11757 = vst [vmem:[#allocation22_spill] sm:$0xff] %v8986_v33  ;;  %v877_v37 = vrot.slane %v8986_v33, 1  ;;  %v881_v39 = vrot.slane %v8989_v35, 1  ;;  %v684_v44 = vrot.slane %v8997_v40, 1  ;;  %v9010_v50 = vld [vmem:[%s8921_s8 + $0x40] sm:$0xff]   ;;  %v9020_v54 = vld [vmem:[%s8921_s8 + $0x48] sm:$0xff]  }
  0xc8   : > { %1128 = vmatprep.subr.bf16.mxu0 %v11729_v0  ;;  %v872_v32 = vrot.slane %v813_v28, 1  ;;  %v9006_v49 = vsel %vm670_vm0, %v680_v29, %v682_v38  ;;  %v9015_v52 = vrot.slane %v522_v42, 1  ;;  %v9024_v56 = vcombine.low %v772_v43, %v8951_v12  ;;  %v8145_v57 = vld [vmem:[#allocation8 + $0x110] sm:$0xff]   ;;  %v8149_v59 = vld [vmem:[#allocation8 + $0x8] sm:$0xff]   ;;  %v8151_v25 = vld [vmem:[#allocation8 + $0x120] sm:$0xff]   ;;  %s8012_s28 = smul.u32 288, %s8917_s13 }
  0xc9   : > { %7702 = vmatpush3.bf16.msra.mxu1 %v8125_v5  ;;  %v878_v45 = vsel %vm670_vm0, %v873_v27, %v877_v37  ;;  %v882_v48 = vsel %vm670_vm0, %v877_v37, %v881_v39  ;;  %v9013_v51 = vsel %vm670_vm0, %v682_v38, %v684_v44  ;;  %v885_v58 = vrot.slane %v9006_v49, 1  ;;  %v8153_v3 = vld [vmem:[#allocation8 + $0x10] sm:$0xff]   ;;  %v9063_v29 = vld [vmem:[%s8921_s8 + $0x60] sm:$0xff]   ;;  %v9078_v42 = vld [vmem:[%s8921_s8 + $0x68] sm:$0xff]   ;;  %s8013_s12 = smul.u32 4608, %s8702_s27  ;;  %s6996_s27 = scalar_lea.sflag [#allocation5], %s8917_s13 }
  0xca   : > { %7703 = vmatprep.subr.bf16.mxu1 %v8127_v7  ;;  %v874_v36 = vsel %vm670_vm0, %v872_v32, %v873_v27  ;;  %v889_v60 = vrot.slane %v9013_v51, 1  ;;  %v686_v61 = vrot.slane %v9010_v50, 1  ;;  %v688_v62 = vrot.slane %v9020_v54, 1  ;;  %v9035_v4 = vld [vmem:[%s8921_s8 + $0x50] sm:$0xff]   ;;  %v9051_v16 = vld [vmem:[%s8921_s8 + $0x58] sm:$0xff]   ;;  %v8159_v37 = vld [vmem:[#allocation8 + $0x20] sm:$0xff]  }
  0xcb   : > { %1129 = vmatpush1.bf16.msra.mxu0 %v8126_v8  ;;  %7713 = vmatprep.mubr.bf16.mxu1 %v874_v36  ;;  %v528_v63 = vor.u32 %v526_v53, %v9015_v52  ;;  %v532_v1 = vrot.slane %v530_v55, 1  ;;  %v886_v2 = vsel %vm670_vm0, %v881_v39, %v885_v58  ;;  %v789_v5 = vshrl.u32 %v9024_v56, 16  ;;  %v8154_v43 = vld [vmem:[#allocation8 + $0x128] sm:$0xff]   ;;  %v8157_v53 = vld [vmem:[#allocation8 + $0x130] sm:$0xff]   ;;  %s11471_s30 = scalar_lea.vmem [#allocation14], %s8012_s28  ;;  %s11667_s11 = scalar_lea.hbm %s11721_s6, %s8013_s12 }
  0xcc   : > { %1130 = vmatprep.subr.bf16.mxu0 %v11729_v0  ;;  %v791_v6 = vshll.u32 %v9024_v56, 16  ;;  %v890_v8 = vsel %vm670_vm0, %v885_v58, %v889_v60  ;;  %v690_v19 = vrot.slane %v9035_v4, 1  ;;  %v692_v28 = vrot.slane %v9051_v16, 1  ;;  %v9090_v58 = vld [vmem:[%s8921_s8 + $0x70] sm:$0xff]   ;;  %s7009_s9 = sshll.u32 %s11471_s30, 4  ;;  %p11822_p7 = scmp.ne.s32.totalorder %s11743_s25, 0  ;;  %s11670_s9 = int_to_ptr.vmem [resolvable:$true] %s7009_s9 }
  0xcd   : > { %7704 = vmatpush3.bf16.msra.mxu1 %v8127_v7  ;;  %v8148_v7 = vld [vmem:[#allocation8 + $0x118] sm:$0xff]   ;;  %v538_v32 = vshll.u32 %v8967_v21, 16  ;;  %v534_v38 = vshrl.u32 %v8957_v15, 16  ;;  %vm343_vm4 = vsmask.f32 1280  ;;  %vm348_vm11 = vcmask 1043456  }
  0xce   : > { %7705 = vmatprep.subr.bf16.mxu1 %v8129_v9  ;;  %v793_v14 = vrot.slane %v791_v6, 1  ;;  %v9069_v36 = vsel %vm670_vm0, %v688_v62, %v690_v19  ;;  %vm344_vm5 = vmand %vm342_vm3, %vm343_vm4  ;;  %vm3488_vm6 = vsmask.f32 5392  ;;  %vm3887_vm8 = vsmask.f32 7942  ;;  %s8552_s7 = scalar_lea.vmem %s11670_s9, 4608 }
  0xcf   : > { %1131 = vmatpush1.bf16.msra.mxu0 %v8128_v10  ;;  %v8155_v10 = vld [vmem:[#allocation8 + $0x18] sm:$0xff]   ;;  %v901_v15 = vrot.slane %v9069_v36, 1  ;;  %vm10135_vm9 = vmand %vm3886_vm7, %vm3887_vm8  ;;  %vm349_vm12 = vsmask.f32 7938  ;;  %vm3927_vm14 = vcmask 1040384   ;;  %p8553_p2 = scmp.ne.s32.totalorder %s11670_s9, %s8552_s7  ;;  %s8643_s17 = smov [#allocation14]  }
  0xd0   : > { %1132 = vmatprep.subr.bf16.mxu0 %v11729_v0  ;;  %v794_v20 = vor.u32 %v793_v14, %v789_v5  ;;  %v867_v5 = vrot.slane %v9024_v56, 1  ;;  %v8166_v14 = vld [vmem:[#allocation8 + $0x38] sm:$0xff]   ;;  %vm10141_vm10 = vmor %vm343_vm4, %vm3488_vm6  ;;  %vm3928_vm15 = vsmask.f32 256  ;;  %s8556_s18 = sshll.u32 %s8643_s17, 4  ;;  %s8557_s18 = int_to_ptr.vmem [resolvable:$false] %s8556_s18 }
  0xd1   : > { %7706 = vmatpush3.bf16.msra.mxu1 %v8129_v9  ;;  %v9041_v9 = vsel %vm670_vm0, %v684_v44, %v686_v61  ;;  %v9081_v44 = vsel %vm670_vm0, %v690_v19, %v692_v28  ;;  %vm350_vm13 = vmand %vm348_vm11, %vm349_vm12  ;;  %p8554_p10 = pnand %p8553_p2, %p11822_p7  ;;  %s8558_s26 = scalar_lea.vmem %s8557_s18, 9216 }
  0xd2   : > { %7707 = vmatprep.subr.bf16.mxu1 %v8131_v11  ;;  %v795_v27 = vsel %vm505_vm1, %v794_v20, %v9015_v52  ;;  %v905_v55 = vrot.slane %v9081_v44, 1  ;;  %vm10758_vm3 = vmand %vm3927_vm14, %vm3928_vm15  ;;  %p8559_p11 = scmp.lt.s32.totalorder %s11670_s9, %s8557_s18  ;;  %p8560_p12 = scmp.lt.s32.totalorder %s8558_s26, %s8552_s7 }
  0xd3   : > { %1133 = vmatpush1.bf16.msra.mxu0 %v8130_v13  ;;  %v9048_v13 = vsel %vm505_vm1, %v528_v63, %v532_v1  ;;  %p8555_p1 = pneg %p8554_p10 }
  0xd4   : > { %1134 = vmatprep.subr.bf16.mxu0 %v11729_v0  ;;  %v870_v24 = vrot.slane %v9048_v13, 1  ;;  %v906_v6 = vsel %vm670_vm0, %v901_v15, %v905_v55  ;;  %p8561_p13 = por %p8560_p12, %p8559_p11 }
  0xd5   : > { %7708 = vmatpush3.bf16.msra.mxu1 %v8131_v11  ;;  %v9045_v11 = vsel %vm670_vm0, %v686_v61, %v688_v62  ;;  %v546_v61 = vshll.u32 %v8975_v26, 16  ;;  %v358_v62 = vld [vmem:[%s8921_s8 + $0x8] sm:$0xf] }
  0xd6   : > { %7709 = vmatprep.subr.bf16.mxu1 %v8133_v17  ;;  %p8562_p8 = pnand %p8561_p13, %p8555_p1 }
  0xd7   : > { %1135 = vmatpush1.bf16.msra.mxu0 %v8132_v22  ;;  %v897_v22 = vrot.slane %v9045_v11, 1  ;;  %v548_v20 = vrot.slane %v546_v61, 1 }
  0xd8   : > { %1136 = vmatprep.subr.bf16.mxu0 %v11729_v0 }
  0xd9   : > { %7710 = vmatpush3.bf16.msra.mxu1 %v8133_v17  ;;  %v893_v17 = vrot.slane %v9041_v9, 1  ;;  %v902_v63 = vsel %vm670_vm0, %v897_v22, %v901_v15  ;;  %v8169_v15 = vld [vmem:[#allocation8 + $0x40] sm:$0xff]  }
  0xda   : > { %7711 = vmatprep.subr.bf16.mxu1 %v8135_v31 }
  0xdb   : > { %1137 = vmatpush1.bf16.msra.mxu0 %v8134_v34  ;;  %v894_v34 = vsel %vm670_vm0, %v889_v60, %v893_v17  ;;  %v898_v39 = vsel %vm670_vm0, %v893_v17, %v897_v22  ;;  %v542_v60 = vshrl.u32 %v8967_v21, 16  ;;  %v698_v17 = vrot.slane %v9090_v58, 1 }
  0xdc   : > { %1138 = vmatprep.subr.bf16.mxu0 %v11729_v0 }
  0xdd   : > { %7712 = vmatpush3.bf16.msra.mxu1 %v8135_v31  ;;  %v869_v31 = vrot.slane %v795_v27, 1  ;;  %v9121_v27 = vcombine.low %v358_v62, %v8951_v12  ;;  %v550_v12 = vshrl.u32 %v8975_v26, 16  ;;  %v8170_v62 = vld [vmem:[#allocation8 + $0x48] sm:$0xff]  }
  0xde   : > { %1620 = vmatprep.subr.bf16.mxu1 %v11729_v0 }
  0xdf   : > { %1139 = vmatpush1.bf16.msra.mxu0 %v8141_v41  ;;  %v871_v41 = vsel %vm670_vm0, %v869_v31, %v870_v24  ;;  %v8174_v31 = vld [vmem:[#allocation8 + $0x88] sm:$0xff]  }
  0xe0   : > { %7714 = vmatmul.mubr.bf16.vlgmr.msra.gmra.mrb[0].mxu1 %v878_v45  ;;  %1140 = vmatprep.subr.bf16.mxu0 %v11729_v0  ;;  %v8161_v45 = vld [vmem:[#allocation8 + $0x28] sm:$0xff]  }
  0xe1   : > { %7717 = vmatprep.mubr.bf16.mxu1 %v882_v48  ;;  %1621 = vmatpush1.bf16.msra.mxu1 %v8147_v47  ;;  %v540_v47 = vrot.slane %v538_v32, 1  ;;  %v536_v48 = vor.u32 %v534_v38, %v532_v1  ;;  %v8165_v1 = vld [vmem:[#allocation8 + $0x30] sm:$0xff]   ;;  %v868_v32 = vsel %vm670_vm0, %v867_v5, %v8962_v18  ;;  %v11762_v18 = vmov 0  }
  0xe2   : > { %1622 = vmatprep.subr.bf16.mxu1 %v11729_v0  ;;  %1154 = vmatprep.mubr.bf16.mxu0 %v871_v41  ;;  %v554_v41 = vshll.u32 %v8983_v30, 16 }
  0xe3   : > { %1141 = vmatpush1.bf16.msra.mxu0 %v8143_v46  ;;  %v694_v46 = vrot.slane %v9063_v29, 1  ;;  %v544_v19 = vor.u32 %v542_v60, %v540_v47  ;;  %v8182_v60 = vld [vmem:[#allocation8 + $0x90] sm:$0xff]  }
  0xe4   : > { %1142 = vmatprep.subr.bf16.mxu0 %v11729_v0 }
  0xe5   : > { %1623 = vmatpush1.bf16.msra.mxu1 %v8149_v59  ;;  %v9094_v59 = vsel %vm670_vm0, %v692_v28, %v694_v46 }
  0xe6   : > { %1624 = vmatprep.subr.bf16.mxu1 %v11729_v0 }
  0xe7   : > { %1143 = vmatpush1.bf16.msra.mxu0 %v8145_v57  ;;  %v696_v57 = vrot.slane %v9078_v42, 1 }
  0xe8   : > { %7718 = vmatmul.mubr.bf16.gmra.mrb[4].mxu1 %v886_v2  ;;  %1144 = vmatprep.subr.bf16.mxu0 %v11729_v0  ;;  %v9101_v2 = vsel %vm505_vm1, %v536_v48, %v540_v47  ;;  %v514_v47 = vshll.u32 %v9121_v27, 16 }
  0xe9   : > { %7721 = vmatprep.mubr.bf16.mxu1 %v890_v8  ;;  %1625 = vmatpush1.bf16.msra.mxu1 %v8153_v3  ;;  %v8160_v3 = vld [vmem:[#allocation8 + $0x138] sm:$0xff]   ;;  %v9107_v21 = vsel %vm670_vm0, %v694_v46, %v696_v57  ;;  %v875_v56 = vrot.slane %v9101_v2, 1  ;;  %v9140_v46 = vsel %vm670_vm0, %v696_v57, %v698_v17  ;;  %v556_v57 = vrot.slane %v554_v41, 1 }
  0xea   : > { %1626 = vmatprep.subr.bf16.mxu1 %v11729_v0  ;;  %v9110_v8 = vld [vmem:[%s8921_s8 + $0x78] sm:$0xff]   ;;  %v913_v22 = vrot.slane %v9107_v21, 1  ;;  %v917_v61 = vrot.slane %v9140_v46, 1 }
  0xeb   : > { %1145 = vmatpush1.bf16.msra.mxu0 %v8148_v7  ;;  %v8163_v7 = vld [vmem:[#allocation8 + $0x80] sm:$0xff]   ;;  %v700_v28 = vrot.slane %v9110_v8, 1  ;;  %v876_v38 = vsel %vm670_vm0, %v870_v24, %v875_v56 }
  0xec   : > { %1146 = vmatprep.subr.bf16.mxu0 %v11729_v0 }
  0xed   : > { %1627 = vmatpush1.bf16.msra.mxu1 %v8155_v10  ;;  %v909_v10 = vrot.slane %v9094_v59, 1  ;;  %v9148_v48 = vsel %vm670_vm0, %v698_v17, %v700_v28 }
  0xee   : > { %1628 = vmatprep.subr.bf16.mxu1 %v11729_v0 }
  0xef   : > { %1147 = vmatpush1.bf16.msra.mxu0 %v8151_v25  ;;  %v9118_v25 = vld [vmem:[%s8921_s8 + $0x80] sm:$0xff]  }
  0xf0   : > { %7722 = vmatmul.mubr.bf16.gmra.mrb[8].mxu1 %v894_v34  ;;  %1148 = vmatprep.subr.bf16.mxu0 %v11729_v0  ;;  %v390_v34 = vld [vmem:[%s8921_s8 + $0x88] sm:$0xf] }
  0xf1   : > { %7725 = vmatprep.mubr.bf16.mxu1 %v898_v39  ;;  %1629 = vmatpush1.bf16.msra.mxu1 %v8159_v37  ;;  %v392_v37 = vld [vmem:[%s8921_s8 + $0x8c] sm:$0xf]  ;;  %v9133_v39 = vsel %vm505_vm1, %v544_v19, %v548_v20 }
  0xf2   : > { %1630 = vmatprep.subr.bf16.mxu1 %v11729_v0  ;;  %v9143_v24 = vcombine.low %v390_v34, %v392_v37  ;;  %v879_v26 = vrot.slane %v9133_v39, 1  ;;  %v8185_v34 = vld [vmem:[#allocation8 + $0x98] sm:$0xff]  }
  0xf3   : > { %1149 = vmatpush1.bf16.msra.mxu0 %v8154_v43  ;;  %v910_v43 = vsel %vm670_vm0, %v905_v55, %v909_v10  ;;  %v552_v55 = vor.u32 %v550_v12, %v548_v20 }
  0xf4   : > { %1150 = vmatprep.subr.bf16.mxu0 %v11729_v0  ;;  %v9158_v5 = vrot.slane %v9143_v24, 1  ;;  %v880_v17 = vsel %vm670_vm0, %v875_v56, %v879_v26 }
  0xf5   : > { %1631 = vmatpush1.bf16.msra.mxu1 %v8161_v45  ;;  %v914_v45 = vsel %vm670_vm0, %v909_v10, %v913_v22  ;;  %v562_v10 = vshll.u32 %v8997_v40, 16  ;;  %v9171_v20 = vsel %vm505_vm1, %v552_v55, %v556_v57  ;;  %v570_v55 = vshll.u32 %v9010_v50, 16 }
  0xf6   : > { %1632 = vmatprep.subr.bf16.mxu1 %v11729_v0  ;;  %11758 = vst [vmem:[#allocation23_spill] sm:$0xff] %v9158_v5  ;;  %v11727_v12 = vrot.slane %v9171_v20, 1 }
  0xf7   : > { %1151 = vmatpush1.bf16.msra.mxu0 %v8157_v53  ;;  %v702_v53 = vrot.slane %v9118_v25, 1  ;;  %v564_v41 = vrot.slane %v562_v10, 1  ;;  %v8190_v10 = vld [vmem:[#allocation8 + $0xa8] sm:$0xff]  }
  0xf8   : > { %7726 = vmatmul.mubr.bf16.gmra.mrb[12].mxu1 %v902_v63  ;;  %1152 = vmatprep.subr.bf16.mxu0 %v11729_v0  ;;  %v9152_v63 = vrot.slane %v514_v47, 1 }
  0xf9   : > { %7729 = vmatprep.mubr.bf16.mxu1 %v906_v6  ;;  %1633 = vmatpush1.bf16.msra.mxu1 %v8165_v1  ;;  %v518_v1 = vshrl.u32 %v9121_v27, 16  ;;  %v9161_v6 = vld [vmem:[%s8921_s8 + $0x90] sm:$0xff]   ;;  %v9168_v19 = vsel %vm670_vm0, %v700_v28, %v702_v53  ;;  %v9186_v28 = vsel %vm670_vm0, %v702_v53, %v9158_v5  ;;  %v566_v53 = vshrl.u32 %v8997_v40, 16 }
  0xfa   : > { %1634 = vmatprep.subr.bf16.mxu1 %v11729_v0  ;;  %v929_v47 = vrot.slane %v9186_v28, 1  ;;  %v884_v40 = vsel %vm670_vm0, %v879_v26, %v11727_v12  ;;  %v646_v12 = vshrl.u32 %v9143_v24, 16  ;;  %v393_v26 = vld [vmem:[%s8921_s8] sm:$0xe] }
  0xfb   : > { %1153 = vmatpush1.bf16.msra.mxu0 %v8160_v3  ;;  %v921_v3 = vrot.slane %v9148_v48, 1 }
  0xfc   : > { %7749 = vmatprep.subr.bf16.mxu0 %v8163_v7 }
  0xfd   : > { %1635 = vmatpush1.bf16.msra.mxu1 %v8166_v14  ;;  %v520_v14 = vor.u32 %v518_v1, %v9152_v63  ;;  %v922_v56 = vsel %vm670_vm0, %v917_v61, %v921_v3 }
  0xfe   : > { %1155 = vmatmul.mubr.bf16.vlgmr.msra.gmra.mrb[0].mxu0 %v868_v32  ;;  %1636 = vmatprep.subr.bf16.mxu1 %v11729_v0  ;;  %v9174_v32 = vld [vmem:[%s8921_s8 + $0x98] ss:$0 sps:$4 sm:$0x11]  }
  0xff   : > { %7750 = vmatpush3.bf16.msra.mxu0 %v8163_v7  ;;  %1162 = vmatprep.mubr.bf16.mxu0 %v876_v38  ;;  %v558_v7 = vshrl.u32 %v8983_v30, 16  ;;  %v8173_v30 = vld [vmem:[#allocation8 + $0x50] sm:$0xff]   ;;  %v9179_v37 = vsel %vm505_vm1, %v520_v14, %v9015_v52  ;;  %v9189_v38 = vrot.slane %v9161_v6, 1 }
 0x100   : > { %7730 = vmatmul.mubr.bf16.gmra.mrb[16].mxu1 %v910_v43  ;;  %7751 = vmatprep.subr.bf16.mxu0 %v8174_v31  ;;  %v816_v43 = vrot.slane %v9174_v32, 1 }
 0x101   : > { %7733 = vmatprep.mubr.bf16.mxu1 %v914_v45  ;;  %1637 = vmatpush1.bf16.msra.mxu1 %v8169_v15  ;;  %v560_v52 = vor.u32 %v558_v7, %v556_v57  ;;  %v8187_v15 = vld [vmem:[#allocation8 + $0xa0] sm:$0xff]   ;;  %v8175_v45 = vld [vmem:[#allocation8 + $0x58] sm:$0xff]   ;;  %v9201_v57 = vsel %vm670_vm0, %v9158_v5, %v9189_v38 }
 0x102   : > { %1638 = vmatprep.subr.bf16.mxu1 %v11729_v0  ;;  %v9216_v7 = vsel %vm670_vm0, %v9189_v38, %v816_v43  ;;  %v933_v14 = vrot.slane %v9201_v57, 1  ;;  %v8179_v43 = vld [vmem:[#allocation8 + $0x68] sm:$0xff]  }
 0x103   : > { %7752 = vmatpush3.bf16.msra.mxu0 %v8174_v31  ;;  %v918_v31 = vsel %vm670_vm0, %v913_v22, %v917_v61  ;;  %v925_v22 = vrot.slane %v9168_v19, 1  ;;  %v9205_v61 = vld [vmem:[%s8921_s8 + $0x4] sm:$0xf] }
 0x104   : > { %7753 = vmatprep.subr.bf16.mxu0 %v8182_v60 }
 0x105   : > { %1639 = vmatpush1.bf16.msra.mxu1 %v8170_v62  ;;  %v9208_v62 = vsel %vm505_vm1, %v560_v52, %v564_v41  ;;  %v926_v1 = vsel %vm670_vm0, %v921_v3, %v925_v22  ;;  %v930_v3 = vsel %vm670_vm0, %v925_v22, %v929_v47  ;;  %v574_v52 = vshrl.u32 %v9010_v50, 16 }
 0x106   : > { %1163 = vmatmul.mubr.bf16.gmra.mrb[4].mxu0 %v8971_v23  ;;  %1640 = vmatprep.subr.bf16.mxu1 %v11729_v0  ;;  %v638_v22 = vshrl.u32 %v9118_v25, 16  ;;  %v11759_v5 = vrot.slane %v9208_v62, 1  ;;  %v672_v23 = vrot.slane %v9121_v27, 1 }
 0x107   : > { %1170 = vmatprep.mubr.bf16.mxu0 %v880_v17  ;;  %7754 = vmatpush3.bf16.msra.mxu0 %v8182_v60  ;;  %v356_v60 = vld [vmem:[%s8921_s8] sm:$0xf]  ;;  %v8178_v17 = vld [vmem:[#allocation8 + $0x60] sm:$0xff]  }
 0x108   : > { %7734 = vmatmul.mubr.bf16.gmra.mrb[20].mxu1 %v918_v31  ;;  %7755 = vmatprep.subr.bf16.mxu0 %v8185_v34  ;;  %v568_v31 = vor.u32 %v566_v53, %v564_v41  ;;  %v805_v41 = vshll.u32 %v9174_v32, 16  ;;  %v7164_v32 = vcombine.low %v393_v26, %v9205_v61 }
 0x109   : > { %7737 = vmatprep.mubr.bf16.mxu1 %v922_v56  ;;  %1641 = vmatpush1.bf16.msra.mxu1 %v8173_v30  ;;  %v9219_v30 = vrot.slane %v570_v55, 1  ;;  %v9227_v56 = vcombine.low %v356_v60, %v9205_v61  ;;  %v642_v55 = vshll.u32 %v9143_v24, 16  ;;  %v934_v60 = vsel %vm670_vm0, %v929_v47, %v933_v14  ;;  %v8181_v47 = vld [vmem:[#allocation8 + $0x70] sm:$0xff]  }
 0x10a   : > { %1642 = vmatprep.subr.bf16.mxu1 %v11729_v0 }
 0x10b   : > { %7756 = vmatpush3.bf16.msra.mxu0 %v8185_v34  ;;  %v634_v34 = vshll.u32 %v9118_v25, 16  ;;  %v9239_v50 = vsel %vm505_vm1, %v568_v31, %v9219_v30  ;;  %v509_v25 = vshll.u32 %v9227_v56, 16  ;;  %v801_v31 = vshrl.u32 %v9161_v6, 16 }
 0x10c   : > { %7757 = vmatprep.subr.bf16.mxu0 %v8187_v15 }
 0x10d   : > { %1643 = vmatpush1.bf16.msra.mxu1 %v8175_v45  ;;  %v8193_v45 = vld [vmem:[#allocation8 + $0xb0] sm:$0xff]   ;;  %v9231_v53 = vrot.slane %v634_v34, 1  ;;  %v644_v34 = vrot.slane %v642_v55, 1 }
 0x10e   : > { %1171 = vmatmul.mubr.bf16.gmra.mrb[8].mxu0 %v8986_v33  ;;  %1644 = vmatprep.subr.bf16.mxu1 %v11729_v0 }
 0x10f   : > { %1178 = vmatprep.mubr.bf16.mxu0 %v884_v40  ;;  %7758 = vmatpush3.bf16.msra.mxu0 %v8187_v15  ;;  %v578_v15 = vshll.u32 %v9020_v54, 16  ;;  %v582_v40 = vshrl.u32 %v9020_v54, 16  ;;  %v640_v24 = vor.u32 %v638_v22, %v9231_v53  ;;  %v891_v54 = vrot.slane %v9239_v50, 1 }
 0x110   : > { %7738 = vmatmul.mubr.bf16.gmra.mrb[24].mxu1 %v926_v1  ;;  %7759 = vmatprep.subr.bf16.mxu0 %v8190_v10  ;;  %v797_v1 = vshll.u32 %v9161_v6, 16  ;;  %v9260_v55 = vor.u32 %v646_v12, %v644_v34 }
 0x111   : > { %7741 = vmatprep.mubr.bf16.mxu1 %v930_v3  ;;  %1645 = vmatpush1.bf16.msra.mxu1 %v8178_v17  ;;  %v507_v17 = vshrl.u32 %v9227_v56, 16  ;;  %v9258_v22 = vsel %vm505_vm1, %v640_v24, %v644_v34  ;;  %v511_v24 = vrot.slane %v509_v25, 1  ;;  %v671_v34 = vrot.slane %v7164_v32, 1 }
 0x112   : > { %1646 = vmatprep.subr.bf16.mxu1 %v11729_v0  ;;  %v799_v3 = vrot.slane %v797_v1, 1  ;;  %v11760_v0 = vrot.slane %v9171_v20, 1  ;;  %v807_v1 = vrot.slane %v805_v41, 1  ;;  %v927_v12 = vrot.slane %v9258_v22, 1  ;;  %v8183_v41 = vld [vmem:[#allocation8 + $0x78] sm:$0xff]  }
 0x113   : > { %7760 = vmatpush3.bf16.msra.mxu0 %v8190_v10  ;;  %v8196_v10 = vld [vmem:[#allocation8 + $0xb8] sm:$0xff]   ;;  %v590_v32 = vshrl.u32 %v9035_v4, 16 }
 0x114   : > { %v888_v33 = vsel %vm670_vm0, %v11760_v0, %v11759_v5  ;;  %7761 = vmatprep.subr.bf16.mxu0 %v8193_v45  ;;  %v803_v6 = vor.u32 %v801_v31, %v799_v3  ;;  %v11761_v0 = vrot.slane %v9216_v7, 1  ;;  %v580_v31 = vrot.slane %v578_v15, 1 }
 0x115   : > { %1647 = vmatpush1.bf16.msra.mxu1 %v8179_v43  ;;  %v800_v43 = vsel %vm505_vm1, %v9260_v55, %v799_v3  ;;  %v512_v15 = vor.u32 %v511_v24, %v507_v17 }
 0x116   : > { %1179 = vmatmul.mubr.bf16.gmra.mrb[12].mxu0 %v8989_v35  ;;  %v938_v5 = vsel %vm670_vm0, %v933_v14, %v11761_v0  ;;  %1648 = vmatprep.subr.bf16.mxu1 %v11762_v18  ;;  %v931_v61 = vrot.slane %v800_v43, 1  ;;  %v9273_v26 = vsel %vm505_vm1, %v803_v6, %v807_v1  ;;  %v586_v14 = vshll.u32 %v9035_v4, 16  ;;  %v9277_v0 = vld [vmem:[#allocation8 + $0x200] sm:$0xff]  }
 0x117   : > { %1186 = vmatprep.mubr.bf16.mxu0 %v888_v33  ;;  %7762 = vmatpush3.bf16.msra.mxu0 %v8193_v45  ;;  %v935_v25 = vrot.slane %v9273_v26, 1  ;;  %v576_v33 = vor.u32 %v574_v52, %v9219_v30  ;;  %v11763_v30 = vrot.slane %v9208_v62, 1  ;;  %v517_v17 = vsel %vm505_vm1, %v512_v15, %v9152_v63  ;;  %v8186_v43 = vld [vmem:[#allocation8 + $0x180] sm:$0xff]   ;;  %v8191_v15 = vld [vmem:[#allocation8 + $0x198] sm:$0xff]  }
 0x118   : > { %7742 = vmatmul.mubr.bf16.gmra.mrb[28].mxu1 %v934_v60  ;;  %7763 = vmatprep.subr.bf16.mxu0 %v8196_v10  ;;  %v9283_v45 = vsel %vm670_vm0, %v927_v12, %v931_v61  ;;  %v9288_v60 = vsel %vm670_vm0, %v671_v34, %v672_v23  ;;  %v588_v1 = vrot.slane %v586_v14, 1  ;;  %v584_v24 = vor.u32 %v582_v40, %v580_v31  ;;  %v8188_v34 = vld [vmem:[#allocation8 + $0x188] sm:$0xff]   ;;  %v8364_v26 = vld [vmem:[%s8921_s8 + $0x60] sm:$0xff]  }
 0x119   : > { %7745 = vmatprep.mubr.bf16.mxu1 %v938_v5  ;;  %1649 = vmatpush1.bf16.msra.mxu1 %v8181_v47  ;;  %v9294_v3 = vsel %vm670_vm0, %v931_v61, %v935_v25  ;;  %v892_v52 = vsel %vm670_vm0, %v11763_v30, %v891_v54  ;;  %v9301_v47 = vsel %vm505_vm1, %v576_v33, %v580_v31  ;;  %v594_v5 = vshll.u32 %v9051_v16, 16 }
 0x11a   : > { %1650 = vmatprep.subr.bf16.mxu1 %v11762_v18  ;;  %v895_v6 = vrot.slane %v9301_v47, 1  ;;  %v9314_v63 = vsel %vm505_vm1, %v584_v24, %v588_v1  ;;  %v592_v4 = vor.u32 %v590_v32, %v588_v1  ;;  %v602_v40 = vshll.u32 %v9063_v29, 16 }
 0x11b   : > { %7764 = vmatpush3.bf16.msra.mxu0 %v8196_v10  ;;  %v11764_v10 = vrot.slane %v9216_v7, 1  ;;  %v899_v7 = vrot.slane %v9314_v63, 1  ;;  %v596_v61 = vrot.slane %v594_v5, 1  ;;  %v598_v14 = vshrl.u32 %v9051_v16, 16 }
 0x11c   : > { %7801 = vmatprep.subr.bf16.mxu0 %v9277_v0  ;;  %v604_v33 = vrot.slane %v602_v40, 1  ;;  %v8197_v40 = vld [vmem:[#allocation8 + $0x1b8] sm:$0xff]  }
 0x11d   : > { %1651 = vmatpush1.bf16.msra.mxu1 %v8183_v41  ;;  %v896_v41 = vsel %vm670_vm0, %v891_v54, %v895_v6  ;;  %v900_v54 = vsel %vm670_vm0, %v895_v6, %v899_v7  ;;  %v9324_v31 = vsel %vm505_vm1, %v592_v4, %v596_v61  ;;  %v600_v30 = vor.u32 %v598_v14, %v596_v61  ;;  %v8192_v6 = vld [vmem:[#allocation8 + $0x1a0] sm:$0xff]   ;;  %v8195_v61 = vld [vmem:[#allocation8 + $0x1b0] sm:$0xff]  }
 0x11e   : > { %1187 = vmatmul.mubr.bf16.gmra.mrb[16].mxu0 %v9006_v49  ;;  %2659 = vmatprep.subr.bf16.mxu1 %v11762_v18  ;;  %v622_v14 = vshrl.u32 %v9090_v58, 16 }
 0x11f   : > { %1194 = vmatprep.mubr.bf16.mxu0 %v892_v52  ;;  %v9335_v52 = vsel %vm505_vm1, %v600_v30, %v604_v33 }
 0x120   : > { %7746 = vmatmul.mubr.bf16.gmra.mrb[32].mxu1 %v11764_v10  ;;  %v610_v10 = vshll.u32 %v9078_v42, 16  ;;  %v907_v1 = vrot.slane %v9335_v52, 1 }
 0x121   : > { %1652 = vmatprep.mubr.bf16.mxu1 %v517_v17  ;;  %v606_v17 = vshrl.u32 %v9063_v29, 16  ;;  %v8194_v29 = vld [vmem:[#allocation8 + $0x1a8] sm:$0xff]  }
 0x122   : > { %v612_v5 = vrot.slane %v610_v10, 1 }
 0x123   : > { %v608_v32 = vor.u32 %v606_v17, %v604_v33  ;;  %v8198_v33 = vld [vmem:[#allocation8 + $0x1c0] sm:$0xff]  }
 0x126   : > { %1195 = vmatmul.mubr.bf16.gmra.mrb[20].mxu0 %v9013_v51 }
 0x127   : > { %1202 = vmatprep.mubr.bf16.mxu0 %v896_v41  ;;  %v9348_v41 = vsel %vm505_vm1, %v608_v32, %v612_v5 }
 0x128   : > { %1653 = vmatmul.mubr.bf16.vlgmr.msra.gmra.mrb[36].mxu1 %v9227_v56  ;;  %v8189_v56 = vld [vmem:[#allocation8 + $0x190] sm:$0xff]  }
 0x129   : > { %1660 = vmatprep.mubr.bf16.mxu1 %v9179_v37  ;;  %2660 = vmatpush1.bf16.msra.mxu1 %v8186_v43  ;;  %v903_v37 = vrot.slane %v9324_v31, 1  ;;  %v614_v43 = vshrl.u32 %v9078_v42, 16 }
 0x12a   : > { %2661 = vmatprep.subr.bf16.mxu1 %v11762_v18 }
 0x12b   : > { %v904_v16 = vsel %vm670_vm0, %v899_v7, %v903_v37  ;;  %v908_v24 = vsel %vm670_vm0, %v903_v37, %v907_v1  ;;  %v618_v7 = vshll.u32 %v9090_v58, 16  ;;  %v616_v42 = vor.u32 %v614_v43, %v612_v5  ;;  %v8205_v5 = vld [vmem:[#allocation8 + $0x1d8] sm:$0xff]  }
 0x12c   : > { %v626_v37 = vshll.u32 %v9110_v8, 16 }
 0x12d   : > { %2662 = vmatpush1.bf16.msra.mxu1 %v8188_v34  ;;  %v911_v34 = vrot.slane %v9348_v41, 1  ;;  %v620_v4 = vrot.slane %v618_v7, 1  ;;  %v8208_v7 = vld [vmem:[#allocation8 + $0x1e8] sm:$0xff]  }
 0x12e   : > { %1203 = vmatmul.mubr.bf16.gmra.mrb[24].mxu0 %v9041_v9  ;;  %2663 = vmatprep.subr.bf16.mxu1 %v11762_v18  ;;  %v628_v30 = vrot.slane %v626_v37, 1  ;;  %v3135_v37 = vld [vmem:[#allocation6 + $0x38] sm:$0xff] }
 0x12f   : > { %1210 = vmatprep.mubr.bf16.mxu0 %v900_v54  ;;  %v912_v54 = vsel %vm670_vm0, %v907_v1, %v911_v34  ;;  %v624_v58 = vor.u32 %v622_v14, %v620_v4  ;;  %v8362_v14 = vld [vmem:[%s8921_s8 + $0x50] sm:$0xff]  }
 0x130   : > { %1661 = vmatmul.mubr.bf16.gmra.mrb[40].mxu1 %v9121_v27  ;;  %v3146_v27 = vld [vmem:[#allocation6 + $0x90] sm:$0xff] }
 0x131   : > { %1668 = vmatprep.mubr.bf16.mxu1 %v9048_v13  ;;  %2664 = vmatpush1.bf16.msra.mxu1 %v8189_v56  ;;  %v8354_v13 = vld [vmem:[%s8921_s8 + $0x10] sm:$0xff]   ;;  %v9360_v56 = vsel %vm505_vm1, %v616_v42, %v620_v4  ;;  %v9371_v10 = vsel %vm505_vm1, %v624_v58, %v628_v30  ;;  %v8360_v42 = vld [vmem:[%s8921_s8 + $0x40] sm:$0xff]   ;;  %v8361_v4 = vld [vmem:[%s8921_s8 + $0x48] sm:$0xff]  }
 0x132   : > { %2665 = vmatprep.subr.bf16.mxu1 %v11762_v18  ;;  %v919_v1 = vrot.slane %v9371_v10, 1 }
 0x135   : > { %2666 = vmatpush1.bf16.msra.mxu1 %v8191_v15  ;;  %v915_v15 = vrot.slane %v9360_v56, 1 }
 0x136   : > { %1211 = vmatmul.mubr.bf16.gmra.mrb[28].mxu0 %v9045_v11  ;;  %2667 = vmatprep.subr.bf16.mxu1 %v11762_v18 }
 0x137   : > { %1218 = vmatprep.mubr.bf16.mxu0 %v904_v16  ;;  %v8201_v16 = vld [vmem:[#allocation8 + $0x1c8] sm:$0xff]   ;;  %v916_v17 = vsel %vm670_vm0, %v911_v34, %v915_v15 }
 0x138   : > { %1669 = vmatmul.mubr.bf16.gmra.mrb[44].mxu1 %v8354_v13  ;;  %v8203_v13 = vld [vmem:[#allocation8 + $0x1d0] sm:$0xff]  }
 0x139   : > { %1676 = vmatprep.mubr.bf16.mxu1 %v9101_v2  ;;  %2668 = vmatpush1.bf16.msra.mxu1 %v8192_v6  ;;  %v8355_v2 = vld [vmem:[%s8921_s8 + $0x18] sm:$0xff]   ;;  %v630_v6 = vshrl.u32 %v9110_v8, 16  ;;  %v920_v8 = vsel %vm670_vm0, %v915_v15, %v919_v1 }
 0x13a   : > { %2669 = vmatprep.subr.bf16.mxu1 %v11762_v18  ;;  %v3139_v15 = vld [vmem:[#allocation6 + $0x58] sm:$0xff] }
 0x13b   : > { %v632_v32 = vor.u32 %v630_v6, %v628_v30  ;;  %v3142_v30 = vld [vmem:[#allocation6 + $0x70] sm:$0xff] }
 0x13c   : > { %v8204_v6 = vld [vmem:[#allocation8 + $0x210] sm:$0xff]  }
 0x13d   : > { %2670 = vmatpush1.bf16.msra.mxu1 %v8194_v29  ;;  %v9383_v29 = vsel %vm505_vm1, %v632_v32, %v9231_v53  ;;  %v11767_v32 = vld [vmem:[#allocation22_spill] sm:$0xff] }
 0x13e   : > { %1219 = vmatmul.mubr.bf16.gmra.mrb[32].mxu0 %v9069_v36  ;;  %2671 = vmatprep.subr.bf16.mxu1 %v11762_v18  ;;  %v923_v43 = vrot.slane %v9383_v29, 1 }
 0x13f   : > { %1226 = vmatprep.mubr.bf16.mxu0 %v908_v24  ;;  %v8206_v24 = vld [vmem:[#allocation8 + $0x1e0] sm:$0xff]  }
 0x140   : > { %1677 = vmatmul.mubr.bf16.gmra.mrb[48].mxu1 %v8355_v2  ;;  %v924_v53 = vsel %vm670_vm0, %v919_v1, %v923_v43  ;;  %v8359_v2 = vld [vmem:[%s8921_s8 + $0x38] sm:$0xff]   ;;  %v928_v34 = vsel %vm670_vm0, %v923_v43, %v927_v12  ;;  %v3149_v43 = vld [vmem:[#allocation6 + $0xa8] sm:$0xff] }
 0x141   : > { %1684 = vmatprep.mubr.bf16.mxu1 %v9133_v39  ;;  %2672 = vmatpush1.bf16.msra.mxu1 %v8195_v61  ;;  %v8356_v39 = vld [vmem:[%s8921_s8 + $0x20] sm:$0xff]   ;;  %v8210_v61 = vld [vmem:[#allocation8 + $0x1f0] sm:$0xff]  }
 0x142   : > { %2673 = vmatprep.subr.bf16.mxu1 %v11762_v18  ;;  %v3130_v12 = vld [vmem:[#allocation6 + $0x10] sm:$0xff]  ;;  %v3147_v1 = vld [vmem:[#allocation6 + $0x98] sm:$0xff] }
 0x143   : > { %3176 = vperm.xlu1 %8119, %v3130_v12   ;;  %v3152_v12 = vld [vmem:[#allocation6 + $0xc0] sm:$0xff] }
 0x145   : > { %2674 = vmatpush1.bf16.msra.mxu1 %v8197_v40  ;;  %v3129_v40 = vld [vmem:[#allocation6 + $0x8] sm:$0xff] }
 0x146   : > { %1227 = vmatmul.mubr.bf16.gmra.mrb[36].mxu0 %v9081_v44  ;;  %2675 = vmatprep.subr.bf16.mxu1 %v11762_v18 }
 0x147   : > { %1234 = vmatprep.mubr.bf16.mxu0 %v912_v54  ;;  %v3131_v54 = vld [vmem:[#allocation6 + $0x18] sm:$0xff] }
 0x148   : > { %1685 = vmatmul.mubr.bf16.gmra.mrb[52].mxu1 %v8356_v39  ;;  %3181 = vperm.xlu1 %8119, %v3131_v54   ;;  %v3137_v39 = vld [vmem:[#allocation6 + $0x48] sm:$0xff]  ;;  %v8218_v54 = vld [vmem:[#allocation8 + $0x230] sm:$0xff]  }
 0x149   : > { %1692 = vmatprep.mubr.bf16.mxu1 %v9171_v20  ;;  %2676 = vmatpush1.bf16.msra.mxu1 %v8198_v33  ;;  %v8357_v20 = vld [vmem:[%s8921_s8 + $0x28] sm:$0xff]  }
 0x14a   : > { %2677 = vmatprep.subr.bf16.mxu1 %v11762_v18  ;;  %v3136_v33 = vld [vmem:[#allocation6 + $0x40] sm:$0xff] }
 0x14d   : > { %2678 = vmatpush1.bf16.msra.mxu1 %v8201_v16  ;;  %v8202_v16 = vld [vmem:[#allocation8 + $0x208] sm:$0xff]  }
 0x14e   : > { %1235 = vmatmul.mubr.bf16.gmra.mrb[40].mxu0 %v9094_v59  ;;  %2679 = vmatprep.subr.bf16.mxu1 %v11762_v18 }
 0x14f   : > { %1242 = vmatprep.mubr.bf16.mxu0 %v916_v17  ;;  %v8365_v17 = vld [vmem:[%s8921_s8 + $0x68] sm:$0xff]  }
 0x150   : > { %1693 = vmatmul.mubr.bf16.gmra.mrb[56].mxu1 %v8357_v20  ;;  %v9430_v20 = vld [vmem:[%s8921_s8 + $0x14] sm:$0xf] }
 0x151   : > { %1700 = vmatprep.mubr.bf16.mxu1 %v9208_v62  ;;  %2680 = vmatpush1.bf16.msra.mxu1 %v8203_v13  ;;  %v8358_v62 = vld [vmem:[%s8921_s8 + $0x30] sm:$0xff]   ;;  %v8207_v13 = vld [vmem:[#allocation8 + $0x218] sm:$0xff]  }
 0x152   : > { %2681 = vmatprep.subr.bf16.mxu1 %v11762_v18 }
 0x155   : > { %2682 = vmatpush1.bf16.msra.mxu1 %v8205_v5  ;;  %v9438_v5 = vld [vmem:[%s8921_s8 + $0x18] sm:$0xff]  }
 0x156   : > { %1243 = vmatmul.mubr.bf16.gmra.mrb[44].mxu0 %v9107_v21  ;;  %2683 = vmatprep.subr.bf16.mxu1 %v11762_v18 }
 0x157   : > { %1250 = vmatprep.mubr.bf16.mxu0 %v920_v8  ;;  %v3148_v8 = vld [vmem:[#allocation6 + $0xa0] sm:$0xff] }
 0x158   : > { %1701 = vmatmul.mubr.bf16.gmra.mrb[60].mxu1 %v8358_v62  ;;  %v8211_v62 = vld [vmem:[#allocation8 + $0x220] sm:$0xff]  }
 0x159   : > { %1708 = vmatprep.mubr.bf16.mxu1 %v9239_v50  ;;  %2684 = vmatpush1.bf16.msra.mxu1 %v8206_v24  ;;  %v8212_v50 = vld [vmem:[#allocation8 + $0x1f8] sm:$0xff]   ;;  %v8366_v24 = vld [vmem:[%s8921_s8 + $0x70] sm:$0xff]  }
 0x15a   : > { %2685 = vmatprep.subr.bf16.mxu1 %v11762_v18 }
 0x15d   : > { %2686 = vmatpush1.bf16.msra.mxu1 %v8208_v7  ;;  %v9443_v7 = vld [vmem:[%s8921_s8 + $0x20] sm:$0xff]  }
 0x15e   : > { %1251 = vmatmul.mubr.bf16.gmra.mrb[48].mxu0 %v9140_v46  ;;  %2687 = vmatprep.subr.bf16.mxu1 %v11762_v18 }
 0x15f   : > { %1258 = vmatprep.mubr.bf16.mxu0 %v924_v53  ;;  %v2117_v53 = vshll.u32 %v9438_v5, 16 }
 0x160   : > { %1709 = vmatmul.mubr.bf16.gmra.mrb[64].mxu1 %v8359_v2  ;;  %v8216_v2 = vld [vmem:[#allocation8 + $0x228] sm:$0xff]  }
 0x161   : > { %1716 = vmatprep.mubr.bf16.mxu1 %v9301_v47  ;;  %2688 = vmatpush1.bf16.msra.mxu1 %v8210_v61  ;;  %v3128_v47 = vld [vmem:[#allocation6] sm:$0xff]  ;;  %v3150_v61 = vld [vmem:[#allocation6 + $0xb0] sm:$0xff] }
 0x162   : > { %2689 = vmatprep.subr.bf16.mxu1 %v11762_v18  ;;  %3166 = vperm.xlu0 %8118, %v3128_v47   ;;  %v2121_v47 = vshrl.u32 %v9438_v5, 16 }
 0x165   : > { %2690 = vmatpush1.bf16.msra.mxu1 %v8212_v50  ;;  %v3151_v50 = vld [vmem:[#allocation6 + $0xb8] sm:$0xff] }
 0x166   : > { %1259 = vmatmul.mubr.bf16.gmra.mrb[52].mxu0 %v9148_v48  ;;  %3171 = vperm.xlu0 %8118, %v3129_v40   ;;  %v8367_v40 = vld [vmem:[%s8921_s8 + $0x78] sm:$0xff]  }
 0x167   : > { %1266 = vmatprep.mubr.bf16.mxu0 %v928_v34 }
 0x168   : > { %1717 = vmatmul.mubr.bf16.gmra.mrb[68].mxu1 %v8360_v42  ;;  %v2119_v42 = vrot.slane %v2117_v53, 1 }
 0x169   : > { %1724 = vmatprep.mubr.bf16.mxu1 %v9314_v63  ;;  %v3132_v63 = vld [vmem:[#allocation6 + $0x20] sm:$0xff] }
 0x16a   : > { %3186 = vperm.xlu0 %8118, %v3132_v63  }
 0x16e   : > { %1267 = vmatmul.mubr.bf16.gmra.mrb[56].mxu0 %v9168_v19 }
 0x16f   : > { %1274 = vmatprep.mubr.bf16.mxu0 %v9283_v45  ;;  %v3133_v45 = vld [vmem:[#allocation6 + $0x28] sm:$0xff] }
 0x170   : > { %1725 = vmatmul.mubr.bf16.gmra.mrb[72].mxu1 %v8361_v4  ;;  %3191 = vperm.xlu1 %8119, %v3133_v45   ;;  %v2125_v4 = vshll.u32 %v9443_v7, 16  ;;  %v9455_v45 = vld [vmem:[%s8921_s8 + $0x28] sm:$0xff]  }
 0x171   : > { %1732 = vmatprep.mubr.bf16.mxu1 %v9324_v31  ;;  %v3134_v31 = vld [vmem:[#allocation6 + $0x30] sm:$0xff] }
 0x172   : > { %3196 = vperm.xlu0 %8118, %v3134_v31   ;;  %v3154_v31 = vld [vmem:[#allocation6 + $0xd0] sm:$0xff] }
 0x174   : > { %3201 = vperm.xlu1 %8119, %v3135_v37   ;;  %v8220_v37 = vld [vmem:[#allocation8 + $0x238] sm:$0xff]  }
 0x176   : > { %1275 = vmatmul.mubr.bf16.gmra.mrb[60].mxu0 %v9186_v28  ;;  %3206 = vperm.xlu0 %8118, %v3136_v33   ;;  %v3155_v33 = vld [vmem:[#allocation6 + $0xd8] sm:$0xff] }
 0x177   : > { %1282 = vmatprep.mubr.bf16.mxu0 %v9294_v3  ;;  %v8363_v3 = vld [vmem:[%s8921_s8 + $0x58] sm:$0xff]  }
 0x178   : > { %1733 = vmatmul.mubr.bf16.gmra.mrb[76].mxu1 %v8362_v14  ;;  %3211 = vperm.xlu1 %8119, %v3137_v39   ;;  %v2127_v14 = vrot.slane %v2125_v4, 1  ;;  %v2129_v39 = vshrl.u32 %v9443_v7, 16 }
 0x179   : > { %1740 = vmatprep.mubr.bf16.mxu1 %v9335_v52  ;;  %v3138_v52 = vld [vmem:[#allocation6 + $0x50] sm:$0xff] }
 0x17a   : > { %3216 = vperm.xlu0 %8118, %v3138_v52   ;;  %v2133_v52 = vshll.u32 %v9455_v45, 16 }
 0x17c   : > { %3221 = vperm.xlu1 %8119, %v3139_v15   ;;  %v3156_v15 = vld [vmem:[#allocation6 + $0xe0] sm:$0xff] }
 0x17e   : > { %1283 = vmatmul.mubr.bf16.gmra.mrb[64].mxu0 %v9201_v57  ;;  %v3140_v57 = vld [vmem:[#allocation6 + $0x60] sm:$0xff] }
 0x17f   : > { %1290 = vmatprep.mubr.bf16.mxu0 %v935_v25  ;;  %3226 = vperm.xlu0 %8118, %v3140_v57   ;;  %v3141_v25 = vld [vmem:[#allocation6 + $0x68] sm:$0xff]  ;;  %v8368_v57 = vld [vmem:[%s8921_s8 + $0x80] sm:$0xff]  }
 0x180   : > { %1741 = vmatmul.mubr.bf16.gmra.mrb[80].mxu1 %v8363_v3  ;;  %3231 = vperm.xlu1 %8119, %v3141_v25  }
 0x181   : > { %1748 = vmatprep.mubr.bf16.mxu1 %v9348_v41  ;;  %v11765_v41 = vld [vmem:[#allocation20_spill] sm:$0xff] }
 0x182   : > { %v675_v58 = vsel %vm670_vm0, %v672_v23, %v11765_v41  ;;  %v3145_v23 = vld [vmem:[#allocation6 + $0x88] sm:$0xff]  ;;  %v2131_v41 = vor.u32 %v2129_v39, %v2127_v14  ;;  %v2266_v39 = vrot.slane %v9443_v7, 1 }
 0x183   : > { %3236 = vperm.xlu0 %8118, %v3142_v30   ;;  %v9467_v30 = vld [vmem:[%s8921_s8 + $0x30] sm:$0xff]  }
 0x186   : > { %1291 = vmatmul.mubr.bf16.gmra.mrb[68].mxu0 %v9189_v38  ;;  %v3143_v38 = vld [vmem:[#allocation6 + $0x78] sm:$0xff] }
 0x187   : > { %7765 = vmatprep.mubr.bf16.mxu0 %v9288_v60  ;;  %3241 = vperm.xlu1 %8119, %v3143_v38   ;;  %v11766_v60 = vld [vmem:[#allocation21_spill] sm:$0xff]  ;;  %v8369_v38 = vld [vmem:[%s8921_s8 + $0x88] sm:$0xf] }
 0x188   : > { %1749 = vmatmul.mubr.bf16.gmra.mrb[84].mxu1 %v8364_v26 }
 0x189   : > { %1756 = vmatprep.mubr.bf16.mxu1 %v9360_v56  ;;  %v3144_v56 = vld [vmem:[#allocation6 + $0x80] sm:$0xff] }
 0x18a   : > { %3246 = vperm.xlu0 %8118, %v3144_v56   ;;  %v3159_v56 = vld [vmem:[#allocation6 + $0xf8] sm:$0xff] }
 0x18b   : > { %3251 = vperm.xlu1 %8119, %v3145_v23   ;;  %v2141_v23 = vshll.u32 %v9467_v30, 16 }
 0x18e   : > { %7766 = vmatmul.mubr.bf16.vlgmr.msra.gmra.mrb[72].mxu0 %v675_v58  ;;  %3256 = vperm.xlu0 %8118, %v3146_v27   ;;  %v2135_v58 = vrot.slane %v2133_v52, 1  ;;  %v3160_v27 = vld [vmem:[#allocation6 + $0x100] sm:$0xff] }
 0x18f   : > { %7802 = vmatpush3.bf16.msra.mxu0 %v9277_v0  ;;  %7769 = vmatprep.mubr.bf16.mxu0 %v11766_v60  ;;  %v1974_v0 = vld [vmem:[%s8921_s8 + $0x10] sm:$0xc] }
 0x190   : > { %1757 = vmatmul.mubr.bf16.gmra.mrb[88].mxu1 %v8365_v17  ;;  %7803 = vmatprep.subr.bf16.mxu0 %v8202_v16  ;;  %v2136_v17 = vsel %vm505_vm1, %v2131_v41, %v2135_v58 }
 0x191   : > { %1764 = vmatprep.mubr.bf16.mxu1 %v9371_v10  ;;  %3261 = vperm.xlu1 %8119, %v3147_v1   ;;  %v9435_v10 = vcombine.low %v1974_v0, %v9430_v20  ;;  %v2351_v0 = vrot.slane %v9438_v5, 2  ;;  %v2361_v1 = vrot.slane %v2136_v17, 2  ;;  %v2268_v17 = vrot.slane %v9455_v45, 1 }
 0x192   : > { %3266 = vperm.xlu0 %8118, %v3148_v8  }
 0x193   : > { %7804 = vmatpush3.bf16.msra.mxu0 %v8202_v16  ;;  %v3158_v16 = vld [vmem:[#allocation6 + $0xf0] sm:$0xff] }
 0x194   : > { %7805 = vmatprep.subr.bf16.mxu0 %v8204_v6 }
 0x195   : > { %3271 = vperm.xlu1 %8119, %v3149_v43  }
 0x196   : > { %7770 = vmatmul.mubr.bf16.gmra.mrb[76].mxu0 %v11767_v32  ;;  %3276 = vperm.xlu0 %8118, %v3150_v61  }
 0x197   : > { %7773 = vmatprep.mubr.bf16.mxu0 %v8989_v35  ;;  %7806 = vmatpush3.bf16.msra.mxu0 %v8204_v6  ;;  %v2112_v35 = vshll.u32 %v9435_v10, 16  ;;  %v2137_v6 = vshrl.u32 %v9455_v45, 16 }
 0x198   : > { %1765 = vmatmul.mubr.bf16.gmra.mrb[92].mxu1 %v8366_v24  ;;  %7807 = vmatprep.subr.bf16.mxu0 %v8207_v13  ;;  %v9482_v24 = vld [vmem:[%s8921_s8 + $0x38] sm:$0xff]  }
 0x199   : > { %1772 = vmatprep.mubr.bf16.mxu1 %v9383_v29  ;;  %v2110_v29 = vshrl.u32 %v9435_v10, 16  ;;  %3281 = vperm.xlu1 %8119, %v3151_v50   ;;  %v2114_v34 = vrot.slane %v2112_v35, 1  ;;  %v2139_v32 = vor.u32 %v2137_v6, %v2135_v58  ;;  %v2270_v6 = vrot.slane %v9467_v30, 1 }
 0x19a   : > { %3286 = vperm.xlu0 %8118, %v3152_v12  }
 0x19b   : > { %7808 = vmatpush3.bf16.msra.mxu0 %v8207_v13  ;;  %v2115_v63 = vor.u32 %v2114_v34, %v2110_v29  ;;  %v2350_v13 = vrot.slane %v9435_v10, 2  ;;  %v3163_v10 = vld [vmem:[#allocation6 + $0x118] sm:$0x3f]  ;;  %v2145_v29 = vshrl.u32 %v9467_v30, 16  ;;  %v2149_v34 = vshll.u32 %v9482_v24, 16 }
 0x19c   : > { %7809 = vmatprep.subr.bf16.mxu0 %v8211_v62 }
 0x19d   : > { %v2352_v35 = vsel %vm2349_vm2, %v2350_v13, %v2351_v0  ;;  %v2151_v12 = vrot.slane %v2149_v34, 1 }
 0x19e   : > { %7774 = vmatmul.mubr.bf16.gmra.mrb[80].mxu0 %v9006_v49  ;;  %v3153_v49 = vld [vmem:[#allocation6 + $0xc8] sm:$0xff]  ;;  %3296 = vperm.xlu0 %8118, %v3154_v31  }
 0x19f   : > { %7777 = vmatprep.mubr.bf16.mxu0 %v9013_v51  ;;  %7810 = vmatpush3.bf16.msra.mxu0 %v8211_v62  ;;  %v2123_v51 = vor.u32 %v2121_v47, %v2119_v42  ;;  %v3162_v62 = vld [vmem:[#allocation6 + $0x110] sm:$0xff] }
 0x1a0   : > { %1773 = vmatmul.mubr.bf16.gmra.mrb[96].mxu1 %v8367_v40  ;;  %7811 = vmatprep.subr.bf16.mxu0 %v8216_v2 }
 0x1a1   : > { %1780 = vmatprep.mubr.bf16.mxu1 %v9258_v22  ;;  %3291 = vperm.xlu1 %8119, %v3153_v49   ;;  %v2120_v22 = vsel %vm505_vm1, %v2115_v63, %v2119_v42  ;;  %v2128_v3 = vsel %vm505_vm1, %v2123_v51, %v2127_v14  ;;  %v2359_v42 = vrot.slane %v9443_v7, 2 }
 0x1a2   : > { %3306 = vperm.xlu0 %8118, %v3156_v15   ;;  %v2353_v26 = vrot.slane %v2120_v22, 2  ;;  %v2354_v25 = vrot.slane %v2128_v3, 2  ;;  %v2365_v3 = vrot.slane %v9455_v45, 2 }
 0x1a3   : > { %7812 = vmatpush3.bf16.msra.mxu0 %v8216_v2 }
 0x1a4   : > { %7813 = vmatprep.subr.bf16.mxu0 %v8218_v54  ;;  %v2362_v61 = vsel %vm2349_vm2, %v2354_v25, %v2361_v1 }
 0x1a5   : > { %3301 = vperm.xlu1 %8119, %v3155_v33   ;;  %v2153_v33 = vshrl.u32 %v9482_v24, 16 }
 0x1a6   : > { %7778 = vmatmul.mubr.bf16.gmra.mrb[84].mxu0 %v9041_v9  ;;  %v391_v9 = vld [vmem:[%s8921_s8 + $0x8c] sm:$0x7]  ;;  %3316 = vperm.xlu0 %8118, %v3158_v16  }
 0x1a7   : > { %7781 = vmatprep.mubr.bf16.mxu0 %v9045_v11  ;;  %7814 = vmatpush3.bf16.msra.mxu0 %v8218_v54  ;;  %v3157_v11 = vld [vmem:[#allocation6 + $0xe8] sm:$0xff]  ;;  %v7162_v60 = vcombine.low %v8369_v38, %v391_v9  ;;  %v9502_v54 = vld [vmem:[%s8921_s8 + $0x40] sm:$0xff]   ;;  %v2155_v15 = vor.u32 %v2153_v33, %v2151_v12 }
 0x1a8   : > { %1781 = vmatmul.mubr.bf16.gmra.mrb[100].mxu1 %v8368_v57  ;;  %7815 = vmatprep.subr.bf16.mxu0 %v8220_v37  ;;  %v2157_v22 = vshll.u32 %v9502_v54, 16  ;;  %v2161_v38 = vshrl.u32 %v9502_v54, 16 }
 0x1a9   : > { %1788 = vmatprep.mubr.bf16.mxu1 %v9260_v55  ;;  %3311 = vperm.xlu1 %8119, %v3157_v11   ;;  %v2355_v55 = vsel %vm2349_vm2, %v2353_v26, %v2354_v25  ;;  %v2366_v26 = vsel %vm2349_vm2, %v2359_v42, %v2365_v3 }
 0x1aa   : > { %3326 = vperm.xlu0 %8118, %v3160_v27   ;;  %v2159_v57 = vrot.slane %v2157_v22, 1 }
 0x1ab   : > { %7816 = vmatpush3.bf16.msra.mxu0 %v8220_v37 }
 0x1ac   : > { %4771 = vmatprep.subr.bf16.mxu0 %v11762_v18  ;;  %v2160_v16 = vsel %vm505_vm1, %v2155_v15, %v2159_v57  ;;  %v2163_v27 = vor.u32 %v2161_v38, %v2159_v57 }
 0x1ad   : > { %3321 = vperm.xlu1 %8119, %v3159_v56  }
 0x1ae   : > { %7782 = vmatmul.mubr.bf16.gmra.mrb[88].mxu0 %v9069_v36  ;;  %v3161_v36 = vld [vmem:[#allocation6 + $0x108] sm:$0xff]  ;;  %3336 = vperm.xlu0 %8118, %v3162_v62  }
 0x1af   : > { %7785 = vmatprep.mubr.bf16.mxu0 %v9081_v44  ;;  %v2143_v44 = vrot.slane %v2141_v23, 1  ;;  %v2379_v23 = vrot.slane %v2160_v16, 2 }
 0x1b0   : > { %1789 = vmatmul.mubr.bf16.gmra.mrb[104].mxu1 %v7162_v60 }
 0x1b1   : > { %2691 = vmatprep.mubr.bf16.mxu1 %v2355_v55  ;;  %3331 = vperm.xlu1 %8119, %v3161_v36   ;;  %v2144_v50 = vsel %vm505_vm1, %v2139_v32, %v2143_v44  ;;  %v2147_v4 = vor.u32 %v2145_v29, %v2143_v44  ;;  %v2271_v44 = vsel %vm670_vm0, %v2268_v17, %v2270_v6 }
 0x1b2   : > { %v2367_v47 = vrot.slane %v2144_v50, 2 }
 0x1b3   : > { %v9479_v8 = vpop.f32.mrb[0].mxu1  ;;  %v2152_v37 = vsel %vm505_vm1, %v2147_v4, %v2151_v12  ;;  %v2377_v4 = vrot.slane %v9482_v24, 2  ;;  %v2274_v12 = vrot.slane %v9502_v54, 1 }
 0x1b4   : > { %v9484_v43 = vpop.f32.mrb[1].mxu1  ;;  %v2368_v14 = vsel %vm2349_vm2, %v2361_v1, %v2367_v47  ;;  %v2373_v52 = vrot.slane %v2152_v37, 2  ;;  %v2269_v1 = vsel %vm670_vm0, %v2266_v39, %v2268_v17 }
 0x1b5   : > { %v9487_v53 = vpop.f32.mrb[2].mxu1  ;;  %3341 = vperm.xlu1 %8119, %v3163_v10  }
 0x1b6   : > { %7786 = vmatmul.mubr.bf16.gmra.mrb[92].mxu0 %v9094_v59  ;;  %v9491_v2 = vpop.f32.mrb[3].mxu1  ;;  %v2012_v59 = vld [vmem:[%s8921_s8 + $0x10] sm:$0x8] }
 0x1b7   : > { %7789 = vmatprep.mubr.bf16.mxu0 %v9107_v21  ;;  %v2360_v21 = vsel %vm2349_vm2, %v2351_v0, %v2359_v42  ;;  %v7237_v51 = vcombine.low %v2012_v59, %v9430_v20  ;;  %v9547_v0 = vld [vmem:[%s8921_s8 + $0x50] sm:$0xff]   ;;  %v2369_v42 = vrot.slane %v2271_v44, 2 }
 0x1b8   : > { %2692 = vmatmul.mubr.bf16.vlgmr.msra.gmra.mrb[108].mxu1 %v2352_v35  ;;  %v2380_v35 = vsel %vm2349_vm2, %v2373_v52, %v2379_v23  ;;  %v2173_v34 = vshll.u32 %v9547_v0, 16  ;;  %v2177_v38 = vshrl.u32 %v9547_v0, 16 }
 0x1b9   : > { %2699 = vmatprep.mubr.bf16.mxu1 %v2362_v61  ;;  %v2263_v20 = vrot.slane %v7237_v51, 1  ;;  %v2363_v61 = vrot.slane %v2269_v1, 2 }
 0x1bb   : > { %v9499_v40 = vpop.f32.mrb[4].mxu1 }
 0x1bc   : > { %v9504_v49 = vpop.f32.mrb[5].mxu1 }
 0x1bd   : > { %v9507_v63 = vpop.f32.mrb[6].mxu1 }
 0x1be   : > { %7790 = vmatmul.mubr.bf16.gmra.mrb[96].mxu0 %v9140_v46  ;;  %v9512_v31 = vpop.f32.mrb[7].mxu1  ;;  %v2264_v46 = vrot.slane %v9438_v5, 1  ;;  %v2374_v5 = vsel %vm2349_vm2, %v2367_v47, %v2373_v52  ;;  %v2272_v47 = vrot.slane %v9482_v24, 1  ;;  %v2370_v52 = vsel %vm2349_vm2, %v2363_v61, %v2369_v42 }
 0x1bf   : > { %7793 = vmatprep.mubr.bf16.mxu0 %v9148_v48  ;;  %v9524_v48 = vld [vmem:[%s8921_s8 + $0x48] sm:$0xff]  }
 0x1c0   : > { %2700 = vmatmul.mubr.bf16.gmra.mrb[112].mxu1 %v2360_v21  ;;  %v2265_v25 = vsel %vm670_vm0, %v2263_v20, %v2264_v46  ;;  %v2267_v41 = vsel %vm670_vm0, %v2264_v46, %v2266_v39  ;;  %v2165_v60 = vshll.u32 %v9524_v48, 16  ;;  %v2169_v29 = vshrl.u32 %v9524_v48, 16  ;;  %v9574_v46 = vld [vmem:[%s8921_s8 + $0x58] sm:$0xff]  }
 0x1c1   : > { %2707 = vmatprep.mubr.bf16.mxu1 %v2368_v14  ;;  %v2356_v56 = vrot.slane %v2265_v25, 2  ;;  %v2357_v55 = vrot.slane %v2267_v41, 2  ;;  %v2175_v20 = vrot.slane %v2173_v34, 1 }
 0x1c2   : > { %v2167_v13 = vrot.slane %v2165_v60, 1  ;;  %v2181_v60 = vshll.u32 %v9574_v46, 16 }
 0x1c3   : > { %v9521_v9 = vpop.f32.mrb[8].mxu1  ;;  %v2358_v36 = vsel %vm2349_vm2, %v2356_v56, %v2357_v55  ;;  %v2364_v33 = vsel %vm2349_vm2, %v2357_v55, %v2363_v61  ;;  %v2276_v55 = vrot.slane %v9524_v48, 1  ;;  %v2179_v44 = vor.u32 %v2177_v38, %v2175_v20 }
 0x1c4   : > { %v9526_v11 = vpop.f32.mrb[9].mxu1  ;;  %v2168_v50 = vsel %vm505_vm1, %v2163_v27, %v2167_v13 }
 0x1c5   : > { %v9531_v58 = vpop.f32.mrb[10].mxu1  ;;  %v2385_v14 = vrot.slane %v2168_v50, 2 }
 0x1c6   : > { %7794 = vmatmul.mubr.bf16.gmra.mrb[100].mxu0 %v9168_v19  ;;  %v9535_v7 = vpop.f32.mrb[11].mxu1  ;;  %v2371_v19 = vrot.slane %v9467_v30, 2  ;;  %v11768_v30 = vld [vmem:[#allocation23_spill] sm:$0xff] }
 0x1c7   : > { %7797 = vmatprep.mubr.bf16.mxu0 %v9186_v28  ;;  %v2386_v41 = vsel %vm2349_vm2, %v2379_v23, %v2385_v14 }
 0x1c8   : > { %2708 = vmatmul.mubr.bf16.gmra.mrb[116].mxu1 %v2366_v26  ;;  %v2372_v45 = vsel %vm2349_vm2, %v2365_v3, %v2371_v19  ;;  %v2171_v3 = vor.u32 %v2169_v29, %v2167_v13  ;;  %v2378_v57 = vsel %vm2349_vm2, %v2371_v19, %v2377_v4  ;;  %v2275_v26 = vsel %vm670_vm0, %v2272_v47, %v2274_v12 }
 0x1c9   : > { %2715 = vmatprep.mubr.bf16.mxu1 %v2374_v5  ;;  %v2381_v56 = vrot.slane %v2275_v26, 2  ;;  %v2383_v19 = vrot.slane %v9502_v54, 2 }
 0x1ca   : > { %v9591_v16 = vsel %vm505_vm1, %v2171_v3, %v2175_v20  ;;  %v2280_v3 = vrot.slane %v9574_v46, 1 }
 0x1cb   : > { %v9544_v28 = vpop.f32.mrb[12].mxu1  ;;  %v2391_v13 = vrot.slane %v9591_v16, 2  ;;  %v2384_v34 = vsel %vm2349_vm2, %v2377_v4, %v2383_v19 }
 0x1cc   : > { %v9551_v32 = vpop.f32.mrb[13].mxu1 }
 0x1cd   : > { %v9555_v62 = vpop.f32.mrb[14].mxu1 }
 0x1ce   : > { %7798 = vmatmul.mubr.bf16.gmra.mrb[104].mxu0 %v11768_v30  ;;  %v9559_v10 = vpop.f32.mrb[15].mxu1  ;;  %v2183_v30 = vrot.slane %v2181_v60, 1 }
 0x1cf   : > { %7817 = vmatprep.mubr.bf16.mxu0 %v2358_v36 }
 0x1d0   : > { %2716 = vmatmul.mubr.bf16.gmra.mrb[120].mxu1 %v2372_v45 }
 0x1d1   : > { %v1156_v59 = vpop.f32.mrb[0].mxu0  ;;  %2723 = vmatprep.mubr.bf16.mxu1 %v2380_v35  ;;  %v9606_v35 = vld [vmem:[%s8921_s8 + $0x60] sm:$0xff]  }
 0x1d2   : > { %v9568_v21 = vadd.f32 %v9484_v43, %v1156_v59  ;;  %v1158_v51 = vpop.f32.mrb[1].mxu0  ;;  %v2273_v43 = vsel %vm670_vm0, %v2270_v6, %v2272_v47  ;;  %v2278_v6 = vrot.slane %v9547_v0, 1  ;;  %v2392_v59 = vsel %vm2349_vm2, %v2385_v14, %v2391_v13 }
 0x1d3   : > { %v1159_v37 = vpop.f32.mrb[2].mxu0  ;;  %v9571_v22 = vpop.f32.mrb[16].mxu1  ;;  %v2389_v14 = vrot.slane %v9524_v48, 2 }
 0x1d4   : > { %v9577_v39 = vadd.f32 %v9491_v2, %v1159_v37  ;;  %v1161_v24 = vpop.f32.mrb[3].mxu0  ;;  %v9581_v15 = vpop.f32.mrb[17].mxu1  ;;  %v2375_v2 = vrot.slane %v2273_v43, 2  ;;  %v9623_v37 = vsel %vm505_vm1, %v2179_v44, %v2183_v30  ;;  %v9652_v44 = vld [vmem:[%s8921_s8 + $0x70] sm:$0xff]  }
 0x1d5   : > { %v9585_v25 = vpop.f32.mrb[18].mxu1  ;;  %v2282_v24 = vrot.slane %v9606_v35, 1 }
 0x1d6   : > { %7818 = vmatmul.mubr.bf16.vlgmr.msra.gmra.mrb[108].mxu0 %v2364_v33  ;;  %v9588_v5 = vpop.f32.mrb[19].mxu1  ;;  %v2376_v1 = vsel %vm2349_vm2, %v2369_v42, %v2375_v2  ;;  %v2382_v50 = vsel %vm2349_vm2, %v2375_v2, %v2381_v56  ;;  %v2279_v42 = vsel %vm670_vm0, %v2276_v55, %v2278_v6  ;;  %v2189_v33 = vshll.u32 %v9606_v35, 16 }
 0x1d7   : > { %7821 = vmatprep.mubr.bf16.mxu0 %v2370_v52  ;;  %v2393_v4 = vrot.slane %v2279_v42, 2 }
 0x1d8   : > { %2724 = vmatmul.mubr.bf16.gmra.mrb[124].mxu1 %v2378_v57  ;;  %v2397_v57 = vrot.slane %v9623_v37, 2  ;;  %v2191_v38 = vrot.slane %v2189_v33, 1 }
 0x1d9   : > { %v1164_v17 = vpop.f32.mrb[4].mxu0  ;;  %2731 = vmatprep.mubr.bf16.mxu1 %v2386_v41 }
 0x1da   : > { %v9599_v23 = vadd.f32 %v9479_v8, %v1164_v17  ;;  %v1166_v27 = vpop.f32.mrb[5].mxu0  ;;  %v2277_v8 = vsel %vm670_vm0, %v2274_v12, %v2276_v55  ;;  %v2185_v12 = vshrl.u32 %v9574_v46, 16 }
 0x1db   : > { %v1167_v36 = vpop.f32.mrb[6].mxu0  ;;  %v9603_v45 = vpop.f32.mrb[20].mxu1  ;;  %v9645_v27 = vld [vmem:[%s8921_s8 + $0x68] sm:$0xff]  }
 0x1dc   : > { %v9609_v61 = vadd.f32 %v9487_v53, %v1167_v36  ;;  %v1169_v54 = vpop.f32.mrb[7].mxu0  ;;  %v9613_v29 = vpop.f32.mrb[21].mxu1  ;;  %v2387_v53 = vrot.slane %v2277_v8, 2  ;;  %v2187_v16 = vor.u32 %v2185_v12, %v2183_v30  ;;  %v2390_v36 = vsel %vm2349_vm2, %v2383_v19, %v2389_v14 }
 0x1dd   : > { %v9616_v47 = vpop.f32.mrb[22].mxu1  ;;  %v2197_v19 = vshll.u32 %v9645_v27, 16 }
 0x1de   : > { %7822 = vmatmul.mubr.bf16.gmra.mrb[112].mxu0 %v2376_v1  ;;  %v9620_v51 = vpop.f32.mrb[23].mxu1  ;;  %v2388_v41 = vsel %vm2349_vm2, %v2381_v56, %v2387_v53  ;;  %v2394_v55 = vsel %vm2349_vm2, %v2387_v53, %v2393_v4  ;;  %v2283_v56 = vsel %vm670_vm0, %v2280_v3, %v2282_v24 }
 0x1df   : > { %7825 = vmatprep.mubr.bf16.mxu0 %v2382_v50  ;;  %v2193_v50 = vshrl.u32 %v9606_v35, 16  ;;  %v2405_v8 = vrot.slane %v2283_v56, 2 }
 0x1e0   : > { %2732 = vmatmul.mubr.bf16.gmra.mrb[128].mxu1 %v2384_v34  ;;  %v2284_v34 = vrot.slane %v9645_v27, 1 }
 0x1e1   : > { %v1172_v20 = vpop.f32.mrb[8].mxu0  ;;  %2739 = vmatprep.mubr.bf16.mxu1 %v2392_v59  ;;  %v2286_v59 = vrot.slane %v9652_v44, 1 }
 0x1e2   : > { %v9631_v52 = vadd.f32 %v9504_v49, %v1172_v20  ;;  %v1174_v43 = vpop.f32.mrb[9].mxu0  ;;  %v2281_v49 = vsel %vm670_vm0, %v2278_v6, %v2280_v3  ;;  %v9658_v6 = vsel %vm505_vm1, %v2187_v16, %v2191_v38 }
 0x1e3   : > { %v1175_v26 = vpop.f32.mrb[10].mxu0  ;;  %v9635_v2 = vpop.f32.mrb[24].mxu1  ;;  %v2399_v54 = vrot.slane %v2281_v49, 2  ;;  %v2403_v12 = vrot.slane %v9658_v6, 2  ;;  %v2195_v43 = vor.u32 %v2193_v50, %v2191_v38  ;;  %v9687_v38 = vld [vmem:[%s8921_s8 + $0x80] sm:$0xff]  }
 0x1e4   : > { %v9638_v60 = vadd.f32 %v9512_v31, %v1175_v26  ;;  %v1177_v48 = vpop.f32.mrb[11].mxu0  ;;  %v9642_v17 = vpop.f32.mrb[25].mxu1  ;;  %v2398_v31 = vsel %vm2349_vm2, %v2391_v13, %v2397_v57  ;;  %v2395_v13 = vrot.slane %v9547_v0, 2  ;;  %v2199_v26 = vrot.slane %v2197_v19, 1 }
 0x1e5   : > { %v9648_v1 = vpop.f32.mrb[26].mxu1  ;;  %v2400_v3 = vsel %vm2349_vm2, %v2393_v4, %v2399_v54  ;;  %v2285_v48 = vsel %vm670_vm0, %v2282_v24, %v2284_v34  ;;  %v2287_v4 = vsel %vm670_vm0, %v2284_v34, %v2286_v59  ;;  %v2404_v56 = vsel %vm2349_vm2, %v2397_v57, %v2403_v12 }
 0x1e6   : > { %7826 = vmatmul.mubr.bf16.gmra.mrb[116].mxu0 %v2388_v41  ;;  %v9655_v30 = vpop.f32.mrb[27].mxu1  ;;  %v2396_v49 = vsel %vm2349_vm2, %v2389_v14, %v2395_v13  ;;  %v2201_v24 = vshrl.u32 %v9645_v27, 16  ;;  %v2205_v14 = vshll.u32 %v9652_v44, 16  ;;  %v2417_v6 = vrot.slane %v2287_v4, 2 }
 0x1e7   : > { %7829 = vmatprep.mubr.bf16.mxu0 %v2394_v55  ;;  %v9680_v55 = vld [vmem:[%s8921_s8 + $0x78] sm:$0xff]   ;;  %v2401_v34 = vrot.slane %v9574_v46, 2  ;;  %v2290_v57 = vrot.slane %v9687_v38, 1 }
 0x1e8   : > { %2740 = vmatmul.mubr.bf16.gmra.mrb[132].mxu1 %v2390_v36  ;;  %v2288_v50 = vrot.slane %v9680_v55, 1 }
 0x1e9   : > { %v1180_v42 = vpop.f32.mrb[12].mxu0  ;;  %2747 = vmatprep.mubr.bf16.mxu1 %v2398_v31  ;;  %v2411_v31 = vrot.slane %v2285_v48, 2  ;;  %v2207_v48 = vrot.slane %v2205_v14, 1  ;;  %v2209_v14 = vshrl.u32 %v9652_v44, 16 }
 0x1ea   : > { %v9666_v53 = vadd.f32 %v9499_v40, %v1180_v42  ;;  %v1182_v37 = vpop.f32.mrb[13].mxu0  ;;  %v2406_v40 = vsel %vm2349_vm2, %v2399_v54, %v2405_v8  ;;  %v9693_v54 = vsel %vm505_vm1, %v2195_v43, %v2199_v26 }
 0x1eb   : > { %v1183_v33 = vpop.f32.mrb[14].mxu0  ;;  %v9670_v20 = vpop.f32.mrb[28].mxu1 }
 0x1ec   : > { %11769 = vst [vmem:[#allocation20_spill] sm:$0xff] %v9670_v20  ;;  %v9673_v41 = vadd.f32 %v9507_v63, %v1183_v33  ;;  %v1185_v0 = vpop.f32.mrb[15].mxu0  ;;  %v9675_v16 = vpop.f32.mrb[29].mxu1  ;;  %v2409_v33 = vrot.slane %v9693_v54, 2  ;;  %v2402_v54 = vsel %vm2349_vm2, %v2395_v13, %v2401_v34  ;;  %v2213_v13 = vshll.u32 %v9680_v55, 16 }
 0x1ed   : > { %v9683_v36 = vpop.f32.mrb[30].mxu1  ;;  %v2412_v0 = vsel %vm2349_vm2, %v2405_v8, %v2411_v31  ;;  %v2291_v8 = vsel %vm670_vm0, %v2288_v50, %v2290_v57 }
 0x1ee   : > { %11770 = vst [vmem:[#allocation21_spill] sm:$0xff] %v9683_v36  ;;  %7830 = vmatmul.mubr.bf16.gmra.mrb[120].mxu0 %v2400_v3  ;;  %v9689_v63 = vpop.f32.mrb[31].mxu1 }
 0x1ef   : > { %7833 = vmatprep.mubr.bf16.mxu0 %v2406_v40  ;;  %v2203_v40 = vor.u32 %v2201_v24, %v2199_v26  ;;  %v9722_v26 = vld [vmem:[%s8921_s8 + $0x90] sm:$0xff]   ;;  %v2410_v24 = vsel %vm2349_vm2, %v2403_v12, %v2409_v33 }
 0x1f0   : > { %2748 = vmatmul.mubr.bf16.gmra.mrb[136].mxu1 %v2396_v49  ;;  %v2294_v12 = vrot.slane %v9722_v26, 1 }
 0x1f1   : > { %v1188_v19 = vpop.f32.mrb[16].mxu0  ;;  %2755 = vmatprep.mubr.bf16.mxu1 %v2404_v56  ;;  %v2289_v56 = vsel %vm670_vm0, %v2286_v59, %v2288_v50 }
 0x1f2   : > { %v9701_v42 = vadd.f32 %v9526_v11, %v1188_v19  ;;  %v1190_v37 = vpop.f32.mrb[17].mxu0  ;;  %v2418_v11 = vsel %vm2349_vm2, %v2411_v31, %v2417_v6  ;;  %v9715_v19 = vld [vmem:[%s8921_s8 + $0x88] sm:$0xff]   ;;  %v9728_v31 = vsel %vm505_vm1, %v2203_v40, %v2207_v48  ;;  %v2423_v59 = vrot.slane %v2289_v56, 2 }
 0x1f3   : > { %v1191_v3 = vpop.f32.mrb[18].mxu0  ;;  %v9704_v43 = vpop.f32.mrb[32].mxu1  ;;  %v2292_v50 = vrot.slane %v9715_v19, 1  ;;  %v2415_v56 = vrot.slane %v9728_v31, 2 }
 0x1f4   : > { %11771 = vst [vmem:[#allocation22_spill] sm:$0xff] %v9704_v43  ;;  %v9708_v49 = vadd.f32 %v9535_v7, %v1191_v3  ;;  %v1193_v46 = vpop.f32.mrb[19].mxu0  ;;  %v9710_v4 = vpop.f32.mrb[33].mxu1  ;;  %v2429_v3 = vrot.slane %v2291_v8, 2  ;;  %v2211_v8 = vor.u32 %v2209_v14, %v2207_v48 }
 0x1f5   : > { %11772 = vst [vmem:[#allocation23_spill] sm:$0xff] %v9710_v4  ;;  %v9718_v37 = vpop.f32.mrb[34].mxu1  ;;  %v9754_v48 = vld [vmem:[%s8921_s8 + $0xa0] ss:$0 sps:$4 sm:$0x33]  }
 0x1f6   : > { %11773 = vst [vmem:[#allocation24_spill] sm:$0xff] %v9718_v37  ;;  %7834 = vmatmul.mubr.bf16.gmra.mrb[124].mxu0 %v2412_v0  ;;  %v9724_v7 = vpop.f32.mrb[35].mxu1  ;;  %v2407_v0 = vrot.slane %v9606_v35, 2  ;;  %v2430_v36 = vsel %vm2349_vm2, %v2423_v59, %v2429_v3 }
 0x1f7   : > { %11774 = vst [vmem:[#allocation25_spill] sm:$0xff] %v9724_v7  ;;  %7837 = vmatprep.mubr.bf16.mxu0 %v2418_v11  ;;  %v2215_v7 = vrot.slane %v2213_v13, 1 }
 0x1f8   : > { %2756 = vmatmul.mubr.bf16.gmra.mrb[140].mxu1 %v2402_v54  ;;  %v2424_v54 = vsel %vm2349_vm2, %v2417_v6, %v2423_v59  ;;  %v2408_v20 = vsel %vm2349_vm2, %v2401_v34, %v2407_v0  ;;  %v2295_v6 = vsel %vm670_vm0, %v2292_v50, %v2294_v12 }
 0x1f9   : > { %v1196_v46 = vpop.f32.mrb[20].mxu0  ;;  %2763 = vmatprep.mubr.bf16.mxu1 %v2410_v24  ;;  %v2441_v34 = vrot.slane %v2295_v6, 2 }
 0x1fa   : > { %v9736_v11 = vadd.f32 %v9521_v9, %v1196_v46  ;;  %v1198_v40 = vpop.f32.mrb[21].mxu0  ;;  %v2293_v9 = vsel %vm670_vm0, %v2290_v57, %v2292_v50  ;;  %v9746_v46 = vld [vmem:[%s8921_s8 + $0x98] sm:$0xff]   ;;  %v2216_v57 = vsel %vm505_vm1, %v2211_v8, %v2215_v7  ;;  %v2298_v50 = vrot.slane %v9754_v48, 1 }
 0x1fb   : > { %v1654_v37 = vpop.f32.mrb[36].mxu1  ;;  %v1199_v43 = vpop.f32.mrb[22].mxu0  ;;  %v2435_v59 = vrot.slane %v2293_v9, 2  ;;  %v2296_v14 = vrot.slane %v9746_v46, 1 }
 0x1fc   : > { %v9741_v24 = vadd.f32 %v9531_v58, %v1199_v43  ;;  %v1656_v4 = vpop.f32.mrb[37].mxu1  ;;  %v1201_v35 = vpop.f32.mrb[23].mxu0  ;;  %v9749_v31 = vadd.f32 %v1654_v37, %v9568_v21  ;;  %v2416_v43 = vsel %vm2349_vm2, %v2409_v33, %v2415_v56  ;;  %v2217_v21 = vshrl.u32 %v9680_v55, 16 }
 0x1fd   : > { %v1657_v40 = vpop.f32.mrb[38].mxu1  ;;  %v2221_v37 = vshll.u32 %v9687_v38, 16  ;;  %v2413_v33 = vrot.slane %v9645_v27, 2  ;;  %v2442_v27 = vsel %vm2349_vm2, %v2435_v59, %v2441_v34 }
 0x1fe   : > { %v1659_v58 = vpop.f32.mrb[39].mxu1  ;;  %7838 = vmatmul.mubr.bf16.gmra.mrb[128].mxu0 %v2424_v54  ;;  %v9758_v4 = vadd.f32 %v1657_v40, %v9577_v39  ;;  %v2219_v40 = vor.u32 %v2217_v21, %v2215_v7  ;;  %v2299_v7 = vsel %vm670_vm0, %v2296_v14, %v2298_v50 }
 0x1ff   : > { %7841 = vmatprep.mubr.bf16.mxu0 %v2430_v36  ;;  %v2421_v36 = vrot.slane %v2216_v57, 2  ;;  %v2223_v58 = vrot.slane %v2221_v37, 1  ;;  %v2414_v57 = vsel %vm2349_vm2, %v2407_v0, %v2413_v33 }
 0x200   : > { %11775 = vst [vmem:[#allocation26_spill] sm:$0xff] %v9758_v4  ;;  %2764 = vmatmul.mubr.bf16.gmra.mrb[144].mxu1 %v2408_v20  ;;  %v2436_v20 = vsel %vm2349_vm2, %v2429_v3, %v2435_v59  ;;  %v2297_v4 = vsel %vm670_vm0, %v2294_v12, %v2296_v14  ;;  %v2225_v59 = vshrl.u32 %v9687_v38, 16  ;;  %v2229_v12 = vshll.u32 %v9715_v19, 16 }
 0x201   : > { %v1204_v13 = vpop.f32.mrb[24].mxu0  ;;  %2771 = vmatprep.mubr.bf16.mxu1 %v2416_v43  ;;  %v2422_v3 = vsel %vm2349_vm2, %v2415_v56, %v2421_v36  ;;  %v2224_v37 = vsel %vm505_vm1, %v2219_v40, %v2223_v58  ;;  %v2419_v14 = vrot.slane %v9652_v44, 2 }
 0x202   : > { %v9767_v39 = vadd.f32 %v9551_v32, %v1204_v13  ;;  %v1206_v54 = vpop.f32.mrb[25].mxu0  ;;  %v2227_v40 = vor.u32 %v2225_v59, %v2223_v58  ;;  %v2459_v59 = vrot.slane %v2298_v50, 2 }
 0x203   : > { %v1662_v8 = vpop.f32.mrb[40].mxu1  ;;  %v1207_v35 = vpop.f32.mrb[26].mxu0  ;;  %v2453_v54 = vrot.slane %v2299_v7, 2  ;;  %v2420_v7 = vsel %vm2349_vm2, %v2413_v33, %v2419_v14  ;;  %v2425_v33 = vrot.slane %v9680_v55, 2 }
 0x204   : > { %v9771_v9 = vadd.f32 %v9559_v10, %v1207_v35  ;;  %v1664_v6 = vpop.f32.mrb[41].mxu1  ;;  %v1209_v43 = vpop.f32.mrb[27].mxu0  ;;  %v9776_v32 = vadd.f32 %v1662_v8, %v9599_v23  ;;  %v2447_v23 = vrot.slane %v2297_v4, 2 }
 0x205   : > { %v1665_v13 = vpop.f32.mrb[42].mxu1  ;;  %v2231_v6 = vrot.slane %v2229_v12, 1 }
 0x206   : > { %v1667_v21 = vpop.f32.mrb[43].mxu1  ;;  %7842 = vmatmul.mubr.bf16.gmra.mrb[132].mxu0 %v2436_v20  ;;  %v9782_v10 = vadd.f32 %v1665_v13, %v9609_v61  ;;  %v2427_v61 = vrot.slane %v2224_v37, 2  ;;  %v2448_v43 = vsel %vm2349_vm2, %v2441_v34, %v2447_v23  ;;  %v2233_v34 = vshrl.u32 %v9715_v19, 16 }
 0x207   : > { %7845 = vmatprep.mubr.bf16.mxu0 %v2442_v27  ;;  %v2237_v37 = vshll.u32 %v9722_v26, 16 }
 0x208   : > { %2772 = vmatmul.mubr.bf16.gmra.mrb[148].mxu1 %v2414_v57  ;;  %v2454_v57 = vsel %vm2349_vm2, %v2447_v23, %v2453_v54 }
 0x209   : > { %v1212_v0 = vpop.f32.mrb[28].mxu0  ;;  %2779 = vmatprep.mubr.bf16.mxu1 %v2422_v3  ;;  %v2428_v3 = vsel %vm2349_vm2, %v2421_v36, %v2427_v61 }
 0x20a   : > { %v9789_v56 = vadd.f32 %v9544_v28, %v1212_v0  ;;  %v1214_v8 = vpop.f32.mrb[29].mxu0 }
 0x20b   : > { %v1670_v35 = vpop.f32.mrb[44].mxu1  ;;  %v1215_v20 = vpop.f32.mrb[30].mxu0  ;;  %v2235_v8 = vor.u32 %v2233_v34, %v2231_v6 }
 0x20c   : > { %v9793_v27 = vadd.f32 %v9555_v62, %v1215_v20  ;;  %v1672_v4 = vpop.f32.mrb[45].mxu1  ;;  %v1217_v13 = vpop.f32.mrb[31].mxu0  ;;  %v9797_v44 = vadd.f32 %v1670_v35, %v9631_v52  ;;  %v2232_v62 = vsel %vm505_vm1, %v2227_v40, %v2231_v6  ;;  %v2239_v35 = vrot.slane %v2237_v37, 1  ;;  %v8237_v40 = vld [vmem:[#allocation9 + $0x140] sm:$0xff]  }
 0x20d   : > { %v1673_v28 = vpop.f32.mrb[46].mxu1  ;;  %v2433_v23 = vrot.slane %v2232_v62, 2  ;;  %v2460_v20 = vsel %vm2349_vm2, %v2453_v54, %v2459_v59  ;;  %7853 = vmatprep.subr.bf16.mxu1 %v8237_v40  ;;  %v8239_v62 = vld [vmem:[#allocation9 + $0xc8] sm:$0xff]  }
 0x20e   : > { %v1675_v21 = vpop.f32.mrb[47].mxu1  ;;  %7846 = vmatmul.mubr.bf16.gmra.mrb[136].mxu0 %v2448_v43  ;;  %v9802_v58 = vadd.f32 %v1673_v28, %v9638_v60  ;;  %7854 = vmatpush3.bf16.msra.mxu1 %v8237_v40 }
 0x20f   : > { %7849 = vmatprep.mubr.bf16.mxu0 %v2454_v57  ;;  %v2426_v57 = vsel %vm2349_vm2, %v2419_v14, %v2425_v33  ;;  %v2434_v6 = vsel %vm2349_vm2, %v2427_v61, %v2433_v23  ;;  %v2431_v21 = vrot.slane %v9687_v38, 2 }
 0x210   : > { %2780 = vmatmul.mubr.bf16.gmra.mrb[152].mxu1 %v2420_v7  ;;  %v2240_v7 = vsel %vm505_vm1, %v2235_v8, %v2239_v35 }
 0x211   : > { %v1220_v52 = vpop.f32.mrb[32].mxu0  ;;  %2787 = vmatprep.mubr.bf16.mxu1 %v2428_v3  ;;  %v2439_v3 = vrot.slane %v2240_v7, 2 }
 0x212   : > { %v1222_v12 = vpop.f32.mrb[33].mxu0  ;;  %v9809_v36 = vadd.f32 %v9581_v15, %v1220_v52  ;;  %v8238_v15 = vld [vmem:[#allocation9 + $0xc0] sm:$0xff]  }
 0x213   : > { %v1678_v60 = vpop.f32.mrb[48].mxu1  ;;  %v1223_v0 = vpop.f32.mrb[34].mxu0  ;;  %4772 = vmatpush1.bf16.msra.mxu0 %v8238_v15 }
 0x214   : > { %v1680_v43 = vpop.f32.mrb[49].mxu1  ;;  %v1225_v4 = vpop.f32.mrb[35].mxu0  ;;  %v9813_v50 = vadd.f32 %v9588_v5, %v1223_v0  ;;  %v9816_v13 = vadd.f32 %v1678_v60, %v9666_v53  ;;  %v2241_v5 = vshrl.u32 %v9722_v26, 16  ;;  %v2245_v53 = vshll.u32 %v9746_v46, 16  ;;  %4773 = vmatprep.subr.bf16.mxu0 %v11762_v18 }
 0x215   : > { %v1681_v55 = vpop.f32.mrb[50].mxu1  ;;  %v2440_v43 = vsel %vm2349_vm2, %v2433_v23, %v2439_v3 }
 0x216   : > { %v1683_v28 = vpop.f32.mrb[51].mxu1  ;;  %7850 = vmatmul.mubr.bf16.gmra.mrb[140].mxu0 %v2460_v20  ;;  %v9821_v54 = vadd.f32 %v1681_v55, %v9673_v41  ;;  %v2243_v59 = vor.u32 %v2241_v5, %v2239_v35  ;;  %v2247_v52 = vrot.slane %v2245_v53, 1  ;;  %v2432_v20 = vsel %vm2349_vm2, %v2425_v33, %v2431_v21  ;;  %v8241_v5 = vld [vmem:[#allocation9 + $0xd8] sm:$0xff]  }
 0x217   : > { %4774 = vmatpush1.bf16.msra.mxu0 %v8239_v62  ;;  %v2437_v33 = vrot.slane %v9715_v19, 2 }
 0x218   : > { %2788 = vmatmul.mubr.bf16.gmra.mrb[156].mxu1 %v2426_v57  ;;  %4775 = vmatprep.subr.bf16.mxu0 %v11762_v18  ;;  %v2248_v4 = vsel %vm505_vm1, %v2243_v59, %v2247_v52 }
 0x219   : > { %v1228_v14 = vpop.f32.mrb[36].mxu0  ;;  %2795 = vmatprep.mubr.bf16.mxu1 %v2434_v6  ;;  %v2445_v15 = vrot.slane %v2248_v4, 2 }
 0x21a   : > { %v1230_v61 = vpop.f32.mrb[37].mxu0  ;;  %v9829_v41 = vadd.f32 %v9571_v22, %v1228_v14  ;;  %v8240_v22 = vld [vmem:[#allocation9 + $0xd0] sm:$0xff]  }
 0x21b   : > { %v1686_v34 = vpop.f32.mrb[52].mxu1  ;;  %v1231_v37 = vpop.f32.mrb[38].mxu0  ;;  %4776 = vmatpush1.bf16.msra.mxu0 %v8240_v22  ;;  %v2446_v59 = vsel %vm2349_vm2, %v2439_v3, %v2445_v15 }
 0x21c   : > { %v1688_v12 = vpop.f32.mrb[53].mxu1  ;;  %v1233_v60 = vpop.f32.mrb[39].mxu0  ;;  %v9832_v0 = vadd.f32 %v9585_v25, %v1231_v37  ;;  %v9835_v8 = vadd.f32 %v1686_v34, %v9701_v42  ;;  %v2249_v25 = vshrl.u32 %v9746_v46, 16  ;;  %v2253_v42 = vshll.u32 %v9754_v48, 16  ;;  %4777 = vmatprep.subr.bf16.mxu0 %v11762_v18  ;;  %v8242_v37 = vld [vmem:[#allocation9 + $0x148] sm:$0xff]  }
 0x21d   : > { %v1689_v38 = vpop.f32.mrb[54].mxu1  ;;  %v2438_v34 = vsel %vm2349_vm2, %v2431_v21, %v2437_v33  ;;  %v8243_v12 = vld [vmem:[#allocation9 + $0xe0] sm:$0xff]   ;;  %7855 = vmatprep.subr.bf16.mxu1 %v8242_v37  ;;  %v2443_v60 = vrot.slane %v9722_v26, 2 }
 0x21e   : > { %v1691_v40 = vpop.f32.mrb[55].mxu1  ;;  %v9841_v35 = vadd.f32 %v1689_v38, %v9708_v49  ;;  %v2251_v6 = vor.u32 %v2249_v25, %v2247_v52  ;;  %v2255_v7 = vrot.slane %v2253_v42, 1  ;;  %7856 = vmatpush3.bf16.msra.mxu1 %v8242_v37  ;;  %v8236_v37 = vld [vmem:[%s8921_s8 + $0xa0] ss:$0 sps:$4 sm:$0x11]  }
 0x21f   : > { %4778 = vmatpush1.bf16.msra.mxu0 %v8241_v5  ;;  %v2444_v42 = vsel %vm2349_vm2, %v2437_v33, %v2443_v60 }
 0x220   : > { %2796 = vmatmul.mubr.bf16.gmra.mrb[160].mxu1 %v2432_v20  ;;  %4779 = vmatprep.subr.bf16.mxu0 %v11762_v18  ;;  %v2257_v20 = vshrl.u32 %v9754_v48, 16 }
 0x221   : > { %v1236_v55 = vpop.f32.mrb[40].mxu0  ;;  %2803 = vmatprep.mubr.bf16.mxu1 %v2440_v43 }
 0x222   : > { %v1238_v57 = vpop.f32.mrb[41].mxu0  ;;  %v9849_v23 = vadd.f32 %v9613_v29, %v1236_v55  ;;  %v2259_v55 = vor.u32 %v2257_v20, %v2255_v7 }
 0x223   : > { %v1694_v49 = vpop.f32.mrb[56].mxu1  ;;  %v1239_v28 = vpop.f32.mrb[42].mxu0  ;;  %4780 = vmatpush1.bf16.msra.mxu0 %v8243_v12 }
 0x224   : > { %v1696_v53 = vpop.f32.mrb[57].mxu1  ;;  %v1241_v14 = vpop.f32.mrb[43].mxu0  ;;  %v9852_v61 = vadd.f32 %v9620_v51, %v1239_v28  ;;  %v9855_v62 = vadd.f32 %v1694_v49, %v9736_v11  ;;  %v2256_v51 = vsel %vm505_vm1, %v2251_v6, %v2255_v7  ;;  %4781 = vmatprep.subr.bf16.mxu0 %v11762_v18  ;;  %v8244_v49 = vld [vmem:[#allocation9 + $0xe8] sm:$0xff]   ;;  %v2457_v6 = vrot.slane %v2259_v55, 2 }
 0x225   : > { %v1697_v19 = vpop.f32.mrb[58].mxu1  ;;  %v2451_v38 = vrot.slane %v2256_v51, 2  ;;  %v2455_v51 = vrot.slane %v8236_v37, 2 }
 0x226   : > { %v1699_v29 = vpop.f32.mrb[59].mxu1  ;;  %v9860_v52 = vadd.f32 %v1697_v19, %v9741_v24  ;;  %v345_v19 = vld [vmem:[#allocation2 + $0x8] sm:$0x3] }
 0x227   : > { %4782 = vmatpush1.bf16.msra.mxu0 %v8244_v49  ;;  %v346_v29 = vsel %vm344_vm5, 0, %v345_v19  ;;  %v2458_v12 = vsel %vm2349_vm2, %v2451_v38, %v2457_v6  ;;  %v11776_v19 = vld [vmem:[#allocation20_spill] sm:$0xff] }
 0x228   : > { %2804 = vmatmul.mubr.bf16.gmra.mrb[164].mxu1 %v2438_v34  ;;  %4783 = vmatprep.subr.bf16.mxu0 %v11762_v18  ;;  %347 = vst [vmem:[#allocation2 + $0x8] sm:$0x3] %v346_v29 }
 0x229   : > { %v1244_v11 = vpop.f32.mrb[44].mxu0  ;;  %2811 = vmatprep.mubr.bf16.mxu1 %v2446_v59 }
 0x22a   : > { %v1246_v21 = vpop.f32.mrb[45].mxu0  ;;  %v9867_v3 = vadd.f32 %v9603_v45, %v1244_v11  ;;  %v2452_v45 = vsel %vm2349_vm2, %v2445_v15, %v2451_v38  ;;  %v8245_v15 = vld [vmem:[#allocation9 + $0xf0] sm:$0xff]  }
 0x22b   : > { %v1702_v24 = vpop.f32.mrb[60].mxu1  ;;  %v1247_v22 = vpop.f32.mrb[46].mxu0  ;;  %4784 = vmatpush1.bf16.msra.mxu0 %v8245_v15 }
 0x22c   : > { %v1704_v40 = vpop.f32.mrb[61].mxu1  ;;  %v1249_v43 = vpop.f32.mrb[47].mxu0  ;;  %v9871_v4 = vadd.f32 %v9616_v47, %v1247_v22  ;;  %v9874_v26 = vadd.f32 %v1702_v24, %v9767_v39  ;;  %v2449_v47 = vrot.slane %v9746_v46, 2  ;;  %4785 = vmatprep.subr.bf16.mxu0 %v11762_v18 }
 0x22d   : > { %v1705_v25 = vpop.f32.mrb[62].mxu1 }
 0x22e   : > { %v1707_v48 = vpop.f32.mrb[63].mxu1  ;;  %v9879_v57 = vadd.f32 %v1705_v25, %v9771_v9  ;;  %v2456_v43 = vsel %vm2349_vm2, %v2449_v47, %v2455_v51  ;;  %v8246_v25 = vld [vmem:[#allocation9 + $0xf8] sm:$0xff]  }
 0x22f   : > { %4786 = vmatpush1.bf16.msra.mxu0 %v8246_v25 }
 0x230   : > { %2812 = vmatmul.mubr.bf16.gmra.mrb[168].mxu1 %v2444_v42  ;;  %4787 = vmatprep.subr.bf16.mxu0 %v11762_v18 }
 0x231   : > { %v1252_v28 = vpop.f32.mrb[48].mxu0  ;;  %2819 = vmatprep.mubr.bf16.mxu1 %v2452_v45 }
 0x232   : > { %v1254_v39 = vpop.f32.mrb[49].mxu0  ;;  %v9884_v33 = vadd.f32 %v9642_v17, %v1252_v28  ;;  %v2450_v17 = vsel %vm2349_vm2, %v2443_v60, %v2449_v47 }
 0x233   : > { %v1710_v7 = vpop.f32.mrb[64].mxu1  ;;  %v1255_v5 = vpop.f32.mrb[50].mxu0 }
 0x234   : > { %v1712_v9 = vpop.f32.mrb[65].mxu1  ;;  %v1257_v53 = vpop.f32.mrb[51].mxu0  ;;  %v9887_v14 = vadd.f32 %v9655_v30, %v1255_v5  ;;  %v9890_v46 = vadd.f32 %v1710_v7, %v9789_v56 }
 0x235   : > { %v1713_v34 = vpop.f32.mrb[66].mxu1  ;;  %v8249_v9 = vld [vmem:[#allocation9 + $0x108] sm:$0xff]  }
 0x236   : > { %v1715_v59 = vpop.f32.mrb[67].mxu1  ;;  %v9898_v30 = vadd.f32 %v1713_v34, %v9793_v27 }
 0x238   : > { %2820 = vmatmul.mubr.bf16.gmra.mrb[172].mxu1 %v2450_v17 }
 0x239   : > { %v1260_v56 = vpop.f32.mrb[52].mxu0  ;;  %2827 = vmatprep.mubr.bf16.mxu1 %v2458_v12 }
 0x23a   : > { %v1262_v11 = vpop.f32.mrb[53].mxu0  ;;  %v9901_v21 = vadd.f32 %v9635_v2, %v1260_v56  ;;  %v8250_v56 = vld [vmem:[#allocation9 + $0x110] sm:$0xff]  }
 0x23b   : > { %v1718_v60 = vpop.f32.mrb[68].mxu1  ;;  %v1263_v20 = vpop.f32.mrb[54].mxu0 }
 0x23c   : > { %v9904_v24 = vadd.f32 %v1718_v60, %v9809_v36  ;;  %v1720_v22 = vpop.f32.mrb[69].mxu1  ;;  %v1265_v40 = vpop.f32.mrb[55].mxu0  ;;  %v9907_v38 = vadd.f32 %v9648_v1, %v1263_v20  ;;  %v8248_v36 = vld [vmem:[#allocation9 + $0x100] sm:$0xff]  }
 0x23d   : > { %v1721_v27 = vpop.f32.mrb[70].mxu1  ;;  %4788 = vmatpush1.bf16.msra.mxu0 %v8248_v36 }
 0x23e   : > { %v9911_v42 = vadd.f32 %v1721_v27, %v9813_v50  ;;  %v1723_v48 = vpop.f32.mrb[71].mxu1  ;;  %4789 = vmatprep.subr.bf16.mxu0 %v11762_v18 }
 0x240   : > { %2828 = vmatmul.mubr.bf16.gmra.mrb[176].mxu1 %v2456_v43 }
 0x241   : > { %v1268_v2 = vpop.f32.mrb[56].mxu0  ;;  %4790 = vmatpush1.bf16.msra.mxu0 %v8249_v9 }
 0x242   : > { %v1270_v45 = vpop.f32.mrb[57].mxu0  ;;  %v9915_v55 = vadd.f32 %v9675_v16, %v1268_v2  ;;  %v8247_v16 = vld [vmem:[#allocation9 + $0x150] sm:$0xff]   ;;  %4791 = vmatprep.subr.bf16.mxu0 %v11762_v18 }
 0x243   : > { %v1726_v1 = vpop.f32.mrb[72].mxu1  ;;  %v1271_v49 = vpop.f32.mrb[58].mxu0  ;;  %7857 = vmatprep.subr.bf16.mxu1 %v8247_v16  ;;  %v11779_v2 = vld [vmem:[#allocation25_spill] sm:$0xff] }
 0x244   : > { %v9918_v28 = vadd.f32 %v1726_v1, %v9829_v41  ;;  %v1728_v47 = vpop.f32.mrb[73].mxu1  ;;  %v1273_v50 = vpop.f32.mrb[59].mxu0  ;;  %v9921_v39 = vadd.f32 %v9689_v63, %v1271_v49  ;;  %7858 = vmatpush3.bf16.msra.mxu1 %v8247_v16  ;;  %v8252_v49 = vld [vmem:[#allocation9 + $0x158] sm:$0xff]   ;;  %v8254_v16 = vld [vmem:[#allocation9 + $0x160] sm:$0xff]  }
 0x245   : > { %v1729_v6 = vpop.f32.mrb[74].mxu1  ;;  %4792 = vmatpush1.bf16.msra.mxu0 %v8250_v56  ;;  %v8251_v47 = vld [vmem:[#allocation9 + $0x118] sm:$0xff]   ;;  %7859 = vmatprep.subr.bf16.mxu1 %v8252_v49  ;;  %v8255_v56 = vld [vmem:[#allocation9 + $0x168] sm:$0xff]  }
 0x246   : > { %v9925_v15 = vadd.f32 %v1729_v6, %v9832_v0  ;;  %v1731_v7 = vpop.f32.mrb[75].mxu1  ;;  %v11777_v0 = vld [vmem:[#allocation21_spill] sm:$0xff]  ;;  %4793 = vmatprep.subr.bf16.mxu0 %v11762_v18  ;;  %v11780_v6 = vld [vmem:[#allocation22_spill] sm:$0xff] }
 0x248   : > { %7860 = vmatpush3.bf16.msra.mxu1 %v8252_v49  ;;  %v11782_v49 = vld [vmem:[#allocation26_spill] sm:$0xff] }
 0x249   : > { %v1276_v5 = vpop.f32.mrb[60].mxu0  ;;  %4794 = vmatpush1.bf16.msra.mxu0 %v8251_v47  ;;  %7861 = vmatprep.subr.bf16.mxu1 %v8254_v16 }
 0x24a   : > { %v1278_v53 = vpop.f32.mrb[61].mxu0  ;;  %v9928_v41 = vadd.f32 %v11776_v19, %v1276_v5  ;;  %4795 = vmatprep.subr.bf16.mxu0 %v11762_v18 }
 0x24b   : > { %v1734_v34 = vpop.f32.mrb[76].mxu1  ;;  %v1279_v17 = vpop.f32.mrb[62].mxu0 }
 0x24c   : > { %v9931_v63 = vadd.f32 %v1734_v34, %v9849_v23  ;;  %v1736_v37 = vpop.f32.mrb[77].mxu1  ;;  %v1281_v29 = vpop.f32.mrb[63].mxu0  ;;  %v9934_v59 = vadd.f32 %v11777_v0, %v1279_v17  ;;  %v11778_v23 = vld [vmem:[#allocation23_spill] sm:$0xff]  ;;  %7862 = vmatpush3.bf16.msra.mxu1 %v8254_v16 }
 0x24d   : > { %v1737_v12 = vpop.f32.mrb[78].mxu1  ;;  %v8253_v37 = vld [vmem:[#allocation9 + $0x120] sm:$0xff]   ;;  %7863 = vmatprep.subr.bf16.mxu1 %v8255_v56 }
 0x24e   : > { %v9938_v51 = vadd.f32 %v1737_v12, %v9852_v61  ;;  %v1739_v11 = vpop.f32.mrb[79].mxu1  ;;  %4796 = vmatpush1.bf16.msra.mxu0 %v8253_v37 }
 0x24f   : > { %4797 = vmatprep.subr.bf16.mxu0 %v11762_v18 }
 0x250   : > { %7864 = vmatpush3.bf16.msra.mxu1 %v8255_v56 }
 0x251   : > { %v1284_v60 = vpop.f32.mrb[64].mxu0 }
 0x252   : > { %v1286_v20 = vpop.f32.mrb[65].mxu0  ;;  %v9942_v22 = vadd.f32 %v11778_v23, %v1284_v60  ;;  %v8257_v23 = vld [vmem:[#allocation9 + $0x170] sm:$0xff]  }
 0x253   : > { %v1742_v40 = vpop.f32.mrb[80].mxu1  ;;  %v1287_v27 = vpop.f32.mrb[66].mxu0  ;;  %7865 = vmatprep.subr.bf16.mxu1 %v8257_v23 }
 0x254   : > { %v9945_v43 = vadd.f32 %v1742_v40, %v9867_v3  ;;  %v1744_v25 = vpop.f32.mrb[81].mxu1  ;;  %v1289_v48 = vpop.f32.mrb[67].mxu0  ;;  %v9948_v36 = vadd.f32 %v11779_v2, %v1287_v27  ;;  %7866 = vmatpush3.bf16.msra.mxu1 %v8257_v23 }
 0x255   : > { %v1745_v61 = vpop.f32.mrb[82].mxu1 }
 0x256   : > { %v9951_v45 = vadd.f32 %v1745_v61, %v9871_v4  ;;  %v1747_v1 = vpop.f32.mrb[83].mxu1  ;;  %v11781_v4 = vld [vmem:[#allocation24_spill] sm:$0xff] }
 0x259   : > { %v1292_v50 = vpop.f32.mrb[68].mxu0 }
 0x25a   : > { %v9954_v7 = vadd.f32 %v11780_v6, %v1292_v50  ;;  %v1294_v3 = vpop.f32.mrb[69].mxu0  ;;  %v8259_v6 = vld [vmem:[#allocation9 + $0x178] sm:$0xff]  }
 0x25b   : > { %v1750_v5 = vpop.f32.mrb[84].mxu1  ;;  %v1295_v9 = vpop.f32.mrb[70].mxu0  ;;  %7867 = vmatprep.subr.bf16.mxu1 %v8259_v6 }
 0x25c   : > { %v9958_v53 = vadd.f32 %v1750_v5, %v9884_v33  ;;  %v9961_v19 = vadd.f32 %v11781_v4, %v1295_v9  ;;  %v1752_v34 = vpop.f32.mrb[85].mxu1  ;;  %v1297_v17 = vpop.f32.mrb[71].mxu0  ;;  %v8256_v33 = vld [vmem:[#allocation9 + $0x128] sm:$0xff]   ;;  %7868 = vmatpush3.bf16.msra.mxu1 %v8259_v6 }
 0x25d   : > { %v1753_v29 = vpop.f32.mrb[86].mxu1  ;;  %4798 = vmatpush1.bf16.msra.mxu0 %v8256_v33  ;;  %5269 = vmatprep.subr.bf16.mxu1 %v11762_v18 }
 0x25e   : > { %v9964_v0 = vadd.f32 %v1753_v29, %v9887_v14  ;;  %v1755_v12 = vpop.f32.mrb[87].mxu1  ;;  %4799 = vmatprep.subr.bf16.mxu0 %v11762_v18 }
 0x261   : > { %v7767_v11 = vpop.f32.mrb[72].mxu0 }
 0x262   : > { %v9968_v60 = vadd.f32 %v7767_v11, %v9776_v32  ;;  %v1831_v20 = vpop.f32.mrb[73].mxu0  ;;  %v8258_v32 = vld [vmem:[#allocation9 + $0x130] sm:$0xff]  }
 0x263   : > { %v1758_v40 = vpop.f32.mrb[88].mxu1  ;;  %v9971_v27 = vadd.f32 %v1831_v20, %v9749_v31  ;;  %v7768_v14 = vpop.f32.mrb[74].mxu0  ;;  %4800 = vmatpush1.bf16.msra.mxu0 %v8258_v32 }
 0x264   : > { %v9975_v25 = vadd.f32 %v1758_v40, %v9901_v21  ;;  %v1760_v48 = vpop.f32.mrb[89].mxu1  ;;  %v9978_v2 = vadd.f32 %v7768_v14, %v9782_v10  ;;  %v1834_v61 = vpop.f32.mrb[75].mxu0  ;;  %4801 = vmatprep.subr.bf16.mxu0 %v11762_v18  ;;  %v8260_v21 = vld [vmem:[#allocation9 + $0x138] sm:$0xff]  }
 0x265   : > { %v1761_v1 = vpop.f32.mrb[90].mxu1  ;;  %v9981_v47 = vadd.f32 %v1834_v61, %v11782_v49 }
 0x266   : > { %v9984_v31 = vadd.f32 %v1761_v1, %v9907_v38  ;;  %v1763_v50 = vpop.f32.mrb[91].mxu1 }
 0x267   : > { %4802 = vmatpush1.bf16.msra.mxu0 %v8260_v21 }
 0x269   : > { %v7771_v10 = vpop.f32.mrb[76].mxu0 }
 0x26a   : > { %v9988_v3 = vadd.f32 %v7771_v10, %v9816_v13  ;;  %v1847_v16 = vpop.f32.mrb[77].mxu0 }
 0x26b   : > { %v1766_v5 = vpop.f32.mrb[92].mxu1  ;;  %v9992_v38 = vadd.f32 %v1847_v16, %v9797_v44  ;;  %v7772_v9 = vpop.f32.mrb[78].mxu0 }
 0x26c   : > { %v9995_v4 = vadd.f32 %v1766_v5, %v9915_v55  ;;  %v1768_v34 = vpop.f32.mrb[93].mxu1  ;;  %v9998_v17 = vadd.f32 %v7772_v9, %v9821_v54  ;;  %v1850_v37 = vpop.f32.mrb[79].mxu0 }
 0x26d   : > { %v1769_v29 = vpop.f32.mrb[94].mxu1  ;;  %v10001_v13 = vadd.f32 %v1850_v37, %v9802_v58 }
 0x26e   : > { %v10004_v12 = vadd.f32 %v1769_v29, %v9921_v39  ;;  %v1771_v56 = vpop.f32.mrb[95].mxu1 }
 0x271   : > { %v7775_v33 = vpop.f32.mrb[80].mxu0 }
 0x272   : > { %v10007_v44 = vadd.f32 %v7775_v33, %v9855_v62  ;;  %v1863_v11 = vpop.f32.mrb[81].mxu0 }
 0x273   : > { %v1774_v55 = vpop.f32.mrb[96].mxu1  ;;  %v10010_v20 = vadd.f32 %v1863_v11, %v9835_v8  ;;  %v7776_v54 = vpop.f32.mrb[82].mxu0 }
 0x274   : > { %v10013_v23 = vadd.f32 %v1774_v55, %v9928_v41  ;;  %v1776_v40 = vpop.f32.mrb[97].mxu1  ;;  %v10016_v58 = vadd.f32 %v7776_v54, %v9860_v52  ;;  %v1866_v39 = vpop.f32.mrb[83].mxu0 }
 0x275   : > { %v1777_v14 = vpop.f32.mrb[98].mxu1  ;;  %v10019_v48 = vadd.f32 %v1866_v39, %v9841_v35 }
 0x276   : > { %v10022_v62 = vadd.f32 %v1777_v14, %v9934_v59  ;;  %v1779_v61 = vpop.f32.mrb[99].mxu1 }
 0x279   : > { %v7779_v32 = vpop.f32.mrb[84].mxu0 }
 0x27a   : > { %v10025_v8 = vadd.f32 %v7779_v32, %v9890_v46  ;;  %v1879_v1 = vpop.f32.mrb[85].mxu0 }
 0x27b   : > { %v1782_v41 = vpop.f32.mrb[100].mxu1  ;;  %v10028_v49 = vadd.f32 %v1879_v1, %v9874_v26  ;;  %v7780_v52 = vpop.f32.mrb[86].mxu0 }
 0x27c   : > { %v10031_v50 = vadd.f32 %v1782_v41, %v9942_v22  ;;  %v1784_v6 = vpop.f32.mrb[101].mxu1  ;;  %v10034_v35 = vadd.f32 %v7780_v52, %v9898_v30  ;;  %v1882_v59 = vpop.f32.mrb[87].mxu0  ;;  %v8266_v22 = vld [vmem:[#allocation9 + $0x80] sm:$0xff]  }
 0x27d   : > { %v1785_v21 = vpop.f32.mrb[102].mxu1  ;;  %v10037_v10 = vadd.f32 %v1882_v59, %v9879_v57  ;;  %7905 = vmatprep.subr.bf16.mxu0 %v8266_v22 }
 0x27e   : > { %v10040_v46 = vadd.f32 %v1785_v21, %v9948_v36  ;;  %v1787_v16 = vpop.f32.mrb[103].mxu1 }
 0x281   : > { %v7783_v5 = vpop.f32.mrb[88].mxu0 }
 0x282   : > { %v10043_v26 = vadd.f32 %v7783_v5, %v9918_v28  ;;  %v1895_v9 = vpop.f32.mrb[89].mxu0 }
 0x283   : > { %v1790_v34 = vpop.f32.mrb[104].mxu1  ;;  %v10046_v37 = vadd.f32 %v1895_v9, %v9904_v24  ;;  %v7784_v30 = vpop.f32.mrb[90].mxu0 }
 0x284   : > { %v1791_v29 = vadd.f32 %v1790_v34, %v9954_v7  ;;  %v1792_v56 = vpop.f32.mrb[105].mxu1  ;;  %v10050_v57 = vadd.f32 %v7784_v30, %v9925_v15  ;;  %v1898_v36 = vpop.f32.mrb[91].mxu0 }
 0x285   : > { %v1793_v33 = vpop.f32.mrb[106].mxu1  ;;  %v10053_v11 = vadd.f32 %v1898_v36, %v9911_v42  ;;  %v3167_v34 = vpop.permute.xlu0 %3166 }
 0x286   : > { %v1794_v28 = vadd.f32 %v1793_v33, %v9961_v19  ;;  %v1795_v55 = vpop.f32.mrb[107].mxu1 }
 0x289   : > { %v7787_v54 = vpop.f32.mrb[92].mxu0 }
 0x28a   : > { %v10057_v24 = vadd.f32 %v7787_v54, %v9945_v43  ;;  %v1911_v40 = vpop.f32.mrb[93].mxu0 }
 0x28b   : > { %v10060_v7 = vadd.f32 %v1911_v40, %v9931_v63  ;;  %v7788_v39 = vpop.f32.mrb[94].mxu0  ;;  %v2693_v15 = vpop.f32.mrb[108].mxu1 }
 0x28c   : > { %v10063_v14 = vadd.f32 %v7788_v39, %v9951_v45  ;;  %v1914_v61 = vpop.f32.mrb[95].mxu0  ;;  %v2695_v32 = vpop.f32.mrb[109].mxu1 }
 0x28d   : > { %v10066_v42 = vadd.f32 %v1914_v61, %v9938_v51  ;;  %v2696_v19 = vpop.f32.mrb[110].mxu1  ;;  %v3177_v39 = vpop.permute.xlu1 %3176 }
 0x28e   : > { %v2698_v1 = vpop.f32.mrb[111].mxu1  ;;  %v3172_v61 = vpop.permute.xlu0 %3171 }
 0x291   : > { %v7791_v41 = vpop.f32.mrb[96].mxu0 }
 0x292   : > { %v10069_v43 = vadd.f32 %v7791_v41, %v9975_v25  ;;  %v1927_v52 = vpop.f32.mrb[97].mxu0 }
 0x293   : > { %v10072_v63 = vadd.f32 %v1927_v52, %v9958_v53  ;;  %v7792_v6 = vpop.f32.mrb[98].mxu0  ;;  %v2701_v59 = vpop.f32.mrb[112].mxu1 }
 0x294   : > { %v10075_v45 = vadd.f32 %v7792_v6, %v9984_v31  ;;  %v1930_v21 = vpop.f32.mrb[99].mxu0  ;;  %v2703_v16 = vpop.f32.mrb[113].mxu1 }
 0x295   : > { %v10078_v51 = vadd.f32 %v1930_v21, %v9964_v0  ;;  %v2704_v5 = vpop.f32.mrb[114].mxu1 }
 0x296   : > { %v2706_v9 = vpop.f32.mrb[115].mxu1 }
 0x299   : > { %v7795_v22 = vpop.f32.mrb[100].mxu0 }
 0x29a   : > { %v10081_v25 = vadd.f32 %v7795_v22, %v10013_v23  ;;  %v1943_v30 = vpop.f32.mrb[101].mxu0  ;;  %v3182_v22 = vpop.permute.xlu1 %3181 }
 0x29b   : > { %v10084_v53 = vadd.f32 %v1943_v30, %v9995_v4  ;;  %v7796_v56 = vpop.f32.mrb[102].mxu0  ;;  %v2709_v36 = vpop.f32.mrb[116].mxu1 }
 0x29c   : > { %11783 = vst [vmem:[#allocation20_spill] sm:$0xff] %v10081_v25  ;;  %v10087_v31 = vadd.f32 %v7796_v56, %v10022_v62  ;;  %v1946_v33 = vpop.f32.mrb[103].mxu0  ;;  %v2711_v55 = vpop.f32.mrb[117].mxu1 }
 0x29d   : > { %11784 = vst [vmem:[#allocation21_spill] sm:$0xff] %v10084_v53  ;;  %v10090_v0 = vadd.f32 %v1946_v33, %v10004_v12  ;;  %v10092_v54 = vpop.f32.mrb[118].mxu1  ;;  %v10104_v56 = vpop.permute.xlu0 %3186  ;;  %v10106_v55 = vld [vmem:[#allocation11] ss:$0 sm:$0xff] }
 0x29e   : > { %11785 = vst [vmem:[#allocation23_spill] sm:$0xff] %v10087_v31  ;;  %v2714_v40 = vpop.f32.mrb[119].mxu1 }
 0x29f   : > { %11786 = vst [vmem:[#allocation25_spill] sm:$0xff] %v10090_v0 }
 0x2a1   : > { %v7799_v23 = vpop.f32.mrb[104].mxu0 }
 0x2a2   : > { %v10094_v32 = vadd.f32 %v7799_v23, %v1791_v29  ;;  %v1959_v4 = vpop.f32.mrb[105].mxu0 }
 0x2a3   : > { %v10097_v1 = vadd.f32 %v1959_v4, %v10031_v50  ;;  %v7800_v41 = vpop.f32.mrb[106].mxu0  ;;  %v2717_v62 = vpop.f32.mrb[120].mxu1 }
 0x2a4   : > { %11787 = vst [vmem:[#allocation22_spill] sm:$0xff] %v10094_v32  ;;  %v10099_v52 = vadd.f32 %v7800_v41, %v1794_v28  ;;  %v1962_v6 = vpop.f32.mrb[107].mxu0  ;;  %v2719_v21 = vpop.f32.mrb[121].mxu1 }
 0x2a5   : > { %11788 = vst [vmem:[#allocation24_spill] sm:$0xff] %v10097_v1  ;;  %v10102_v12 = vadd.f32 %v1962_v6, %v10040_v46  ;;  %v2720_v16 = vpop.f32.mrb[122].mxu1 }
 0x2a6   : > { %11789 = vst [vmem:[#allocation26_spill] sm:$0xff] %v10099_v52  ;;  %v2722_v9 = vpop.f32.mrb[123].mxu1 }
 0x2a7   : > { %11790 = vst [vmem:[#allocation27_spill] sm:$0xff] %v10102_v12 }
 0x2a9   : > { %v7819_v30 = vpop.f32.mrb[108].mxu0 }
 0x2aa   : > { %v2879_v29 = vadd.f32 %v7819_v30, %v2701_v59  ;;  %v2870_v33 = vpop.f32.mrb[109].mxu0 }
 0x2ab   : > { %v2871_v50 = vadd.f32 %v2870_v33, %v2693_v15  ;;  %v7820_v40 = vpop.f32.mrb[110].mxu0  ;;  %v10108_v23 = vpop.f32.mrb[124].mxu1 }
 0x2ac   : > { %v3015_v28 = vadd.f32 %v2879_v29, %v9968_v60  ;;  %v2882_v4 = vadd.f32 %v7820_v40, %v2704_v5  ;;  %v2873_v41 = vpop.f32.mrb[111].mxu0  ;;  %v2727_v46 = vpop.f32.mrb[125].mxu1 }
 0x2ad   : > { %v3013_v6 = vadd.f32 %v2871_v50, %v9971_v27  ;;  %v2874_v21 = vadd.f32 %v2873_v41, %v2696_v19  ;;  %v10112_v9 = vpop.f32.mrb[126].mxu1  ;;  %v10119_v5 = vpop.permute.xlu1 %3191 }
 0x2ae   : > { %v3058_v52 = vadd.f32 %v10106_v55, %v3015_v28  ;;  %v3016_v59 = vadd.f32 %v2882_v4, %v9978_v2  ;;  %v2730_v30 = vpop.f32.mrb[127].mxu1  ;;  %v3197_v50 = vpop.permute.xlu0 %3196 }
 0x2af   : > { %v3056_v15 = vadd.f32 %v10106_v55, %v3013_v6  ;;  %v3014_v33 = vadd.f32 %v2874_v21, %v9981_v47 }
 0x2b0   : > { %v3094_v32 = vmax.f32 %v3058_v52, 0.0  ;;  %v3059_v60 = vadd.f32 %v10106_v55, %v3016_v59 }
 0x2b1   : > { %v3092_v29 = vmax.f32 %v3056_v15, 0.0  ;;  %v3057_v27 = vadd.f32 %v10106_v55, %v3014_v33  ;;  %v7823_v19 = vpop.f32.mrb[112].mxu0 }
 0x2b2   : > { %v3346_v40 = vmul.f32 %v3177_v39, %v3094_v32  ;;  %v3095_v28 = vmax.f32 %v3059_v60, 0.0  ;;  %v2895_v2 = vadd.f32 %v7823_v19, %v2717_v62  ;;  %v2886_v4 = vpop.f32.mrb[113].mxu0 }
 0x2b3   : > { %v3344_v41 = vmul.f32 %v3167_v34, %v3092_v29  ;;  %v3093_v46 = vmax.f32 %v3057_v27, 0.0  ;;  %v2887_v47 = vadd.f32 %v2886_v4, %v2709_v36  ;;  %v7824_v52 = vpop.f32.mrb[114].mxu0  ;;  %v10122_v6 = vpop.f32.mrb[128].mxu1 }
 0x2b4   : > { %v7422_v21 = vpack.c.bf16 %v3346_v40, %v3346_v40  ;;  %v3347_v59 = vmul.f32 %v3182_v22, %v3095_v28  ;;  %v3019_v30 = vadd.f32 %v2895_v2, %v9988_v3  ;;  %v2898_v15 = vadd.f32 %v7824_v52, %v2720_v16  ;;  %v2889_v33 = vpop.f32.mrb[115].mxu0  ;;  %v2735_v12 = vpop.f32.mrb[129].mxu1 }
 0x2b5   : > { %v7420_v1 = vpack.c.bf16 %v3344_v41, %v3344_v41  ;;  %v3345_v39 = vmul.f32 %v3172_v61, %v3093_v46  ;;  %v3017_v32 = vadd.f32 %v2887_v47, %v9992_v38  ;;  %v2890_v62 = vadd.f32 %v2889_v33, %v10092_v54  ;;  %v10127_v34 = vpop.f32.mrb[130].mxu1  ;;  %v3202_v38 = vpop.permute.xlu1 %3201 }
 0x2b6   : > { %v3510_v60 = vshrl.u32 %v7422_v21, 16  ;;  %v3513_v36 = vshll.u32 %v7422_v21, 16  ;;  %v7423_v29 = vpack.c.bf16 %v3347_v59, %v3347_v59  ;;  %v3062_v27 = vadd.f32 %v10106_v55, %v3019_v30  ;;  %v2738_v19 = vpop.f32.mrb[131].mxu1  ;;  %v10131_v52 = vpop.permute.xlu0 %3206  ;;  %v3889_v59 = vld [vmem:[#allocation2 + $0x8] sm:$0xe] }
 0x2b7   : > { %v3491_v22 = vshrl.u32 %v7420_v1, 16  ;;  %v3494_v40 = vshll.u32 %v7420_v1, 16  ;;  %v7421_v3 = vpack.c.bf16 %v3345_v39, %v3345_v39  ;;  %v3060_v16 = vadd.f32 %v10106_v55, %v3017_v32 }
 0x2b8   : > { %v3512_v12 = vrot.slane %v3510_v60, 6  ;;  %v3515_v28 = vrot.slane %v3513_v36, 7  ;;  %v3520_v61 = vshrl.u32 %v7423_v29, 16  ;;  %v3523_v2 = vshll.u32 %v7423_v29, 16 }
 0x2b9   : > { %v3493_v4 = vrot.slane %v3491_v22, 6  ;;  %v3496_v54 = vrot.slane %v3494_v40, 7  ;;  %v3500_v41 = vshrl.u32 %v7421_v3, 16  ;;  %v3503_v46 = vshll.u32 %v7421_v3, 16  ;;  %v7827_v47 = vpop.f32.mrb[116].mxu0 }
 0x2ba   : > { %v3516_v21 = vor.u32 %v3515_v28, %v3512_v12  ;;  %v3522_v30 = vrot.slane %v3520_v61, 6  ;;  %v3525_v33 = vrot.slane %v3523_v2, 7  ;;  %v3098_v39 = vmax.f32 %v3062_v27, 0.0  ;;  %v2902_v32 = vpop.f32.mrb[117].mxu0 }
 0x2bb   : > { %v3497_v36 = vor.u32 %v3496_v54, %v3493_v4  ;;  %v3502_v29 = vrot.slane %v3500_v41, 6  ;;  %v3505_v19 = vrot.slane %v3503_v46, 7  ;;  %v3096_v22 = vmax.f32 %v3060_v16, 0.0  ;;  %v7828_v40 = vpop.f32.mrb[118].mxu0  ;;  %v10145_v3 = vpop.f32.mrb[132].mxu1 }
 0x2bc   : > { %v3518_v12 = vrot.slane %v3516_v21, 4  ;;  %v10147_v28 = vor.u32 %v3525_v33, %v3522_v30  ;;  %v3350_v61 = vmul.f32 %v3197_v50, %v3098_v39  ;;  %v3020_v27 = vadd.f32 %v2898_v15, %v9998_v17  ;;  %v2905_v2 = vpop.f32.mrb[119].mxu0  ;;  %v2743_v31 = vpop.f32.mrb[133].mxu1 }
 0x2bd   : > { %v3498_v25 = vrot.slane %v3497_v36, 4  ;;  %v3890_v0 = vsel %vm10135_vm9, %v3497_v36, %v3889_v59  ;;  %v3506_v53 = vor.u32 %v3505_v19, %v3502_v29  ;;  %v3348_v4 = vmul.f32 %v10104_v56, %v3096_v22  ;;  %v10153_v54 = vpop.f32.mrb[134].mxu1  ;;  %v10164_v39 = vpop.permute.xlu1 %3211 }
 0x2be   : > { %3891 = vst [vmem:[#allocation2 + $0x8] sm:$0xe] %v3890_v0  ;;  %v3527_v16 = vsel %vm10141_vm10, %v3518_v12, %v10147_v28  ;;  %v3528_v50 = vrot.slane %v10147_v28, 4  ;;  %v7426_v41 = vpack.c.bf16 %v3350_v61, %v3350_v61  ;;  %v3063_v17 = vadd.f32 %v10106_v55, %v3020_v27  ;;  %v2746_v31 = vpop.f32.mrb[135].mxu1 }
 0x2bf   : > { %3894 = vst [vmem:[#allocation2 + $0x14] sm:$0xf] %v3527_v16  ;;  %v3507_v15 = vsel %vm10141_vm10, %v3498_v25, %v3506_v53  ;;  %v3508_v46 = vrot.slane %v3506_v53, 4  ;;  %v7424_v1 = vpack.c.bf16 %v3348_v4, %v3348_v4  ;;  %v3018_v56 = vadd.f32 %v2890_v62, %v10001_v13  ;;  %v3217_v53 = vpop.permute.xlu0 %3216 }
 0x2c0   : > { %3892 = vst [vmem:[#allocation2 + $0xc] sm:$0xf] %v3507_v15  ;;  %v3550_v0 = vshrl.u32 %v7426_v41, 16  ;;  %v3553_v59 = vshll.u32 %v7426_v41, 16  ;;  %v3099_v30 = vmax.f32 %v3063_v17, 0.0  ;;  %v2911_v33 = vadd.f32 %v7827_v47, %v10122_v6 }
 0x2c1   : > { %v3517_v36 = vsel %vm10141_vm10, %v3508_v46, %v3516_v21  ;;  %v3530_v29 = vshrl.u32 %v7424_v1, 16  ;;  %v3533_v19 = vshll.u32 %v7424_v1, 16  ;;  %v3061_v22 = vadd.f32 %v10106_v55, %v3018_v56  ;;  %v7831_v25 = vpop.f32.mrb[120].mxu0 }
 0x2c2   : > { %3893 = vst [vmem:[#allocation2 + $0x10] sm:$0xf] %v3517_v36  ;;  %v3552_v12 = vrot.slane %v3550_v0, 6  ;;  %v3555_v13 = vrot.slane %v3553_v59, 7  ;;  %v3351_v62 = vmul.f32 %v3202_v38, %v3099_v30  ;;  %v3023_v28 = vadd.f32 %v2911_v33, %v10007_v44  ;;  %v10170_v61 = vpop.f32.mrb[121].mxu0 }
 0x2c3   : > { %v3532_v6 = vrot.slane %v3530_v29, 6  ;;  %v3535_v47 = vrot.slane %v3533_v19, 7  ;;  %v3097_v27 = vmax.f32 %v3061_v22, 0.0  ;;  %v2903_v4 = vadd.f32 %v2902_v32, %v10108_v23  ;;  %v2749_v21 = vpop.f32.mrb[136].mxu1  ;;  %v10173_v16 = vpop.f32.mrb[122].mxu0 }
 0x2c4   : > { %v10175_v41 = vor.u32 %v3555_v13, %v3552_v12  ;;  %v7427_v17 = vpack.c.bf16 %v3351_v62, %v3351_v62  ;;  %v3066_v31 = vadd.f32 %v10106_v55, %v3023_v28  ;;  %v2914_v15 = vadd.f32 %v7828_v40, %v10127_v34  ;;  %v2751_v38 = vpop.f32.mrb[137].mxu1  ;;  %v10179_v46 = vpop.f32.mrb[123].mxu0 }
 0x2c5   : > { %v3536_v44 = vor.u32 %v3535_v47, %v3532_v6  ;;  %v3349_v1 = vmul.f32 %v10119_v5, %v3097_v27  ;;  %v3021_v56 = vadd.f32 %v2903_v4, %v10010_v20  ;;  %v2906_v23 = vadd.f32 %v2905_v2, %v10112_v9  ;;  %v10184_v32 = vpop.f32.mrb[138].mxu1  ;;  %v3222_v2 = vpop.permute.xlu1 %3221 }
 0x2c6   : > { %v3558_v0 = vrot.slane %v10175_v41, 4  ;;  %v3560_v59 = vshrl.u32 %v7427_v17, 16  ;;  %v3563_v30 = vshll.u32 %v7427_v17, 16  ;;  %v3102_v33 = vmax.f32 %v3066_v31, 0.0  ;;  %v2754_v36 = vpop.f32.mrb[139].mxu1  ;;  %v10194_v47 = vpop.permute.xlu0 %3226 }
 0x2c7   : > { %v3537_v34 = vsel %vm10141_vm10, %v3528_v50, %v3536_v44  ;;  %v3538_v40 = vrot.slane %v3536_v44, 4  ;;  %v7425_v29 = vpack.c.bf16 %v3349_v1, %v3349_v1  ;;  %v3064_v19 = vadd.f32 %v10106_v55, %v3021_v56 }
 0x2c8   : > { %3895 = vst [vmem:[#allocation2 + $0x18] sm:$0xf] %v3537_v34  ;;  %v3562_v5 = vrot.slane %v3560_v59, 6  ;;  %v3565_v20 = vrot.slane %v3563_v30, 7  ;;  %v3354_v22 = vmul.f32 %v3217_v53, %v3102_v33  ;;  %v3024_v9 = vadd.f32 %v2914_v15, %v10016_v58 }
 0x2c9   : > { %v3540_v12 = vshrl.u32 %v7425_v29, 16  ;;  %v3543_v13 = vshll.u32 %v7425_v29, 16  ;;  %v3100_v62 = vmax.f32 %v3064_v19, 0.0  ;;  %v3022_v28 = vadd.f32 %v2906_v23, %v10019_v48  ;;  %v10192_v6 = vpop.f32.mrb[124].mxu0 }
 0x2ca   : > { %v10196_v50 = vor.u32 %v3565_v20, %v3562_v5  ;;  %v7430_v27 = vpack.c.bf16 %v3354_v22, %v3354_v22  ;;  %v3067_v4 = vadd.f32 %v10106_v55, %v3024_v9  ;;  %v2927_v17 = vadd.f32 %v7831_v25, %v2749_v21  ;;  %v10199_v31 = vpop.f32.mrb[125].mxu0 }
 0x2cb   : > { %v3542_v53 = vrot.slane %v3540_v12, 6  ;;  %v3545_v58 = vrot.slane %v3543_v13, 7  ;;  %v3352_v15 = vmul.f32 %v10131_v52, %v3100_v62  ;;  %v3065_v38 = vadd.f32 %v10106_v55, %v3022_v28  ;;  %v10203_v44 = vpop.f32.mrb[140].mxu1  ;;  %v10205_v48 = vpop.f32.mrb[126].mxu0 }
 0x2cc   : > { %v3567_v1 = vsel %vm10141_vm10, %v3558_v0, %v10196_v50  ;;  %v3568_v56 = vrot.slane %v10196_v50, 4  ;;  %v3590_v23 = vshrl.u32 %v7430_v27, 16  ;;  %v3593_v25 = vshll.u32 %v7430_v27, 16  ;;  %v2759_v21 = vpop.f32.mrb[141].mxu1  ;;  %v10211_v59 = vpop.f32.mrb[127].mxu0 }
 0x2cd   : > { %3898 = vst [vmem:[#allocation2 + $0x24] sm:$0xf] %v3567_v1  ;;  %v3546_v30 = vor.u32 %v3545_v58, %v3542_v53  ;;  %v7428_v52 = vpack.c.bf16 %v3352_v15, %v3352_v15  ;;  %v3103_v33 = vmax.f32 %v3067_v4, 0.0  ;;  %v3101_v36 = vmax.f32 %v3065_v38, 0.0  ;;  %v2760_v34 = vpop.f32.mrb[142].mxu1  ;;  %v10222_v4 = vpop.permute.xlu1 %3231 }
 0x2ce   : > { %v3592_v29 = vrot.slane %v3590_v23, 6  ;;  %v3595_v19 = vrot.slane %v3593_v25, 7  ;;  %v3027_v5 = vadd.f32 %v2927_v17, %v10025_v8  ;;  %v2919_v0 = vadd.f32 %v10170_v61, %v10145_v3  ;;  %v2762_v20 = vpop.f32.mrb[143].mxu1  ;;  %v3237_v53 = vpop.permute.xlu0 %3236 }
 0x2cf   : > { %v3547_v22 = vsel %vm10141_vm10, %v3538_v40, %v3546_v30  ;;  %v3548_v9 = vrot.slane %v3546_v30, 4  ;;  %v3570_v12 = vshrl.u32 %v7428_v52, 16  ;;  %v3573_v13 = vshll.u32 %v7428_v52, 16 }
 0x2d0   : > { %3896 = vst [vmem:[#allocation2 + $0x1c] sm:$0xf] %v3547_v22  ;;  %v10218_v62 = vor.u32 %v3595_v19, %v3592_v29  ;;  %v3355_v28 = vmul.f32 %v3222_v2, %v3103_v33  ;;  %v3353_v50 = vmul.f32 %v10164_v39, %v3101_v36  ;;  %v3070_v27 = vadd.f32 %v10106_v55, %v3027_v5 }
 0x2d1   : > { %v3557_v8 = vsel %vm10141_vm10, %v3548_v9, %v10175_v41  ;;  %v3572_v3 = vrot.slane %v3570_v12, 6  ;;  %v3575_v61 = vrot.slane %v3573_v13, 7  ;;  %v3025_v40 = vadd.f32 %v2919_v0, %v10028_v49  ;;  %v10228_v17 = vpop.f32.mrb[128].mxu0 }
 0x2d2   : > { %3897 = vst [vmem:[#allocation2 + $0x20] sm:$0xf] %v3557_v8  ;;  %v3598_v2 = vrot.slane %v10218_v62, 4  ;;  %v7431_v58 = vpack.c.bf16 %v3355_v28, %v3355_v28  ;;  %v7429_v39 = vpack.c.bf16 %v3353_v50, %v3353_v50  ;;  %v3106_v15 = vmax.f32 %v3070_v27, 0.0  ;;  %v10231_v38 = vpop.f32.mrb[129].mxu0 }
 0x2d3   : > { %v3576_v1 = vor.u32 %v3575_v61, %v3572_v3  ;;  %v3068_v23 = vadd.f32 %v10106_v55, %v3025_v40  ;;  %v2930_v41 = vadd.f32 %v10173_v16, %v10184_v32  ;;  %v2922_v49 = vadd.f32 %v10179_v46, %v10153_v54  ;;  %v2765_v25 = vpop.f32.mrb[144].mxu1  ;;  %v10238_v21 = vpop.f32.mrb[130].mxu0 }
 0x2d4   : > { %v3600_v30 = vshrl.u32 %v7431_v58, 16  ;;  %v3603_v52 = vshll.u32 %v7431_v58, 16  ;;  %v3580_v33 = vshrl.u32 %v7429_v39, 16  ;;  %v3583_v36 = vshll.u32 %v7429_v39, 16  ;;  %v2767_v29 = vpop.f32.mrb[145].mxu1  ;;  %v10240_v19 = vpop.f32.mrb[131].mxu0 }
 0x2d5   : > { %v3577_v5 = vsel %vm10141_vm10, %v3568_v56, %v3576_v1  ;;  %v3578_v0 = vrot.slane %v3576_v1, 4  ;;  %v3358_v20 = vmul.f32 %v3237_v53, %v3106_v15  ;;  %v3104_v22 = vmax.f32 %v3068_v23, 0.0  ;;  %v2768_v16 = vpop.f32.mrb[146].mxu1  ;;  %v3242_v1 = vpop.permute.xlu1 %3241 }
 0x2d6   : > { %3899 = vst [vmem:[#allocation2 + $0x28] sm:$0xf] %v3577_v5  ;;  %v3602_v32 = vrot.slane %v3600_v30, 6  ;;  %v3605_v54 = vrot.slane %v3603_v52, 7  ;;  %v3582_v46 = vrot.slane %v3580_v33, 6  ;;  %v3585_v9 = vrot.slane %v3583_v36, 7 }
 0x2d7   : > { %v2770_v12 = vpop.f32.mrb[147].mxu1  ;;  %v7434_v13 = vpack.c.bf16 %v3358_v20, %v3358_v20  ;;  %v3356_v28 = vmul.f32 %v10194_v47, %v3104_v22  ;;  %v3028_v50 = vadd.f32 %v2930_v41, %v10034_v35  ;;  %v3026_v27 = vadd.f32 %v2922_v49, %v10037_v10 }
 0x2d8   : > { %v3606_v8 = vor.u32 %v3605_v54, %v3602_v32  ;;  %v3586_v3 = vor.u32 %v3585_v9, %v3582_v46  ;;  %v2935_v56 = vadd.f32 %v10199_v31, %v10203_v44  ;;  %v2938_v61 = vadd.f32 %v10211_v59, %v2760_v34 }
 0x2d9   : > { %v3630_v40 = vshrl.u32 %v7434_v13, 16  ;;  %v3633_v53 = vshll.u32 %v7434_v13, 16  ;;  %v7432_v58 = vpack.c.bf16 %v3356_v28, %v3356_v28  ;;  %v3071_v39 = vadd.f32 %v10106_v55, %v3028_v50  ;;  %v10251_v15 = vpop.f32.mrb[132].mxu0 }
 0x2da   : > { %v3607_v35 = vsel %vm10141_vm10, %v3598_v2, %v3606_v8  ;;  %v3608_v47 = vrot.slane %v3606_v8, 4  ;;  %v3587_v10 = vsel %vm10141_vm10, %v3578_v0, %v3586_v3  ;;  %v3588_v23 = vrot.slane %v3586_v3, 4  ;;  %v10257_v41 = vpop.f32.mrb[133].mxu0  ;;  %v10280_v8 = vld [vmem:[#allocation2 + $0x10] sm:$0xff]  }
 0x2db   : > { %3902 = vst [vmem:[#allocation2 + $0x34] sm:$0xf] %v3607_v35  ;;  %3900 = vst [vmem:[#allocation2 + $0x2c] sm:$0xf] %v3587_v10  ;;  %v3632_v31 = vrot.slane %v3630_v40, 6  ;;  %v3635_v44 = vrot.slane %v3633_v53, 7  ;;  %v3069_v33 = vadd.f32 %v10106_v55, %v3026_v27  ;;  %v3029_v36 = vadd.f32 %v2935_v56, %v10046_v37  ;;  %v3247_v40 = vpop.permute.xlu0 %3246 }
 0x2dc   : > { %v3610_v59 = vshrl.u32 %v7432_v58, 16  ;;  %v3613_v34 = vshll.u32 %v7432_v58, 16  ;;  %v10259_v49 = vpop.f32.mrb[148].mxu1  ;;  %v10261_v30 = vpop.f32.mrb[134].mxu0  ;;  %v3597_v2 = vsel %vm10141_vm10, %v3588_v23, %v10218_v62  ;;  %v3107_v52 = vmax.f32 %v3071_v39, 0.0 }
 0x2dd   : > { %v2775_v29 = vpop.f32.mrb[149].mxu1  ;;  %v10268_v5 = vpop.f32.mrb[135].mxu0  ;;  %3901 = vst [vmem:[#allocation2 + $0x30] sm:$0xf] %v3597_v2  ;;  %v10270_v0 = vor.u32 %v3635_v44, %v3632_v31  ;;  %v3030_v32 = vadd.f32 %v2938_v61, %v10053_v11  ;;  %v3105_v9 = vmax.f32 %v3069_v33, 0.0  ;;  %v3072_v62 = vadd.f32 %v10106_v55, %v3029_v36 }
 0x2de   : > { %v3612_v20 = vrot.slane %v3610_v59, 6  ;;  %v3615_v22 = vrot.slane %v3613_v34, 7  ;;  %v10273_v54 = vpop.f32.mrb[150].mxu1  ;;  %v3359_v46 = vmul.f32 %v3242_v1, %v3107_v52  ;;  %v2943_v12 = vadd.f32 %v10192_v6, %v2765_v25  ;;  %v3252_v1 = vpop.permute.xlu1 %3251 }
 0x2df   : > { %v2778_v13 = vpop.f32.mrb[151].mxu1  ;;  %v3638_v37 = vrot.slane %v10270_v0, 4  ;;  %v3073_v50 = vadd.f32 %v10106_v55, %v3030_v32  ;;  %v2946_v27 = vadd.f32 %v10205_v48, %v2768_v16  ;;  %v3357_v11 = vmul.f32 %v10222_v4, %v3105_v9  ;;  %v10289_v4 = vld [vmem:[#allocation2 + $0x18] sm:$0xff]  }
 0x2e0   : > { %v3616_v28 = vor.u32 %v3615_v22, %v3612_v20  ;;  %v7435_v3 = vpack.c.bf16 %v3359_v46, %v3359_v46  ;;  %v3108_v56 = vmax.f32 %v3072_v62, 0.0  ;;  %v3031_v61 = vadd.f32 %v2943_v12, %v10043_v26  ;;  %v4010_v13 = vld [vmem:[#allocation2 + $0xc] sm:$0xf] }
 0x2e1   : > { %v3109_v53 = vmax.f32 %v3073_v50, 0.0  ;;  %v3032_v58 = vadd.f32 %v2946_v27, %v10050_v57  ;;  %v10287_v39 = vpop.f32.mrb[136].mxu0  ;;  %v7433_v35 = vpack.c.bf16 %v3357_v11, %v3357_v11  ;;  %v10296_v44 = vrot.slane %v10280_v8, 1  ;;  %v3257_v27 = vpop.permute.xlu0 %3256 }
 0x2e2   : > { %v3617_v6 = vsel %vm10141_vm10, %v3608_v47, %v3616_v28  ;;  %v3618_v25 = vrot.slane %v3616_v28, 4  ;;  %v3640_v48 = vshrl.u32 %v7435_v3, 16  ;;  %v3643_v16 = vshll.u32 %v7435_v3, 16  ;;  %v10291_v23 = vpop.f32.mrb[137].mxu0 }
 0x2e3   : > { %3903 = vst [vmem:[#allocation2 + $0x38] sm:$0xf] %v3617_v6  ;;  %v3360_v10 = vmul.f32 %v3247_v40, %v3108_v56  ;;  %v3361_v26 = vmul.f32 %v3252_v1, %v3109_v53  ;;  %v3074_v31 = vadd.f32 %v10106_v55, %v3031_v61  ;;  %v3075_v47 = vadd.f32 %v10106_v55, %v3032_v58  ;;  %v10298_v57 = vpop.f32.mrb[152].mxu1  ;;  %v10300_v59 = vpop.f32.mrb[138].mxu0 }
 0x2e4   : > { %v3642_v34 = vrot.slane %v3640_v48, 6  ;;  %v3645_v2 = vrot.slane %v3643_v16, 7  ;;  %v3620_v52 = vshrl.u32 %v7433_v35, 16  ;;  %v3623_v33 = vshll.u32 %v7433_v35, 16  ;;  %v2783_v32 = vpop.f32.mrb[153].mxu1  ;;  %v10302_v46 = vpop.f32.mrb[139].mxu0 }
 0x2e5   : > { %v7436_v36 = vpack.c.bf16 %v3360_v10, %v3360_v10  ;;  %v7437_v29 = vpack.c.bf16 %v3361_v26, %v3361_v26  ;;  %v3110_v20 = vmax.f32 %v3074_v31, 0.0  ;;  %v3111_v22 = vmax.f32 %v3075_v47, 0.0  ;;  %v10305_v50 = vpop.f32.mrb[154].mxu1  ;;  %v3262_v48 = vpop.permute.xlu1 %3261 }
 0x2e6   : > { %v3646_v9 = vor.u32 %v3645_v2, %v3642_v34  ;;  %v3622_v62 = vrot.slane %v3620_v52, 6  ;;  %v3625_v12 = vrot.slane %v3623_v33, 7  ;;  %v4325_v28 = vrot.slane %v10289_v4, 1  ;;  %v2786_v40 = vpop.f32.mrb[155].mxu1  ;;  %v4421_v52 = vld [vmem:[#allocation2 + $0x8] sm:$0xe] }
 0x2e7   : > { %v3650_v3 = vshrl.u32 %v7436_v36, 16  ;;  %v3653_v11 = vshll.u32 %v7436_v36, 16  ;;  %v3660_v56 = vshrl.u32 %v7437_v29, 16  ;;  %v3663_v61 = vshll.u32 %v7437_v29, 16 }
 0x2e8   : > { %v3647_v6 = vsel %vm10141_vm10, %v3638_v37, %v3646_v9  ;;  %v3648_v53 = vrot.slane %v3646_v9, 4  ;;  %v3626_v58 = vor.u32 %v3625_v12, %v3622_v62  ;;  %v3362_v1 = vmul.f32 %v3257_v27, %v3110_v20  ;;  %v4425_v27 = vld [vmem:[#allocation2 + $0x8] sm:$0xc] }
 0x2e9   : > { %3906 = vst [vmem:[#allocation2 + $0x44] sm:$0xf] %v3647_v6  ;;  %v3652_v16 = vrot.slane %v3650_v3, 6  ;;  %v3655_v35 = vrot.slane %v3653_v11, 7  ;;  %v3662_v10 = vrot.slane %v3660_v56, 6  ;;  %v3665_v26 = vrot.slane %v3663_v61, 7 }
 0x2ea   : > { %v3627_v31 = vsel %vm10141_vm10, %v3618_v25, %v3626_v58  ;;  %v3628_v47 = vrot.slane %v3626_v58, 4  ;;  %v7438_v34 = vpack.c.bf16 %v3362_v1, %v3362_v1  ;;  %v3363_v2 = vmul.f32 %v3262_v48, %v3111_v22  ;;  %v10311_v33 = vpop.f32.mrb[140].mxu0 }
 0x2eb   : > { %3904 = vst [vmem:[#allocation2 + $0x3c] sm:$0xf] %v3627_v31  ;;  %v3656_v37 = vor.u32 %v3655_v35, %v3652_v16  ;;  %v3666_v36 = vor.u32 %v3665_v26, %v3662_v10  ;;  %v10317_v29 = vsel %vm670_vm0, %v10296_v44, %v4325_v28  ;;  %v10319_v20 = vcombine.low %v4421_v52, %v4010_v13  ;;  %v10321_v32 = vpop.f32.mrb[156].mxu1  ;;  %v10323_v25 = vpop.f32.mrb[141].mxu0 }
 0x2ec   : > { %v3637_v22 = vsel %vm10141_vm10, %v3628_v47, %v10270_v0  ;;  %v3670_v9 = vshrl.u32 %v7438_v34, 16  ;;  %v3673_v62 = vshll.u32 %v7438_v34, 16  ;;  %v7439_v12 = vpack.c.bf16 %v3363_v2, %v3363_v2  ;;  %v2791_v3 = vpop.f32.mrb[157].mxu1  ;;  %v10328_v11 = vpop.f32.mrb[142].mxu0 }
 0x2ed   : > { %3905 = vst [vmem:[#allocation2 + $0x40] sm:$0xf] %v3637_v22  ;;  %v3657_v56 = vsel %vm10141_vm10, %v3648_v53, %v3656_v37  ;;  %v3658_v61 = vrot.slane %v3656_v37, 4  ;;  %v3668_v40 = vrot.slane %v3666_v36, 4  ;;  %v7322_v6 = vcombine.low %v4425_v27, %v4010_v13  ;;  %v10332_v58 = vpop.f32.mrb[158].mxu1  ;;  %v10334_v1 = vpop.f32.mrb[143].mxu0 }
 0x2ee   : > { %3907 = vst [vmem:[#allocation2 + $0x48] sm:$0xf] %v3657_v56  ;;  %v3672_v0 = vrot.slane %v3670_v9, 6  ;;  %v3675_v48 = vrot.slane %v3673_v62, 7  ;;  %v3680_v16 = vshrl.u32 %v7439_v12, 16  ;;  %v3683_v35 = vshll.u32 %v7439_v12, 16 }
 0x2ef   : > { %v2794_v10 = vpop.f32.mrb[159].mxu1  ;;  %v3667_v26 = vsel %vm10141_vm10, %v3658_v61, %v3666_v36  ;;  %v4461_v31 = vrot.slane %v7322_v6, 1  ;;  %v4522_v47 = vrot.slane %v10317_v29, 1  ;;  %v2951_v53 = vadd.f32 %v10231_v38, %v10259_v49  ;;  %v10347_v62 = vld [vmem:[#allocation2 + $0x20] sm:$0xff]  }
 0x2f0   : > { %3908 = vst [vmem:[#allocation2 + $0x4c] sm:$0xf] %v3667_v26  ;;  %v3676_v13 = vor.u32 %v3675_v48, %v3672_v0  ;;  %v3682_v34 = vrot.slane %v3680_v16, 6  ;;  %v3685_v2 = vrot.slane %v3683_v35, 7  ;;  %v4172_v52 = vshll.u32 %v10280_v8, 16  ;;  %v10365_v16 = vld [vmem:[#allocation2 + $0x28] sm:$0xff]  }
 0x2f1   : > { %v4462_v37 = vsel %vm670_vm0, %v4461_v31, %v10296_v44  ;;  %v3033_v22 = vadd.f32 %v2951_v53, %v10060_v7  ;;  %v4176_v9 = vshrl.u32 %v10280_v8, 16  ;;  %v4180_v36 = vshll.u32 %v10289_v4, 16 }
 0x2f2   : > { %v3677_v38 = vsel %vm10141_vm10, %v3668_v40, %v3676_v13  ;;  %v3678_v49 = vrot.slane %v3676_v13, 4  ;;  %v10351_v12 = vor.u32 %v3685_v2, %v3682_v34  ;;  %v4521_v27 = vrot.slane %v4462_v37, 1  ;;  %v3267_v34 = vpop.permute.xlu0 %3266 }
 0x2f3   : > { %3909 = vst [vmem:[#allocation2 + $0x50] sm:$0xf] %v3677_v38  ;;  %v3076_v3 = vadd.f32 %v10106_v55, %v3033_v22  ;;  %v10354_v56 = vrot.slane %v4172_v52, 1  ;;  %v4182_v61 = vrot.slane %v4180_v36, 1  ;;  %v4438_v7 = vshrl.u32 %v10319_v20, 16  ;;  %v10357_v8 = vpop.f32.mrb[160].mxu1 }
 0x2f4   : > { %v3687_v6 = vsel %vm10141_vm10, %v3678_v49, %v10351_v12  ;;  %v3688_v40 = vrot.slane %v10351_v12, 4  ;;  %v4523_v0 = vsel %vm670_vm0, %v4521_v27, %v4522_v47  ;;  %v4440_v48 = vshll.u32 %v10319_v20, 16  ;;  %v2799_v35 = vpop.f32.mrb[161].mxu1  ;;  %v8277_v27 = vld [vmem:[#allocation9] sm:$0xff]   ;;  %v8280_v12 = vld [vmem:[#allocation9 + $0x10] sm:$0xff]  }
 0x2f5   : > { %3910 = vst [vmem:[#allocation2 + $0x54] sm:$0xf] %v3687_v6  ;;  %7869 = vmatprep.mubr.bf16.mxu1 %v4523_v0  ;;  %v3112_v10 = vmax.f32 %v3076_v3, 0.0  ;;  %v4178_v26 = vor.u32 %v4176_v9, %v10354_v56  ;;  %v4327_v31 = vrot.slane %v10347_v62, 1  ;;  %v4516_v53 = vrot.slane %v10319_v20, 1  ;;  %v10370_v13 = vpop.f32.mrb[162].mxu1 }
 0x2f6   : > { %v4442_v2 = vrot.slane %v4440_v48, 1  ;;  %v2954_v52 = vadd.f32 %v10240_v19, %v10273_v54  ;;  %v4184_v37 = vshrl.u32 %v10289_v4, 16  ;;  %v4188_v22 = vshll.u32 %v10347_v62, 16  ;;  %v2802_v36 = vpop.f32.mrb[163].mxu1 }
 0x2f7   : > { %v3364_v38 = vmul.f32 %v3267_v34, %v3112_v10  ;;  %v10377_v49 = vsel %vm505_vm1, %v4178_v26, %v4182_v61  ;;  %v10382_v20 = vsel %vm670_vm0, %v4325_v28, %v4327_v31  ;;  %v4517_v9 = vsel %vm670_vm0, %v4516_v53, %v10296_v44  ;;  %v10396_v53 = vld [vmem:[#allocation2 + $0x30] sm:$0xff]  }
 0x2f8   : > { %v4443_v3 = vor.u32 %v4442_v2, %v4438_v7  ;;  %v4519_v19 = vrot.slane %v10377_v49, 1  ;;  %v4526_v54 = vrot.slane %v10382_v20, 1  ;;  %v3034_v6 = vadd.f32 %v2954_v52, %v10066_v42 }
 0x2f9   : > { %v7440_v0 = vpack.c.bf16 %v3364_v38, %v3364_v38  ;;  %v4186_v48 = vor.u32 %v4184_v37, %v4182_v61  ;;  %v4190_v35 = vrot.slane %v4188_v22, 1  ;;  %v4329_v10 = vrot.slane %v10365_v16, 1  ;;  %v3272_v38 = vpop.permute.xlu1 %3271 }
 0x2fa   : > { %v4444_v4 = vsel %vm505_vm1, %v4443_v3, %v10354_v56  ;;  %v4527_v28 = vsel %vm670_vm0, %v4522_v47, %v4526_v54  ;;  %v3077_v26 = vadd.f32 %v10106_v55, %v3034_v6  ;;  %v2959_v7 = vadd.f32 %v10228_v17, %v10298_v57  ;;  %v8271_v17 = vld [vmem:[#allocation9 + $0x88] sm:$0xff]  }
 0x2fb   : > { %v3690_v34 = vshrl.u32 %v7440_v0, 16  ;;  %v3693_v2 = vshll.u32 %v7440_v0, 16  ;;  %v4518_v42 = vrot.slane %v4444_v4, 1  ;;  %7870 = vmatmul.mubr.bf16.vlgmr.msra.gmra.mrb[180].mxu1 %v4527_v28  ;;  %v10399_v61 = vsel %vm505_vm1, %v4186_v48, %v4190_v35  ;;  %v10401_v52 = vpop.f32.mrb[164].mxu1 }
 0x2fc   : > { %v3113_v37 = vmax.f32 %v3077_v26, 0.0  ;;  %v4524_v22 = vrot.slane %v10399_v61, 1  ;;  %v10405_v47 = vsel %vm670_vm0, %v4327_v31, %v4329_v10  ;;  %v3035_v36 = vadd.f32 %v2959_v7, %v10057_v24  ;;  %v2807_v57 = vpop.f32.mrb[165].mxu1  ;;  %5270 = vmatpush1.bf16.msra.mxu1 %v8277_v27  ;;  %v8278_v7 = vld [vmem:[#allocation9 + $0x8] sm:$0xff]  }
 0x2fd   : > { %v3692_v3 = vrot.slane %v3690_v34, 6  ;;  %v3695_v6 = vrot.slane %v3693_v2, 7  ;;  %v4520_v0 = vsel %vm670_vm0, %v4518_v42, %v4519_v19  ;;  %v4530_v48 = vrot.slane %v10405_v47, 1  ;;  %v10410_v4 = vpop.f32.mrb[166].mxu1  ;;  %5271 = vmatprep.subr.bf16.mxu1 %v11762_v18  ;;  %v10424_v57 = vld [vmem:[#allocation2 + $0x38] sm:$0xff]  }
 0x2fe   : > { %4803 = vmatprep.mubr.bf16.mxu0 %v4520_v0  ;;  %v3365_v28 = vmul.f32 %v3272_v38, %v3113_v37  ;;  %v4525_v24 = vsel %vm670_vm0, %v4519_v19, %v4524_v22  ;;  %v3078_v31 = vadd.f32 %v10106_v55, %v3035_v36  ;;  %v4331_v27 = vrot.slane %v10396_v53, 1  ;;  %v2810_v26 = vpop.f32.mrb[167].mxu1  ;;  %v8370_v19 = vld [vmem:[#allocation9 + $0x80] sm:$0xff]  }
 0x2ff   : > { %v10418_v34 = vor.u32 %v3695_v6, %v3692_v3  ;;  %4804 = vmatmul.mubr.bf16.vlgmr.msra.gmra.mrb[144].mxu0 %v4517_v9  ;;  %v4531_v2 = vsel %vm670_vm0, %v4526_v54, %v4530_v48  ;;  %v2962_v42 = vadd.f32 %v10238_v21, %v10305_v50  ;;  %v4192_v37 = vshrl.u32 %v10347_v62, 16  ;;  %v3277_v9 = vpop.permute.xlu0 %3276  ;;  %v10438_v6 = vld [vmem:[#allocation2 + $0x40] sm:$0xff]   ;;  %v10441_v26 = vld [vmem:[#allocation11] ss:$0 sm:$0xff] }
 0x300   : > { %v7441_v38 = vpack.c.bf16 %v3365_v28, %v3365_v28  ;;  %4811 = vmatprep.mubr.bf16.mxu0 %v4525_v24  ;;  %7906 = vmatpush3.bf16.msra.mxu0 %v8370_v19  ;;  %v3114_v55 = vmax.f32 %v3078_v31, 0.0  ;;  %v10427_v36 = vsel %vm670_vm0, %v4329_v10, %v4331_v27  ;;  %v4196_v3 = vshll.u32 %v10365_v16, 16  ;;  %v8274_v10 = vld [vmem:[#allocation9 + $0x90] sm:$0xff]  }
 0x301   : > { %v3697_v21 = vsel %vm10141_vm10, %v3688_v40, %v10418_v34  ;;  %v3698_v50 = vrot.slane %v10418_v34, 4  ;;  %7873 = vmatprep.mubr.bf16.mxu1 %v4531_v2  ;;  %v4534_v62 = vrot.slane %v10427_v36, 1  ;;  %v3036_v54 = vadd.f32 %v2962_v42, %v10063_v14  ;;  %7907 = vmatprep.subr.bf16.mxu0 %v8271_v17 }
 0x302   : > { %3911 = vst [vmem:[#allocation2 + $0x58] sm:$0xf] %v3697_v21  ;;  %v3700_v0 = vshrl.u32 %v7441_v38, 16  ;;  %v3703_v28 = vshll.u32 %v7441_v38, 16  ;;  %v3366_v24 = vmul.f32 %v3277_v9, %v3114_v55  ;;  %v4194_v31 = vor.u32 %v4192_v37, %v4190_v35  ;;  %5272 = vmatpush1.bf16.msra.mxu1 %v8278_v7 }
 0x303   : > { %v4535_v40 = vsel %vm670_vm0, %v4530_v48, %v4534_v62  ;;  %v3079_v34 = vadd.f32 %v10441_v26, %v3036_v54  ;;  %v10444_v2 = vrot.slane %v4196_v3, 1  ;;  %v4333_v14 = vrot.slane %v10424_v57, 1  ;;  %v10447_v42 = vpop.f32.mrb[168].mxu1  ;;  %5273 = vmatprep.subr.bf16.mxu1 %v11762_v18  ;;  %v8281_v54 = vld [vmem:[#allocation9 + $0x98] sm:$0xff]  }
 0x304   : > { %v3702_v19 = vrot.slane %v3700_v0, 6  ;;  %v3705_v38 = vrot.slane %v3703_v28, 7  ;;  %v7442_v55 = vpack.c.bf16 %v3366_v24, %v3366_v24  ;;  %7874 = vmatmul.mubr.bf16.gmra.mrb[184].mxu1 %v4535_v40  ;;  %v2967_v35 = vadd.f32 %v10257_v41, %v10321_v32  ;;  %7908 = vmatpush3.bf16.msra.mxu0 %v8271_v17  ;;  %v2815_v48 = vpop.f32.mrb[169].mxu1  ;;  %v3282_v0 = vpop.permute.xlu1 %3281 }
 0x305   : > { %v3115_v7 = vmax.f32 %v3079_v34, 0.0  ;;  %v10454_v37 = vsel %vm505_vm1, %v4194_v31, %v10444_v2  ;;  %v10457_v3 = vsel %vm670_vm0, %v4331_v27, %v4333_v14  ;;  %v4335_v9 = vrot.slane %v10438_v6, 1  ;;  %7909 = vmatprep.subr.bf16.mxu0 %v8274_v10  ;;  %v10460_v21 = vpop.f32.mrb[170].mxu1 }
 0x306   : > { %v3706_v28 = vor.u32 %v3705_v38, %v3702_v19  ;;  %v3710_v24 = vshrl.u32 %v7442_v55, 16  ;;  %v3713_v41 = vshll.u32 %v7442_v55, 16  ;;  %v11734_v32 = vrot.slane %v10454_v37, 1  ;;  %v2818_v17 = vpop.f32.mrb[171].mxu1  ;;  %5274 = vmatpush1.bf16.msra.mxu1 %v8280_v12  ;;  %v8282_v19 = vld [vmem:[#allocation9 + $0x18] sm:$0xff]  }
 0x307   : > { %4812 = vmatmul.mubr.bf16.gmra.mrb[148].mxu0 %v10317_v29  ;;  %v3367_v31 = vmul.f32 %v3282_v0, %v3115_v7  ;;  %v4538_v27 = vrot.slane %v10457_v3, 1  ;;  %v3037_v40 = vadd.f32 %v2967_v35, %v10072_v63  ;;  %v10469_v34 = vsel %vm670_vm0, %v4333_v14, %v4335_v9  ;;  %5275 = vmatprep.subr.bf16.mxu1 %v11762_v18  ;;  %v8288_v0 = vld [vmem:[#allocation9 + $0xa0] sm:$0xff]  }
 0x308   : > { %v3707_v38 = vsel %vm10141_vm10, %v3698_v50, %v3706_v28  ;;  %v3708_v55 = vrot.slane %v3706_v28, 4  ;;  %v3712_v12 = vrot.slane %v3710_v24, 6  ;;  %v3715_v48 = vrot.slane %v3713_v41, 7  ;;  %7910 = vmatpush3.bf16.msra.mxu0 %v8274_v10  ;;  %v10485_v24 = vld [vmem:[#allocation2 + $0x48] sm:$0xff]  }
 0x309   : > { %3912 = vst [vmem:[#allocation2 + $0x5c] sm:$0xf] %v3707_v38  ;;  %v7443_v7 = vpack.c.bf16 %v3367_v31, %v3367_v31  ;;  %v4529_v63 = vsel %vm670_vm0, %v4524_v22, %v11734_v32  ;;  %v4539_v14 = vsel %vm670_vm0, %v4534_v62, %v4538_v27  ;;  %v3080_v35 = vadd.f32 %v10441_v26, %v3037_v40  ;;  %v8284_v38 = vld [vmem:[#allocation9 + $0x20] sm:$0xff]  }
 0x30a   : > { %7911 = vmatprep.subr.bf16.mxu0 %v8281_v54  ;;  %v3716_v17 = vor.u32 %v3715_v48, %v3712_v12  ;;  %4819 = vmatprep.mubr.bf16.mxu0 %v4529_v63  ;;  %v4542_v50 = vrot.slane %v10469_v34, 1  ;;  %v2970_v10 = vadd.f32 %v10268_v5, %v10332_v58  ;;  %v4200_v28 = vshrl.u32 %v10365_v16, 16  ;;  %v3287_v12 = vpop.permute.xlu0 %3286 }
 0x30b   : > { %7877 = vmatprep.mubr.bf16.mxu1 %v4539_v14  ;;  %v3720_v41 = vshrl.u32 %v7443_v7, 16  ;;  %v3723_v22 = vshll.u32 %v7443_v7, 16  ;;  %v3116_v31 = vmax.f32 %v3080_v35, 0.0  ;;  %v4204_v62 = vshll.u32 %v10396_v53, 16  ;;  %v10488_v40 = vpop.f32.mrb[172].mxu1  ;;  %5276 = vmatpush1.bf16.msra.mxu1 %v8282_v19 }
 0x30c   : > { %v3717_v48 = vsel %vm10141_vm10, %v3708_v55, %v3716_v17  ;;  %v3718_v63 = vrot.slane %v3716_v17, 4  ;;  %v4543_v5 = vsel %vm670_vm0, %v4538_v27, %v4542_v50  ;;  %v3038_v58 = vadd.f32 %v2970_v10, %v10078_v51  ;;  %v2823_v16 = vpop.f32.mrb[173].mxu1  ;;  %7912 = vmatpush3.bf16.msra.mxu0 %v8281_v54  ;;  %5277 = vmatprep.subr.bf16.mxu1 %v11762_v18  ;;  %v8297_v55 = vld [vmem:[#allocation9 + $0xa8] sm:$0xff]  }
 0x30d   : > { %3913 = vst [vmem:[#allocation2 + $0x60] sm:$0xf] %v3717_v48  ;;  %v3722_v7 = vrot.slane %v3720_v41, 6  ;;  %v3725_v14 = vrot.slane %v3723_v22, 7  ;;  %v3368_v19 = vmul.f32 %v3287_v12, %v3116_v31  ;;  %7878 = vmatmul.mubr.bf16.gmra.mrb[188].mxu1 %v4543_v5  ;;  %v4202_v35 = vor.u32 %v4200_v28, %v10444_v2  ;;  %v10498_v32 = vpop.f32.mrb[174].mxu1  ;;  %7913 = vmatprep.subr.bf16.mxu0 %v8288_v0  ;;  %v8285_v22 = vld [vmem:[#allocation9 + $0x28] sm:$0xff]  }
 0x30e   : > { %v3081_v17 = vadd.f32 %v10441_v26, %v3038_v58  ;;  %v4206_v27 = vrot.slane %v4204_v62, 1  ;;  %v4337_v51 = vrot.slane %v10485_v24, 1  ;;  %v2975_v54 = vadd.f32 %v10251_v15, %v10357_v8  ;;  %v2826_v10 = vpop.f32.mrb[175].mxu1  ;;  %v10522_v5 = vld [vmem:[#allocation2 + $0x50] sm:$0xff]  }
 0x30f   : > { %v3726_v48 = vor.u32 %v3725_v14, %v3722_v7  ;;  %v7444_v41 = vpack.c.bf16 %v3368_v19, %v3368_v19  ;;  %4820 = vmatmul.mubr.bf16.gmra.mrb[152].mxu0 %v10382_v20  ;;  %v2978_v2 = vadd.f32 %v10261_v30, %v10370_v13  ;;  %v4208_v28 = vshrl.u32 %v10396_v53, 16  ;;  %5278 = vmatpush1.bf16.msra.mxu1 %v8284_v38  ;;  %v3292_v30 = vpop.permute.xlu1 %3291  ;;  %v8306_v7 = vld [vmem:[#allocation9 + $0xb0] sm:$0xff]  }
 0x310   : > { %v3117_v31 = vmax.f32 %v3081_v17, 0.0  ;;  %v10509_v62 = vsel %vm505_vm1, %v4202_v35, %v4206_v27  ;;  %v10516_v15 = vsel %vm670_vm0, %v4335_v9, %v4337_v51  ;;  %v3039_v8 = vadd.f32 %v2975_v54, %v10069_v43  ;;  %5279 = vmatprep.subr.bf16.mxu1 %v11762_v18  ;;  %7914 = vmatpush3.bf16.msra.mxu0 %v8288_v0  ;;  %v8287_v17 = vld [vmem:[#allocation9 + $0x30] sm:$0xff]  }
 0x311   : > { %v3727_v13 = vsel %vm10141_vm10, %v3718_v63, %v3726_v48  ;;  %v3728_v53 = vrot.slane %v3726_v48, 4  ;;  %v3730_v38 = vshrl.u32 %v7444_v41, 16  ;;  %v3733_v12 = vshll.u32 %v7444_v41, 16  ;;  %7915 = vmatprep.subr.bf16.mxu0 %v8297_v55 }
 0x312   : > { %3914 = vst [vmem:[#allocation2 + $0x64] sm:$0xf] %v3727_v13  ;;  %v3369_v58 = vmul.f32 %v3292_v30, %v3117_v31  ;;  %v4532_v9 = vrot.slane %v10509_v62, 1  ;;  %v4546_v16 = vrot.slane %v10516_v15, 1  ;;  %v3082_v43 = vadd.f32 %v10441_v26, %v3039_v8  ;;  %v8307_v13 = vld [vmem:[#allocation9 + $0xb8] sm:$0xff]  }
 0x313   : > { %v3732_v0 = vrot.slane %v3730_v38, 6  ;;  %v3735_v14 = vrot.slane %v3733_v12, 7  ;;  %v3040_v19 = vadd.f32 %v2978_v2, %v10075_v45  ;;  %v4210_v63 = vor.u32 %v4208_v28, %v4206_v27  ;;  %v10528_v35 = vpop.f32.mrb[176].mxu1  ;;  %5280 = vmatpush1.bf16.msra.mxu1 %v8285_v22  ;;  %v3297_v45 = vpop.permute.xlu0 %3296 }
 0x314   : > { %v7445_v54 = vpack.c.bf16 %v3369_v58, %v3369_v58  ;;  %v11795_v10 = vrot.slane %v10454_v37, 1  ;;  %v4547_v41 = vsel %vm670_vm0, %v4542_v50, %v4546_v16  ;;  %v3118_v31 = vmax.f32 %v3082_v43, 0.0  ;;  %v2831_v8 = vpop.f32.mrb[177].mxu1  ;;  %5281 = vmatprep.subr.bf16.mxu1 %v11762_v18  ;;  %7916 = vmatpush3.bf16.msra.mxu0 %v8297_v55 }
 0x315   : > { %v3736_v27 = vor.u32 %v3735_v14, %v3732_v0  ;;  %7881 = vmatprep.mubr.bf16.mxu1 %v4547_v41  ;;  %v3083_v2 = vadd.f32 %v10441_v26, %v3040_v19  ;;  %v4212_v28 = vshll.u32 %v10424_v57, 16  ;;  %v4339_v22 = vrot.slane %v10522_v5, 1  ;;  %v10542_v30 = vpop.f32.mrb[178].mxu1  ;;  %7917 = vmatprep.subr.bf16.mxu0 %v8306_v7  ;;  %v11796_v8 = vld [vmem:[#allocation21_spill] sm:$0xff] }
 0x316   : > { %v4533_v48 = vsel %vm670_vm0, %v11795_v10, %v4532_v9  ;;  %v3740_v38 = vshrl.u32 %v7445_v54, 16  ;;  %v3743_v50 = vshll.u32 %v7445_v54, 16  ;;  %v3370_v12 = vmul.f32 %v3297_v45, %v3118_v31  ;;  %v2834_v55 = vpop.f32.mrb[179].mxu1  ;;  %v8289_v10 = vld [vmem:[#allocation9 + $0x38] sm:$0xff]  }
 0x317   : > { %4827 = vmatprep.mubr.bf16.mxu0 %v4533_v48  ;;  %v2983_v58 = vadd.f32 %v10291_v23, %v10401_v52  ;;  %v3737_v43 = vsel %vm10141_vm10, %v3728_v53, %v3736_v27  ;;  %v3738_v0 = vrot.slane %v3736_v27, 4  ;;  %v3119_v14 = vmax.f32 %v3083_v2, 0.0  ;;  %5282 = vmatpush1.bf16.msra.mxu1 %v8287_v17  ;;  %v3302_v48 = vpop.permute.xlu1 %3301 }
 0x318   : > { %4828 = vmatmul.mubr.bf16.gmra.mrb[156].mxu0 %v10405_v47  ;;  %v4214_v19 = vrot.slane %v4212_v28, 1  ;;  %3915 = vst [vmem:[#allocation2 + $0x68] sm:$0xf] %v3737_v43  ;;  %v3742_v41 = vrot.slane %v3740_v38, 6  ;;  %v3745_v54 = vrot.slane %v3743_v50, 7  ;;  %v7446_v31 = vpack.c.bf16 %v3370_v12, %v3370_v12  ;;  %5283 = vmatprep.subr.bf16.mxu1 %v11762_v18  ;;  %v10569_v12 = vld [vmem:[#allocation2 + $0x58] sm:$0xff]  }
 0x319   : > { %v10554_v23 = vsel %vm670_vm0, %v4337_v51, %v4339_v22  ;;  %7918 = vmatpush3.bf16.msra.mxu0 %v8306_v7  ;;  %v3371_v52 = vmul.f32 %v3302_v48, %v3119_v14  ;;  %v3041_v45 = vadd.f32 %v2983_v58, %v11796_v8  ;;  %v8291_v58 = vld [vmem:[#allocation9 + $0x40] sm:$0xff]   ;;  %v4220_v8 = vshll.u32 %v10438_v6, 16 }
 0x31a   : > { %v10558_v53 = vsel %vm505_vm1, %v4210_v63, %v4214_v19  ;;  %v4550_v17 = vrot.slane %v10554_v23, 1  ;;  %7919 = vmatprep.subr.bf16.mxu0 %v8307_v13  ;;  %v3746_v27 = vor.u32 %v3745_v54, %v3742_v41  ;;  %v3750_v2 = vshrl.u32 %v7446_v31, 16 }
 0x31b   : > { %v3753_v28 = vshll.u32 %v7446_v31, 16  ;;  %v4536_v38 = vrot.slane %v10558_v53, 1  ;;  %v7447_v50 = vpack.c.bf16 %v3371_v52, %v3371_v52  ;;  %v3084_v7 = vadd.f32 %v10441_v26, %v3041_v45  ;;  %5284 = vmatpush1.bf16.msra.mxu1 %v8289_v10  ;;  %v3307_v10 = vpop.permute.xlu0 %3306 }
 0x31c   : > { %v4551_v51 = vsel %vm670_vm0, %v4546_v16, %v4550_v17  ;;  %v2986_v63 = vadd.f32 %v10302_v46, %v10410_v4  ;;  %v3747_v55 = vsel %vm10141_vm10, %v3738_v0, %v3746_v27  ;;  %v3748_v43 = vrot.slane %v3746_v27, 4  ;;  %5285 = vmatprep.subr.bf16.mxu1 %v11762_v18  ;;  %v11797_v0 = vld [vmem:[#allocation25_spill] sm:$0xff] }
 0x31d   : > { %v3752_v14 = vrot.slane %v3750_v2, 6  ;;  %v3755_v48 = vrot.slane %v3753_v28, 7  ;;  %7882 = vmatmul.mubr.bf16.gmra.mrb[192].mxu1 %v4551_v51  ;;  %3916 = vst [vmem:[#allocation2 + $0x6c] sm:$0xf] %v3747_v55  ;;  %v3760_v16 = vshrl.u32 %v7447_v50, 16  ;;  %v3763_v41 = vshll.u32 %v7447_v50, 16  ;;  %7920 = vmatpush3.bf16.msra.mxu0 %v8307_v13 }
 0x31e   : > { %v4537_v46 = vsel %vm670_vm0, %v4532_v9, %v4536_v38  ;;  %v3120_v4 = vmax.f32 %v3084_v7, 0.0  ;;  %v3042_v31 = vadd.f32 %v2986_v63, %v11797_v0  ;;  %v4216_v52 = vshrl.u32 %v10424_v57, 16  ;;  %6307 = vmatprep.subr.bf16.mxu0 %v11762_v18  ;;  %v8292_v13 = vld [vmem:[#allocation9 + $0x48] sm:$0xff]  }
 0x31f   : > { %v3756_v54 = vor.u32 %v3755_v48, %v3752_v14  ;;  %4835 = vmatprep.mubr.bf16.mxu0 %v4537_v46  ;;  %v3762_v45 = vrot.slane %v3760_v16, 6  ;;  %v3765_v27 = vrot.slane %v3763_v41, 7  ;;  %v4341_v9 = vrot.slane %v10569_v12, 1  ;;  %5286 = vmatpush1.bf16.msra.mxu1 %v8291_v58  ;;  %v3312_v16 = vpop.permute.xlu1 %3311 }
 0x320   : > { %v3372_v2 = vmul.f32 %v3307_v10, %v3120_v4  ;;  %4836 = vmatmul.mubr.bf16.gmra.mrb[160].mxu0 %v10427_v36  ;;  %v3085_v51 = vadd.f32 %v10441_v26, %v3042_v31  ;;  %v4218_v57 = vor.u32 %v4216_v52, %v4214_v19  ;;  %5287 = vmatprep.subr.bf16.mxu1 %v11762_v18  ;;  %v4222_v55 = vrot.slane %v4220_v8, 1 }
 0x321   : > { %v3757_v28 = vsel %vm10141_vm10, %v3748_v43, %v3756_v54  ;;  %v3758_v50 = vrot.slane %v3756_v54, 4  ;;  %v3766_v7 = vor.u32 %v3765_v27, %v3762_v45  ;;  %v10594_v58 = vsel %vm670_vm0, %v4339_v22, %v4341_v9  ;;  %v10603_v54 = vld [vmem:[#allocation2 + $0x60] sm:$0xff]   ;;  %v11799_v45 = vld [vmem:[#allocation23_spill] sm:$0xff] }
 0x322   : > { %3917 = vst [vmem:[#allocation2 + $0x70] sm:$0xf] %v3757_v28  ;;  %v7448_v63 = vpack.c.bf16 %v3372_v2, %v3372_v2  ;;  %v3121_v14 = vmax.f32 %v3085_v51, 0.0  ;;  %v4554_v43 = vrot.slane %v10594_v58, 1  ;;  %v2991_v48 = vadd.f32 %v10287_v39, %v10447_v42  ;;  %v8295_v22 = vld [vmem:[#allocation9 + $0x50] sm:$0xff]  }
 0x323   : > { %v2994_v19 = vadd.f32 %v10300_v59, %v10460_v21  ;;  %v3767_v41 = vsel %vm10141_vm10, %v3758_v50, %v3766_v7  ;;  %v3768_v46 = vrot.slane %v3766_v7, 4  ;;  %5288 = vmatpush1.bf16.msra.mxu1 %v8292_v13  ;;  %v10606_v31 = vsel %vm505_vm1, %v4218_v57, %v4222_v55  ;;  %v11798_v59 = vld [vmem:[#allocation20_spill] sm:$0xff] }
 0x324   : > { %v3770_v4 = vshrl.u32 %v7448_v63, 16  ;;  %v3773_v10 = vshll.u32 %v7448_v63, 16  ;;  %3918 = vst [vmem:[#allocation2 + $0x74] sm:$0xf] %v3767_v41  ;;  %v3373_v0 = vmul.f32 %v3312_v16, %v3121_v14  ;;  %v4555_v39 = vsel %vm670_vm0, %v4550_v17, %v4554_v43  ;;  %5289 = vmatprep.subr.bf16.mxu1 %v11762_v18  ;;  %v8296_v63 = vld [vmem:[#allocation9 + $0x58] sm:$0xff]  }
 0x325   : > { %v3043_v42 = vadd.f32 %v2991_v48, %v11798_v59  ;;  %v4540_v8 = vrot.slane %v10606_v31, 1  ;;  %7885 = vmatprep.mubr.bf16.mxu1 %v4555_v39  ;;  %v3044_v27 = vadd.f32 %v2994_v19, %v11799_v45  ;;  %v4224_v28 = vshrl.u32 %v10438_v6, 16  ;;  %v3317_v6 = vpop.permute.xlu0 %3316  ;;  %v8300_v45 = vld [vmem:[#allocation9 + $0x60] sm:$0xff]  }
 0x326   : > { %v3772_v21 = vrot.slane %v3770_v4, 6  ;;  %v3775_v52 = vrot.slane %v3773_v10, 7  ;;  %v7449_v2 = vpack.c.bf16 %v3373_v0, %v3373_v0  ;;  %v4228_v50 = vshll.u32 %v10485_v24, 16  ;;  %v3322_v0 = vpop.permute.xlu1 %3321 }
 0x327   : > { %v3086_v13 = vadd.f32 %v10441_v26, %v3043_v42  ;;  %v4541_v17 = vsel %vm670_vm0, %v4536_v38, %v4540_v8  ;;  %v3087_v57 = vadd.f32 %v10441_v26, %v3044_v27  ;;  %v4343_v7 = vrot.slane %v10603_v54, 1  ;;  %5290 = vmatpush1.bf16.msra.mxu1 %v8295_v22 }
 0x328   : > { %v3776_v51 = vor.u32 %v3775_v52, %v3772_v21  ;;  %v3780_v14 = vshrl.u32 %v7449_v2, 16  ;;  %v3783_v48 = vshll.u32 %v7449_v2, 16  ;;  %4843 = vmatprep.mubr.bf16.mxu0 %v4541_v17  ;;  %v4226_v16 = vor.u32 %v4224_v28, %v4222_v55  ;;  %5291 = vmatprep.subr.bf16.mxu1 %v11762_v18 }
 0x329   : > { %v3122_v19 = vmax.f32 %v3086_v13, 0.0  ;;  %4844 = vmatmul.mubr.bf16.gmra.mrb[164].mxu0 %v10457_v3  ;;  %v3123_v38 = vmax.f32 %v3087_v57, 0.0  ;;  %v4230_v10 = vrot.slane %v4228_v50, 1  ;;  %v10634_v55 = vsel %vm670_vm0, %v4341_v9, %v4343_v7 }
 0x32a   : > { %v3777_v41 = vsel %vm10141_vm10, %v3768_v46, %v3776_v51  ;;  %v3778_v4 = vrot.slane %v3776_v51, 4  ;;  %v3782_v22 = vrot.slane %v3780_v14, 6  ;;  %v3785_v39 = vrot.slane %v3783_v48, 7  ;;  %v11800_v51 = vld [vmem:[#allocation24_spill] sm:$0xff] }
 0x32b   : > { %3919 = vst [vmem:[#allocation2 + $0x78] sm:$0xf] %v3777_v41  ;;  %v3374_v59 = vmul.f32 %v3317_v6, %v3122_v19  ;;  %v3375_v42 = vmul.f32 %v3322_v0, %v3123_v38  ;;  %v10637_v46 = vsel %vm505_vm1, %v4226_v16, %v4230_v10  ;;  %v4558_v21 = vrot.slane %v10634_v55, 1  ;;  %5292 = vmatpush1.bf16.msra.mxu1 %v8296_v63  ;;  %v8301_v19 = vld [vmem:[#allocation9 + $0x68] sm:$0xff]  }
 0x32c   : > { %v2999_v52 = vadd.f32 %v10323_v25, %v10488_v40  ;;  %v3786_v27 = vor.u32 %v3785_v39, %v3782_v22  ;;  %v4544_v13 = vrot.slane %v10637_v46, 1  ;;  %v3002_v28 = vadd.f32 %v10334_v1, %v10498_v32  ;;  %5293 = vmatprep.subr.bf16.mxu1 %v11762_v18  ;;  %v10655_v1 = vld [vmem:[#allocation2 + $0x68] sm:$0xff]  }
 0x32d   : > { %v7450_v2 = vpack.c.bf16 %v3374_v59, %v3374_v59  ;;  %v7451_v9 = vpack.c.bf16 %v3375_v42, %v3375_v42  ;;  %v4559_v50 = vsel %vm670_vm0, %v4554_v43, %v4558_v21  ;;  %v4232_v63 = vshrl.u32 %v10485_v24, 16 }
 0x32e   : > { %v3045_v25 = vadd.f32 %v2999_v52, %v11800_v51  ;;  %v3787_v40 = vsel %vm10141_vm10, %v3778_v4, %v3786_v27  ;;  %7886 = vmatmul.mubr.bf16.gmra.mrb[196].mxu1 %v4559_v50  ;;  %v4545_v48 = vsel %vm670_vm0, %v4540_v8, %v4544_v13  ;;  %v3788_v16 = vrot.slane %v3786_v27, 4  ;;  %v11801_v4 = vld [vmem:[#allocation27_spill] sm:$0xff]  ;;  %v3327_v8 = vpop.permute.xlu0 %3326  ;;  %v8302_v50 = vld [vmem:[#allocation9 + $0x70] sm:$0xff]  }
 0x32f   : > { %v3790_v17 = vshrl.u32 %v7450_v2, 16  ;;  %v3793_v57 = vshll.u32 %v7450_v2, 16  ;;  %3920 = vst [vmem:[#allocation2 + $0x7c] sm:$0xf] %v3787_v40  ;;  %v3800_v32 = vshrl.u32 %v7451_v9, 16  ;;  %v3803_v14 = vshll.u32 %v7451_v9, 16  ;;  %5294 = vmatpush1.bf16.msra.mxu1 %v8300_v45  ;;  %4851 = vmatprep.mubr.bf16.mxu0 %v4545_v48 }
 0x330   : > { %v3088_v43 = vadd.f32 %v10441_v26, %v3045_v25  ;;  %v3046_v38 = vadd.f32 %v3002_v28, %v11801_v4  ;;  %5295 = vmatprep.subr.bf16.mxu1 %v11762_v18  ;;  %v4236_v39 = vshll.u32 %v10522_v5, 16  ;;  %v4345_v52 = vrot.slane %v10655_v1, 1  ;;  %v11802_v48 = vld [vmem:[#allocation22_spill] sm:$0xff] }
 0x331   : > { %v3792_v6 = vrot.slane %v3790_v17, 6  ;;  %v3795_v41 = vrot.slane %v3793_v57, 7  ;;  %v3802_v24 = vrot.slane %v3800_v32, 6  ;;  %v3805_v0 = vrot.slane %v3803_v14, 7  ;;  %4852 = vmatmul.mubr.bf16.gmra.mrb[168].mxu0 %v10469_v34 }
 0x332   : > { %v3124_v22 = vmax.f32 %v3088_v43, 0.0  ;;  %v3089_v42 = vadd.f32 %v10441_v26, %v3046_v38  ;;  %v3007_v45 = vadd.f32 %v10311_v33, %v10528_v35  ;;  %v4234_v28 = vor.u32 %v4232_v63, %v4230_v10  ;;  %v3332_v33 = vpop.permute.xlu1 %3331  ;;  %v351_v43 = vld [vmem:[#allocation2 + $0x98] sm:$0xf] }
 0x333   : > { %v3796_v59 = vor.u32 %v3795_v41, %v3792_v6  ;;  %v3806_v27 = vor.u32 %v3805_v0, %v3802_v24  ;;  %v4238_v9 = vrot.slane %v4236_v39, 1  ;;  %5296 = vmatpush1.bf16.msra.mxu1 %v8301_v19  ;;  %v10676_v17 = vsel %vm670_vm0, %v4343_v7, %v4345_v52  ;;  %v8305_v41 = vld [vmem:[#allocation9 + $0x78] sm:$0xff]  }
 0x334   : > { %v3376_v2 = vmul.f32 %v3327_v8, %v3124_v22  ;;  %v3125_v40 = vmax.f32 %v3089_v42, 0.0  ;;  %5297 = vmatprep.subr.bf16.mxu1 %v11762_v18  ;;  %v4562_v57 = vrot.slane %v10676_v17, 1  ;;  %v3047_v7 = vadd.f32 %v3007_v45, %v11802_v48  ;;  %v10701_v22 = vld [vmem:[#allocation9 + $0x200] sm:$0xff]  }
 0x335   : > { %v3797_v51 = vsel %vm10141_vm10, %v3788_v16, %v3796_v59  ;;  %v3798_v25 = vrot.slane %v3796_v59, 4  ;;  %v10680_v10 = vsel %vm505_vm1, %v4234_v28, %v4238_v9  ;;  %v3010_v0 = vadd.f32 %v10328_v11, %v10542_v30  ;;  %v10706_v28 = vld [vmem:[#allocation2 + $0x70] sm:$0xff]  }
 0x336   : > { %3921 = vst [vmem:[#allocation2 + $0x80] sm:$0xf] %v3797_v51  ;;  %v7452_v35 = vpack.c.bf16 %v3376_v2, %v3376_v2  ;;  %v3377_v32 = vmul.f32 %v3332_v33, %v3125_v40  ;;  %v4548_v14 = vrot.slane %v10680_v10, 1  ;;  %v4563_v6 = vsel %vm670_vm0, %v4558_v21, %v4562_v57  ;;  %11804 = vst [vmem:[#allocation21_spill] sm:$0xff] %v10706_v28  ;;  %v10710_v40 = vld [vmem:[#allocation2 + $0x78] sm:$0xff]  }
 0x337   : > { %v3807_v63 = vsel %vm10141_vm10, %v3798_v25, %v3806_v27  ;;  %5298 = vmatpush1.bf16.msra.mxu1 %v8302_v50  ;;  %7889 = vmatprep.mubr.bf16.mxu1 %v4563_v6  ;;  %v3090_v24 = vadd.f32 %v10441_v26, %v3047_v7  ;;  %v352_v8 = vsel %vm350_vm13, 0, %v351_v43  ;;  %v3337_v50 = vpop.permute.xlu0 %3336  ;;  %v3808_v11 = vrot.slane %v3806_v27, 4  ;;  %11805 = vst [vmem:[#allocation25_spill] sm:$0xff] %v10710_v40 }
 0x338   : > { %3922 = vst [vmem:[#allocation2 + $0x84] sm:$0xf] %v3807_v63  ;;  %v3810_v19 = vshrl.u32 %v7452_v35, 16  ;;  %v3813_v16 = vshll.u32 %v7452_v35, 16  ;;  %v7453_v4 = vpack.c.bf16 %v3377_v32, %v3377_v32  ;;  %v4549_v38 = vsel %vm670_vm0, %v4544_v13, %v4548_v14  ;;  %5299 = vmatprep.subr.bf16.mxu1 %v11762_v18  ;;  %353 = vst [vmem:[#allocation2 + $0x98] sm:$0xf] %v352_v8 }
 0x339   : > { %4859 = vmatprep.mubr.bf16.mxu0 %v4549_v38  ;;  %v3126_v45 = vmax.f32 %v3090_v24, 0.0  ;;  %v11803_v13 = vld [vmem:[#allocation26_spill] sm:$0xff]  ;;  %v4240_v51 = vshrl.u32 %v10522_v5, 16  ;;  %v4244_v25 = vshll.u32 %v10569_v12, 16  ;;  %v4347_v6 = vrot.slane %v10706_v28, 1  ;;  %v3342_v24 = vpop.permute.xlu1 %3341 }
 0x33a   : > { %v3812_v21 = vrot.slane %v3810_v19, 6  ;;  %v3815_v39 = vrot.slane %v3813_v16, 7  ;;  %v3820_v59 = vshrl.u32 %v7453_v4, 16  ;;  %v3823_v42 = vshll.u32 %v7453_v4, 16  ;;  %4860 = vmatmul.mubr.bf16.gmra.mrb[172].mxu0 %v10516_v15 }
 0x33b   : > { %v3048_v2 = vadd.f32 %v3010_v0, %v11803_v13  ;;  %5300 = vmatpush1.bf16.msra.mxu1 %v8305_v41  ;;  %v3378_v63 = vmul.f32 %v3337_v50, %v3126_v45  ;;  %v4242_v27 = vor.u32 %v4240_v51, %v4238_v9  ;;  %v4246_v43 = vrot.slane %v4244_v25, 1 }
 0x33c   : > { %v3816_v30 = vor.u32 %v3815_v39, %v3812_v21  ;;  %v3822_v33 = vrot.slane %v3820_v59, 6  ;;  %v3825_v35 = vrot.slane %v3823_v42, 7  ;;  %7957 = vmatprep.subr.bf16.mxu1 %v10701_v22  ;;  %v4252_v4 = vshll.u32 %v10603_v54, 16 }
 0x33d   : > { %v3091_v32 = vadd.f32 %v10441_v26, %v3048_v2  ;;  %v7454_v19 = vpack.c.bf16 %v3378_v63, %v3378_v63  ;;  %v10718_v41 = vsel %vm505_vm1, %v4242_v27, %v4246_v43  ;;  %v4248_v26 = vshrl.u32 %v10569_v12, 16 }
 0x33e   : > { %v3817_v48 = vsel %vm10141_vm10, %v3808_v11, %v3816_v30  ;;  %v3818_v7 = vrot.slane %v3816_v30, 4  ;;  %v3826_v5 = vor.u32 %v3825_v35, %v3822_v33  ;;  %v4349_v38 = vrot.slane %v10710_v40, 1 }
 0x33f   : > { %3923 = vst [vmem:[#allocation2 + $0x88] sm:$0xf] %v3817_v48  ;;  %v3127_v16 = vmax.f32 %v3091_v32, 0.0  ;;  %v3830_v0 = vshrl.u32 %v7454_v19, 16  ;;  %v3833_v21 = vshll.u32 %v7454_v19, 16  ;;  %v4552_v8 = vrot.slane %v10718_v41, 1 }
 0x340   : > { %v3827_v9 = vsel %vm10141_vm10, %v3818_v7, %v3826_v5  ;;  %v10729_v59 = vsel %vm670_vm0, %v4345_v52, %v4347_v6  ;;  %v4250_v42 = vor.u32 %v4248_v26, %v4246_v43  ;;  %v4254_v50 = vrot.slane %v4252_v4, 1  ;;  %v10738_v33 = vld [vmem:[#allocation2 + $0x80] sm:$0xff]  }
 0x341   : > { %3924 = vst [vmem:[#allocation2 + $0x8c] sm:$0xf] %v3827_v9  ;;  %v3379_v39 = vmul.f32 %v3342_v24, %v3127_v16  ;;  %v3832_v45 = vrot.slane %v3830_v0, 6  ;;  %v3835_v13 = vrot.slane %v3833_v21, 7  ;;  %v4566_v2 = vrot.slane %v10729_v59, 1 }
 0x342   : > { %v3828_v11 = vrot.slane %v3826_v5, 4  ;;  %v4553_v51 = vsel %vm670_vm0, %v4548_v14, %v4552_v8  ;;  %v10736_v25 = vsel %vm670_vm0, %v4347_v6, %v4349_v38  ;;  %v10744_v63 = vsel %vm505_vm1, %v4250_v42, %v4254_v50  ;;  %v3930_v9 = vld [vmem:[#allocation2 + $0x98] sm:$0x1] }
 0x343   : > { %v7455_v30 = vpack.c.bf16 %v3379_v39, %v3379_v39  ;;  %v3836_v35 = vor.u32 %v3835_v13, %v3832_v45  ;;  %4867 = vmatprep.mubr.bf16.mxu0 %v4553_v51  ;;  %v4567_v52 = vsel %vm670_vm0, %v4562_v57, %v4566_v2  ;;  %v4570_v32 = vrot.slane %v10736_v25, 1 }
 0x344   : > { %7890 = vmatmul.mubr.bf16.gmra.mrb[200].mxu1 %v4567_v52  ;;  %4868 = vmatmul.mubr.bf16.gmra.mrb[176].mxu0 %v10554_v23  ;;  %v4556_v14 = vrot.slane %v10744_v63, 1  ;;  %v4256_v27 = vshrl.u32 %v10603_v54, 16  ;;  %v4260_v19 = vshll.u32 %v10655_v1, 16  ;;  %v4351_v4 = vrot.slane %v10738_v33, 1 }
 0x345   : > { %v3840_v48 = vshrl.u32 %v7455_v30, 16  ;;  %v3843_v7 = vshll.u32 %v7455_v30, 16  ;;  %v3837_v43 = vsel %vm10141_vm10, %v3828_v11, %v3836_v35  ;;  %v3838_v5 = vrot.slane %v3836_v35, 4 }
 0x346   : > { %v4571_v57 = vsel %vm670_vm0, %v4566_v2, %v4570_v32  ;;  %3925 = vst [vmem:[#allocation2 + $0x90] sm:$0xf] %v3837_v43  ;;  %v4557_v26 = vsel %vm670_vm0, %v4552_v8, %v4556_v14  ;;  %v4258_v0 = vor.u32 %v4256_v27, %v4254_v50  ;;  %v4262_v21 = vrot.slane %v4260_v19, 1  ;;  %v10771_v35 = vld [vmem:[#allocation2 + $0x88] sm:$0xf] }
 0x347   : > { %v3842_v16 = vrot.slane %v3840_v48, 6  ;;  %v3845_v6 = vrot.slane %v3843_v7, 7  ;;  %7893 = vmatprep.mubr.bf16.mxu1 %v4571_v57  ;;  %4875 = vmatprep.mubr.bf16.mxu0 %v4557_v26  ;;  %v4268_v39 = vshll.u32 %v10706_v28, 16  ;;  %v10764_v13 = vsel %vm670_vm0, %v4349_v38, %v4351_v4  ;;  %11808 = vst [vmem:[#allocation20_spill] sm:$0xff] %v10771_v35 }
 0x348   : > { %v4043_v8 = vld [vmem:[#allocation2 + $0x8c] sm:$0xf]  ;;  %v10767_v2 = vsel %vm505_vm1, %v4258_v0, %v4262_v21  ;;  %v4574_v11 = vrot.slane %v10764_v13, 1  ;;  %v4264_v30 = vshrl.u32 %v10655_v1, 16  ;;  %v4276_v57 = vshll.u32 %v10710_v40, 16 }
 0x349   : > { %v3846_v42 = vor.u32 %v3845_v6, %v3842_v16  ;;  %v3848_v45 = vrot.slane %v3842_v16, 4  ;;  %v4270_v51 = vrot.slane %v4268_v39, 1  ;;  %v4560_v38 = vrot.slane %v10767_v2, 1  ;;  %v4007_v16 = vld [vmem:[#allocation2] sm:$0xf] }
 0x34a   : > { %v10779_v48 = vcombine.low %v10771_v35, %v4043_v8  ;;  %v4575_v7 = vsel %vm670_vm0, %v4570_v32, %v4574_v11  ;;  %v4266_v27 = vor.u32 %v4264_v30, %v4262_v21  ;;  %v10796_v6 = vld [vmem:[#allocation2 + $0x4] sm:$0xf]  ;;  %v4272_v24 = vshrl.u32 %v10706_v28, 16 }
 0x34b   : > { %v3847_v50 = vsel %vm10141_vm10, %v3838_v5, %v3846_v42  ;;  %v3931_v52 = vsel %vm10758_vm3, %v3848_v45, %v3930_v9  ;;  %v4561_v43 = vsel %vm670_vm0, %v4556_v14, %v4560_v38  ;;  %v4278_v9 = vrot.slane %v4276_v57, 1 }
 0x34c   : > { %3926 = vst [vmem:[#allocation2 + $0x94] sm:$0xf] %v3847_v50  ;;  %3932 = vst [vmem:[#allocation2 + $0x98] sm:$0x1] %v3931_v52  ;;  %4876 = vmatmul.mubr.bf16.gmra.mrb[180].mxu0 %v10594_v58  ;;  %7894 = vmatmul.mubr.bf16.gmra.mrb[204].mxu1 %v4575_v7  ;;  %v10785_v60 = vrot.slane %v10779_v48, 1  ;;  %v10788_v5 = vsel %vm505_vm1, %v4266_v27, %v4270_v51  ;;  %v7299_v21 = vcombine.low %v4007_v16, %v10796_v6 }
 0x34d   : > { %4883 = vmatprep.mubr.bf16.mxu0 %v4561_v43  ;;  %v4564_v14 = vrot.slane %v10788_v5, 1  ;;  %v4274_v39 = vor.u32 %v4272_v24, %v4270_v51  ;;  %v4284_v30 = vshll.u32 %v10738_v33, 16  ;;  %v4009_v50 = vld [vmem:[#allocation2 + $0x8] sm:$0xf]  ;;  %v8372_v52 = vld [vmem:[#allocation2 + $0xc] sm:$0xf] }
 0x34e   : > { %v10793_v19 = vsel %vm670_vm0, %v4351_v4, %v10785_v60  ;;  %v10821_v7 = vcombine.low %v4009_v50, %v8372_v52  ;;  %v4280_v24 = vshrl.u32 %v10710_v40, 16  ;;  %v4157_v35 = vshrl.u32 %v7299_v21, 16 }
 0x34f   : > { %v4578_v32 = vrot.slane %v10793_v19, 1  ;;  %v4565_v42 = vsel %vm670_vm0, %v4560_v38, %v4564_v14  ;;  %v10812_v8 = vsel %vm505_vm1, %v4274_v39, %v4278_v9  ;;  %v4159_v38 = vshll.u32 %v7299_v21, 16 }
 0x350   : > { %v4568_v57 = vrot.slane %v10812_v8, 1  ;;  %v4286_v39 = vrot.slane %v4284_v30, 1  ;;  %v4164_v52 = vshll.u32 %v10821_v7, 16  ;;  %v4282_v28 = vor.u32 %v4280_v24, %v4278_v9 }
 0x351   : > { %v4579_v26 = vsel %vm670_vm0, %v4574_v11, %v4578_v32  ;;  %v4161_v50 = vrot.slane %v4159_v38, 1  ;;  %v4288_v38 = vshrl.u32 %v10738_v33, 16 }
 0x352   : > { %7897 = vmatprep.mubr.bf16.mxu1 %v4579_v26 }
 0x353   : > { %v10801_v0 = vld [vmem:[#allocation2 + $0x90] sm:$0xff]   ;;  %v10804_v4 = vld [vmem:[#allocation2 + $0x98] ss:$0 sps:$4 sm:$0x11]   ;;  %v4162_v30 = vor.u32 %v4161_v50, %v4157_v35  ;;  %v4290_v24 = vor.u32 %v4288_v38, %v4286_v39 }
 0x354   : > { %4884 = vmatmul.mubr.bf16.gmra.mrb[184].mxu0 %v10634_v55  ;;  %v10809_v45 = vrot.slane %v10801_v0, 1  ;;  %v4465_v11 = vrot.slane %v10804_v4, 1  ;;  %v4454_v38 = vshll.u32 %v10804_v4, 16 }
 0x355   : > { %4891 = vmatprep.mubr.bf16.mxu0 %v4565_v42 }
 0x356   : > { %v10819_v51 = vsel %vm670_vm0, %v10785_v60, %v10809_v45  ;;  %v4466_v43 = vsel %vm670_vm0, %v10809_v45, %v4465_v11  ;;  %v4569_v11 = vsel %vm670_vm0, %v4564_v14, %v4568_v57 }
 0x357   : > { %v4582_v27 = vrot.slane %v10819_v51, 1  ;;  %v4586_v16 = vrot.slane %v4466_v43, 1  ;;  %v10834_v43 = vsel %vm505_vm1, %v4282_v28, %v4286_v39  ;;  %v4168_v28 = vshrl.u32 %v10821_v7, 16 }
 0x359   : > { %v4583_v26 = vsel %vm670_vm0, %v4578_v32, %v4582_v27  ;;  %v4587_v42 = vsel %vm670_vm0, %v4582_v27, %v4586_v16  ;;  %v4292_v32 = vshll.u32 %v10779_v48, 16  ;;  %v4572_v27 = vrot.slane %v10834_v43, 1 }
 0x35a   : > { %7898 = vmatmul.mubr.bf16.gmra.mrb[208].mxu1 %v4583_v26  ;;  %v4166_v26 = vrot.slane %v4164_v52, 1 }
 0x35b   : > { %7901 = vmatprep.mubr.bf16.mxu1 %v4587_v42  ;;  %v4294_v40 = vrot.slane %v4292_v32, 1  ;;  %v4573_v14 = vsel %vm670_vm0, %v4568_v57, %v4572_v27  ;;  %v4446_v42 = vshll.u32 %v10801_v0, 16 }
 0x35c   : > { %4892 = vmatmul.mubr.bf16.gmra.mrb[188].mxu0 %v10676_v17  ;;  %v4167_v9 = vsel %vm505_vm1, %v4162_v30, %v4166_v26  ;;  %v4170_v50 = vor.u32 %v4168_v28, %v4166_v26  ;;  %v8319_v26 = vld [vmem:[#allocation9 + $0x210] sm:$0xff]   ;;  %v8373_v28 = vld [vmem:[#allocation2 + $0x10] sm:$0xff]  }
 0x35d   : > { %4899 = vmatprep.mubr.bf16.mxu0 %v4569_v11  ;;  %v10844_v35 = vsel %vm505_vm1, %v4290_v24, %v4294_v40  ;;  %v4296_v11 = vshrl.u32 %v10779_v48, 16  ;;  %v4448_v32 = vrot.slane %v4446_v42, 1  ;;  %v8332_v24 = vld [vmem:[#allocation9 + $0x220] sm:$0xff]   ;;  %v8338_v42 = vld [vmem:[#allocation9 + $0x230] sm:$0xff]  }
 0x35e   : > { %v4576_v52 = vrot.slane %v10844_v35, 1  ;;  %v4175_v39 = vsel %vm505_vm1, %v4170_v50, %v10354_v56  ;;  %v8341_v50 = vld [vmem:[#allocation9 + $0x238] sm:$0xff]  }
 0x35f   : > { %v10851_v57 = vor.u32 %v4296_v11, %v4294_v40  ;;  %v8324_v40 = vld [vmem:[#allocation9 + $0x218] sm:$0xff]  }
 0x360   : > { %v4577_v30 = vsel %vm670_vm0, %v4572_v27, %v4576_v52 }
 0x361   : > { %v4449_v48 = vsel %vm505_vm1, %v10851_v57, %v4448_v32 }
 0x362   : > { %7902 = vmatmul.mubr.bf16.gmra.mrb[212].mxu1 %v4586_v16  ;;  %v8314_v16 = vld [vmem:[#allocation9 + $0x208] sm:$0xff]   ;;  %v4580_v56 = vrot.slane %v4449_v48, 1  ;;  %v8325_v48 = vld [vmem:[#allocation9 + $0x1e0] sm:$0xff]  }
 0x363   : > { %5301 = vmatprep.mubr.bf16.mxu1 %v4167_v9 }
 0x364   : > { %4900 = vmatmul.mubr.bf16.gmra.mrb[192].mxu0 %v10729_v59  ;;  %v4581_v27 = vsel %vm670_vm0, %v4576_v52, %v4580_v56  ;;  %v4044_v52 = vld [vmem:[#allocation2] sm:$0xe] }
 0x365   : > { %4907 = vmatprep.mubr.bf16.mxu0 %v4573_v14  ;;  %v8336_v14 = vld [vmem:[#allocation9 + $0x228] sm:$0xff]  }
 0x36a   : > { %5302 = vmatmul.mubr.bf16.vlgmr.msra.gmra.mrb[216].mxu1 %v7299_v21  ;;  %v4450_v21 = vshrl.u32 %v10801_v0, 16 }
 0x36b   : > { %5309 = vmatprep.mubr.bf16.mxu1 %v4175_v39  ;;  %7958 = vmatpush3.bf16.msra.mxu1 %v10701_v22  ;;  %v4456_v22 = vrot.slane %v4454_v38, 1  ;;  %v8375_v39 = vld [vmem:[#allocation2 + $0x20] sm:$0xff]  }
 0x36c   : > { %4908 = vmatmul.mubr.bf16.gmra.mrb[196].mxu0 %v10736_v25  ;;  %7959 = vmatprep.subr.bf16.mxu1 %v8314_v16  ;;  %v4452_v9 = vor.u32 %v4450_v21, %v4448_v32  ;;  %v4321_v32 = vrot.slane %v10821_v7, 1  ;;  %v10912_v38 = vld [vmem:[#allocation2 + $0x20] sm:$0xff]  }
 0x36d   : > { %4915 = vmatprep.mubr.bf16.mxu0 %v4577_v30 }
 0x36e   : > { %v4457_v0 = vsel %vm505_vm1, %v4452_v9, %v4456_v22 }
 0x36f   : > { %7960 = vmatpush3.bf16.msra.mxu1 %v8314_v16  ;;  %v4584_v4 = vrot.slane %v4457_v0, 1  ;;  %v8374_v16 = vld [vmem:[#allocation2 + $0x18] sm:$0xff]  }
 0x370   : > { %7961 = vmatprep.subr.bf16.mxu1 %v8319_v26 }
 0x372   : > { %5310 = vmatmul.mubr.bf16.gmra.mrb[220].mxu1 %v10821_v7  ;;  %v10907_v7 = vld [vmem:[#allocation2 + $0x14] sm:$0xf] }
 0x373   : > { %5317 = vmatprep.mubr.bf16.mxu1 %v10377_v49  ;;  %7962 = vmatpush3.bf16.msra.mxu1 %v8319_v26  ;;  %v4585_v49 = vsel %vm670_vm0, %v4580_v56, %v4584_v4  ;;  %v8376_v26 = vld [vmem:[#allocation2 + $0x28] sm:$0xff]  }
 0x374   : > { %4916 = vmatmul.mubr.bf16.gmra.mrb[200].mxu0 %v10764_v13  ;;  %7963 = vmatprep.subr.bf16.mxu1 %v8324_v40 }
 0x375   : > { %4923 = vmatprep.mubr.bf16.mxu0 %v4581_v27 }
 0x377   : > { %7964 = vmatpush3.bf16.msra.mxu1 %v8324_v40  ;;  %v5774_v40 = vshll.u32 %v10912_v38, 16 }
 0x378   : > { %7965 = vmatprep.subr.bf16.mxu1 %v8332_v24 }
 0x37a   : > { %5318 = vmatmul.mubr.bf16.gmra.mrb[224].mxu1 %v8373_v28 }
 0x37b   : > { %5325 = vmatprep.mubr.bf16.mxu1 %v10399_v61  ;;  %7966 = vmatpush3.bf16.msra.mxu1 %v8332_v24  ;;  %v7318_v61 = vcombine.low %v4044_v52, %v10796_v6  ;;  %v4324_v6 = vsel %vm670_vm0, %v4321_v32, %v10296_v44  ;;  %v8313_v44 = vld [vmem:[#allocation9 + $0x198] sm:$0xff]  }
 0x37c   : > { %4924 = vmatmul.mubr.bf16.gmra.mrb[204].mxu0 %v10793_v19  ;;  %7967 = vmatprep.subr.bf16.mxu1 %v8336_v14  ;;  %v10924_v24 = vld [vmem:[#allocation2 + $0x28] sm:$0xff]  }
 0x37d   : > { %4931 = vmatprep.mubr.bf16.mxu0 %v4585_v49  ;;  %v4320_v11 = vrot.slane %v7318_v61, 1  ;;  %v5782_v28 = vshll.u32 %v10924_v24, 16 }
 0x37f   : > { %7968 = vmatpush3.bf16.msra.mxu1 %v8336_v14  ;;  %v4322_v30 = vsel %vm670_vm0, %v4320_v11, %v4321_v32  ;;  %v8331_v14 = vld [vmem:[#allocation9 + $0x1f8] sm:$0xff]  }
 0x380   : > { %7969 = vmatprep.subr.bf16.mxu1 %v8338_v42 }
 0x382   : > { %5326 = vmatmul.mubr.bf16.gmra.mrb[228].mxu1 %v8374_v16  ;;  %v10937_v16 = vld [vmem:[#allocation2 + $0x30] sm:$0xff]  }
 0x383   : > { %5333 = vmatprep.mubr.bf16.mxu1 %v10454_v37  ;;  %7970 = vmatpush3.bf16.msra.mxu1 %v8338_v42  ;;  %v8310_v37 = vld [vmem:[#allocation9 + $0x180] sm:$0xff]  }
 0x384   : > { %4932 = vmatmul.mubr.bf16.gmra.mrb[208].mxu0 %v10819_v51  ;;  %7971 = vmatprep.subr.bf16.mxu1 %v8341_v50  ;;  %v8311_v51 = vld [vmem:[#allocation9 + $0x188] sm:$0xff]  }
 0x385   : > { %4939 = vmatprep.mubr.bf16.mxu0 %v4584_v4 }
 0x387   : > { %7972 = vmatpush3.bf16.msra.mxu1 %v8341_v50 }
 0x38a   : > { %5334 = vmatmul.mubr.bf16.gmra.mrb[232].mxu1 %v8375_v39 }
 0x38b   : > { %5341 = vmatprep.mubr.bf16.mxu1 %v10509_v62  ;;  %v8312_v62 = vld [vmem:[#allocation9 + $0x190] sm:$0xff]  }
 0x38c   : > { %4940 = vmatmul.mubr.bf16.gmra.mrb[212].mxu0 %v10809_v45  ;;  %v8377_v45 = vld [vmem:[#allocation2 + $0x30] sm:$0xff]  }
 0x38d   : > { %7921 = vmatprep.mubr.bf16.mxu0 %v4322_v30 }
 0x392   : > { %5342 = vmatmul.mubr.bf16.gmra.mrb[236].mxu1 %v8376_v26 }
 0x393   : > { %5349 = vmatprep.mubr.bf16.mxu1 %v10558_v53  ;;  %v8378_v53 = vld [vmem:[#allocation2 + $0x38] sm:$0xff]  }
 0x394   : > { %7922 = vmatmul.mubr.bf16.vlgmr.msra.gmra.mrb[216].mxu0 %v4324_v6 }
 0x395   : > { %7925 = vmatprep.mubr.bf16.mxu0 %v10317_v29  ;;  %6308 = vmatpush1.bf16.msra.mxu0 %v8310_v37  ;;  %v8315_v29 = vld [vmem:[#allocation9 + $0x1a0] sm:$0xff]  }
 0x396   : > { %6309 = vmatprep.subr.bf16.mxu0 %v11762_v18 }
 0x399   : > { %6310 = vmatpush1.bf16.msra.mxu0 %v8311_v51  ;;  %v5790_v51 = vshll.u32 %v10937_v16, 16 }
 0x39a   : > { %6311 = vmatprep.subr.bf16.mxu0 %v11762_v18  ;;  %5350 = vmatmul.mubr.bf16.gmra.mrb[240].mxu1 %v8377_v45 }
 0x39b   : > { %5357 = vmatprep.mubr.bf16.mxu1 %v10606_v31  ;;  %v8379_v31 = vld [vmem:[#allocation2 + $0x40] sm:$0xff]  }
 0x39c   : > { %7926 = vmatmul.mubr.bf16.gmra.mrb[220].mxu0 %v10382_v20  ;;  %v8316_v20 = vld [vmem:[#allocation9 + $0x1a8] sm:$0xff]  }
 0x39d   : > { %7929 = vmatprep.mubr.bf16.mxu0 %v10405_v47  ;;  %6312 = vmatpush1.bf16.msra.mxu0 %v8312_v62  ;;  %v8317_v47 = vld [vmem:[#allocation9 + $0x1b0] sm:$0xff]  }
 0x39e   : > { %6313 = vmatprep.subr.bf16.mxu0 %v11762_v18 }
 0x3a1   : > { %6314 = vmatpush1.bf16.msra.mxu0 %v8313_v44  ;;  %v5786_v44 = vshrl.u32 %v10924_v24, 16 }
 0x3a2   : > { %6315 = vmatprep.subr.bf16.mxu0 %v11762_v18  ;;  %5358 = vmatmul.mubr.bf16.gmra.mrb[244].mxu1 %v8378_v53 }
 0x3a3   : > { %5365 = vmatprep.mubr.bf16.mxu1 %v10637_v46  ;;  %v8380_v46 = vld [vmem:[#allocation2 + $0x48] sm:$0xff]  }
 0x3a4   : > { %7930 = vmatmul.mubr.bf16.gmra.mrb[224].mxu0 %v10427_v36  ;;  %v8318_v36 = vld [vmem:[#allocation9 + $0x1b8] sm:$0xff]  }
 0x3a5   : > { %7933 = vmatprep.mubr.bf16.mxu0 %v10457_v3  ;;  %6316 = vmatpush1.bf16.msra.mxu0 %v8315_v29  ;;  %v8320_v3 = vld [vmem:[#allocation9 + $0x1c0] sm:$0xff]  }
 0x3a6   : > { %6317 = vmatprep.subr.bf16.mxu0 %v11762_v18 }
 0x3a9   : > { %6318 = vmatpush1.bf16.msra.mxu0 %v8316_v20 }
 0x3aa   : > { %6319 = vmatprep.subr.bf16.mxu0 %v11762_v18  ;;  %5366 = vmatmul.mubr.bf16.gmra.mrb[248].mxu1 %v8379_v31  ;;  %v5792_v31 = vrot.slane %v5790_v51, 1 }
 0x3ab   : > { %5373 = vmatprep.mubr.bf16.mxu1 %v10680_v10  ;;  %v8381_v10 = vld [vmem:[#allocation2 + $0x50] sm:$0xff]  }
 0x3ac   : > { %7934 = vmatmul.mubr.bf16.gmra.mrb[228].mxu0 %v10469_v34  ;;  %v8321_v34 = vld [vmem:[#allocation9 + $0x1c8] sm:$0xff]  }
 0x3ad   : > { %7937 = vmatprep.mubr.bf16.mxu0 %v10516_v15  ;;  %6320 = vmatpush1.bf16.msra.mxu0 %v8317_v47  ;;  %v8322_v15 = vld [vmem:[#allocation9 + $0x1d0] sm:$0xff]  }
 0x3ae   : > { %6321 = vmatprep.subr.bf16.mxu0 %v11762_v18 }
 0x3b1   : > { %6322 = vmatpush1.bf16.msra.mxu0 %v8318_v36  ;;  %v10954_v36 = vld [vmem:[#allocation2 + $0x38] sm:$0xff]  }
 0x3b2   : > { %6323 = vmatprep.subr.bf16.mxu0 %v11762_v18  ;;  %5374 = vmatmul.mubr.bf16.gmra.mrb[252].mxu1 %v8380_v46 }
 0x3b3   : > { %5381 = vmatprep.mubr.bf16.mxu1 %v10718_v41  ;;  %v10904_v41 = vld [vmem:[#allocation2 + $0x18] sm:$0xff]  }
 0x3b4   : > { %7938 = vmatmul.mubr.bf16.gmra.mrb[232].mxu0 %v10554_v23  ;;  %v8323_v23 = vld [vmem:[#allocation9 + $0x1d8] sm:$0xff]   ;;  %v5770_v9 = vshrl.u32 %v10904_v41, 16  ;;  %v5999_v45 = vrot.slane %v10904_v41, 2 }
 0x3b5   : > { %7941 = vmatprep.mubr.bf16.mxu0 %v10594_v58  ;;  %6324 = vmatpush1.bf16.msra.mxu0 %v8320_v3  ;;  %v5623_v58 = vld [vmem:[#allocation2 + $0x10] sm:$0xc] }
 0x3b6   : > { %6325 = vmatprep.subr.bf16.mxu0 %v11762_v18  ;;  %v10910_v21 = vcombine.low %v5623_v58, %v10907_v7 }
 0x3b9   : > { %6326 = vmatpush1.bf16.msra.mxu0 %v8321_v34  ;;  %v11809_v34 = vld [vmem:[#allocation21_spill] sm:$0xff] }
 0x3ba   : > { %5382 = vmatmul.mubr.bf16.gmra.mrb[0].mxu1 %v8381_v10  ;;  %6327 = vmatprep.subr.bf16.mxu0 %v11762_v18 }
 0x3bb   : > { %5389 = vmatprep.mubr.bf16.mxu1 %v10744_v63  ;;  %v5761_v63 = vshll.u32 %v10910_v21, 16 }
 0x3bc   : > { %7942 = vmatmul.mubr.bf16.gmra.mrb[236].mxu0 %v10634_v55  ;;  %v5766_v55 = vshll.u32 %v10904_v41, 16 }
 0x3bd   : > { %7945 = vmatprep.mubr.bf16.mxu0 %v10676_v17  ;;  %6328 = vmatpush1.bf16.msra.mxu0 %v8322_v15  ;;  %v8326_v17 = vld [vmem:[#allocation9 + $0x1e8] sm:$0xff]   ;;  %v5763_v22 = vrot.slane %v5761_v63, 1 }
 0x3be   : > { %6329 = vmatprep.subr.bf16.mxu0 %v11762_v18  ;;  %v5768_v56 = vrot.slane %v5766_v55, 1  ;;  %v5798_v55 = vshll.u32 %v10954_v36, 16 }
 0x3c0   : > { %v5772_v27 = vor.u32 %v5770_v9, %v5768_v56 }
 0x3c1   : > { %6330 = vmatpush1.bf16.msra.mxu0 %v8323_v23 }
 0x3c2   : > { %5390 = vmatmul.mubr.bf16.gmra.mrb[4].mxu1 %v10569_v12  ;;  %6331 = vmatprep.subr.bf16.mxu0 %v11762_v18  ;;  %v8327_v12 = vld [vmem:[#allocation9 + $0x1f0] sm:$0xff]  }
 0x3c3   : > { %5397 = vmatprep.mubr.bf16.mxu1 %v10767_v2  ;;  %v5776_v2 = vrot.slane %v5774_v40, 1 }
 0x3c4   : > { %7946 = vmatmul.mubr.bf16.gmra.mrb[240].mxu0 %v10729_v59  ;;  %v5759_v59 = vshrl.u32 %v10910_v21, 16 }
 0x3c5   : > { %7949 = vmatprep.mubr.bf16.mxu0 %v10736_v25  ;;  %6332 = vmatpush1.bf16.msra.mxu0 %v8325_v48  ;;  %v5777_v0 = vsel %vm505_vm1, %v5772_v27, %v5776_v2  ;;  %v10974_v27 = vld [vmem:[#allocation2 + $0x40] sm:$0xff]  }
 0x3c6   : > { %6333 = vmatprep.subr.bf16.mxu0 %v11762_v18  ;;  %v5764_v25 = vor.u32 %v5763_v22, %v5759_v59  ;;  %v6002_v42 = vrot.slane %v5777_v0, 2  ;;  %v5800_v22 = vrot.slane %v5798_v55, 1  ;;  %v11810_v0 = vld [vmem:[#allocation25_spill] sm:$0xff] }
 0x3c9   : > { %6334 = vmatpush1.bf16.msra.mxu0 %v8326_v17  ;;  %v6007_v17 = vrot.slane %v10912_v38, 2 }
 0x3ca   : > { %5398 = vmatmul.mubr.bf16.gmra.mrb[8].mxu1 %v10603_v54  ;;  %6335 = vmatprep.subr.bf16.mxu0 %v11762_v18  ;;  %v5769_v54 = vsel %vm505_vm1, %v5764_v25, %v5768_v56 }
 0x3cb   : > { %5405 = vmatprep.mubr.bf16.mxu1 %v10788_v5  ;;  %v6001_v61 = vrot.slane %v5769_v54, 2 }
 0x3cc   : > { %7950 = vmatmul.mubr.bf16.gmra.mrb[244].mxu0 %v10764_v13  ;;  %v5778_v13 = vshrl.u32 %v10912_v38, 16 }
 0x3cd   : > { %7953 = vmatprep.mubr.bf16.mxu0 %v10793_v19  ;;  %6336 = vmatpush1.bf16.msra.mxu0 %v8327_v12  ;;  %v5784_v19 = vrot.slane %v5782_v28, 1  ;;  %v6003_v30 = vsel %vm2349_vm2, %v6001_v61, %v6002_v42  ;;  %v5794_v12 = vshrl.u32 %v10937_v16, 16 }
 0x3ce   : > { %v7871_v4 = vpop.f32.mrb[180].mxu1  ;;  %6337 = vmatprep.subr.bf16.mxu0 %v11762_v18  ;;  %v5780_v18 = vor.u32 %v5778_v13, %v5776_v2  ;;  %v6013_v13 = vrot.slane %v10924_v24, 2 }
 0x3cf   : > { %v4982_v49 = vpop.f32.mrb[181].mxu1  ;;  %v5788_v47 = vor.u32 %v5786_v44, %v5784_v19  ;;  %v5796_v28 = vor.u32 %v5794_v12, %v5792_v31 }
 0x3d0   : > { %v7872_v5 = vpop.f32.mrb[182].mxu1  ;;  %v5785_v6 = vsel %vm505_vm1, %v5780_v18, %v5784_v19  ;;  %v5802_v19 = vshrl.u32 %v10954_v36, 16 }
 0x3d1   : > { %v4985_v50 = vpop.f32.mrb[183].mxu1  ;;  %6338 = vmatpush1.bf16.msra.mxu0 %v8331_v14 }
 0x3d2   : > { %v4805_v52 = vpop.f32.mrb[144].mxu0  ;;  %5406 = vmatmul.mubr.bf16.gmra.mrb[12].mxu1 %v10655_v1  ;;  %v5804_v18 = vor.u32 %v5802_v19, %v5800_v22 }
 0x3d3   : > { %v10939_v11 = vadd.f32 %v4982_v49, %v4805_v52  ;;  %v4807_v32 = vpop.f32.mrb[145].mxu0  ;;  %5413 = vmatprep.mubr.bf16.mxu1 %v10812_v8  ;;  %v6009_v8 = vrot.slane %v5785_v6, 2  ;;  %v5806_v52 = vshll.u32 %v10974_v27, 16  ;;  %v10993_v6 = vld [vmem:[#allocation2 + $0x48] sm:$0xff]  }
 0x3d4   : > { %v4808_v39 = vpop.f32.mrb[146].mxu0  ;;  %7954 = vmatmul.mubr.bf16.gmra.mrb[248].mxu0 %v10785_v60  ;;  %v5998_v60 = vrot.slane %v10910_v21, 2  ;;  %v5793_v21 = vsel %vm505_vm1, %v5788_v47, %v5792_v31 }
 0x3d5   : > { %v10945_v37 = vadd.f32 %v4985_v50, %v4808_v39  ;;  %v4810_v26 = vpop.f32.mrb[147].mxu0  ;;  %6339 = vmatprep.mubr.bf16.mxu0 %v6003_v30  ;;  %v6010_v23 = vsel %vm2349_vm2, %v6002_v42, %v6009_v8  ;;  %v6015_v56 = vrot.slane %v5793_v21, 2  ;;  %v5661_v42 = vld [vmem:[#allocation2 + $0x10] sm:$0x8]  ;;  %v5801_v50 = vsel %vm505_vm1, %v5796_v28, %v5800_v22 }
 0x3d6   : > { %v6000_v15 = vsel %vm2349_vm2, %v5998_v60, %v5999_v45  ;;  %v7391_v61 = vcombine.low %v5661_v42, %v10907_v7  ;;  %v6021_v32 = vrot.slane %v5801_v50, 2  ;;  %v5808_v30 = vrot.slane %v5806_v52, 1 }
 0x3d7   : > { %v7875_v62 = vpop.f32.mrb[184].mxu1  ;;  %v6016_v49 = vsel %vm2349_vm2, %v6009_v8, %v6015_v56  ;;  %v5913_v26 = vrot.slane %v10904_v41, 1 }
 0x3d8   : > { %v4998_v1 = vpop.f32.mrb[185].mxu1  ;;  %v5912_v7 = vrot.slane %v7391_v61, 1  ;;  %v6022_v8 = vsel %vm2349_vm2, %v6015_v56, %v6021_v32  ;;  %v5810_v56 = vshrl.u32 %v10974_v27, 16  ;;  %v6025_v61 = vrot.slane %v10954_v36, 2 }
 0x3d9   : > { %v10951_v29 = vpop.f32.mrb[186].mxu1 }
 0x3da   : > { %v4813_v53 = vpop.f32.mrb[148].mxu0  ;;  %v5001_v20 = vpop.f32.mrb[187].mxu1  ;;  %5414 = vmatmul.mubr.bf16.gmra.mrb[16].mxu1 %v11809_v34 }
 0x3db   : > { %v10956_v3 = vadd.f32 %v7871_v4, %v4813_v53  ;;  %v4815_v46 = vpop.f32.mrb[149].mxu0  ;;  %5421 = vmatprep.mubr.bf16.mxu1 %v10834_v43  ;;  %v6008_v4 = vsel %vm2349_vm2, %v5999_v45, %v6007_v17  ;;  %v5809_v53 = vsel %vm505_vm1, %v5804_v18, %v5808_v30 }
 0x3dc   : > { %v4816_v10 = vpop.f32.mrb[150].mxu0  ;;  %6340 = vmatmul.mubr.bf16.vlgmr.msra.gmra.mrb[252].mxu0 %v6000_v15  ;;  %v6019_v46 = vrot.slane %v10937_v16, 2  ;;  %v11811_v15 = vld [vmem:[#allocation20_spill] sm:$0xff] }
 0x3dd   : > { %v10962_v58 = vadd.f32 %v7872_v5, %v4816_v10  ;;  %v4818_v48 = vpop.f32.mrb[151].mxu0  ;;  %6347 = vmatprep.mubr.bf16.mxu0 %v6010_v23  ;;  %v6027_v23 = vrot.slane %v5809_v53, 2 }
 0x3e0   : > { %v10967_v63 = vpop.f32.mrb[188].mxu1 }
 0x3e1   : > { %v10969_v40 = vpop.f32.mrb[189].mxu1 }
 0x3e2   : > { %v4821_v9 = vpop.f32.mrb[152].mxu0  ;;  %v10971_v43 = vpop.f32.mrb[190].mxu1  ;;  %5422 = vmatmul.mubr.bf16.gmra.mrb[20].mxu1 %v11810_v0  ;;  %v6020_v0 = vsel %vm2349_vm2, %v6013_v13, %v6019_v46 }
 0x3e3   : > { %v10976_v2 = vadd.f32 %v4998_v1, %v4821_v9  ;;  %v4823_v59 = vpop.f32.mrb[153].mxu0  ;;  %v10978_v25 = vpop.f32.mrb[191].mxu1  ;;  %5429 = vmatprep.mubr.bf16.mxu1 %v10844_v35  ;;  %v5915_v35 = vrot.slane %v10912_v38, 1  ;;  %v6014_v1 = vsel %vm2349_vm2, %v6007_v17, %v6013_v13  ;;  %v5921_v13 = vrot.slane %v10954_v36, 1 }
 0x3e4   : > { %v4824_v14 = vpop.f32.mrb[154].mxu0  ;;  %6348 = vmatmul.mubr.bf16.gmra.mrb[0].mxu0 %v6008_v4 }
 0x3e5   : > { %v10984_v54 = vadd.f32 %v5001_v20, %v4824_v14  ;;  %v4826_v5 = vpop.f32.mrb[155].mxu0  ;;  %6355 = vmatprep.mubr.bf16.mxu0 %v6016_v49  ;;  %v5916_v38 = vsel %vm670_vm0, %v5913_v26, %v5915_v35  ;;  %v5814_v20 = vshll.u32 %v10993_v6, 16  ;;  %v5812_v14 = vor.u32 %v5810_v56, %v5808_v30  ;;  %v11041_v30 = vld [vmem:[#allocation2 + $0x58] sm:$0xff]  }
 0x3e6   : > { %v6005_v31 = vrot.slane %v5916_v38, 2  ;;  %v6028_v49 = vsel %vm2349_vm2, %v6021_v32, %v6027_v23 }
 0x3e7   : > { %v5816_v9 = vrot.slane %v5814_v20, 1  ;;  %v5830_v20 = vshll.u32 %v11041_v30, 16 }
 0x3e9   : > { %v5817_v50 = vsel %vm505_vm1, %v5812_v14, %v5816_v9 }
 0x3ea   : > { %5430 = vmatmul.mubr.bf16.gmra.mrb[24].mxu1 %v10738_v33  ;;  %v5914_v33 = vsel %vm670_vm0, %v5912_v7, %v5913_v26 }
 0x3eb   : > { %v4829_v39 = vpop.f32.mrb[156].mxu0  ;;  %5437 = vmatprep.mubr.bf16.mxu1 %v10851_v57  ;;  %v5917_v57 = vrot.slane %v10924_v24, 1  ;;  %v6004_v21 = vrot.slane %v5914_v33, 2  ;;  %v11021_v24 = vld [vmem:[#allocation2 + $0x50] sm:$0xff]  }
 0x3ec   : > { %v10995_v51 = vadd.f32 %v7875_v62, %v4829_v39  ;;  %v4831_v45 = vpop.f32.mrb[157].mxu0  ;;  %6356 = vmatmul.mubr.bf16.gmra.mrb[4].mxu0 %v6014_v1  ;;  %v4042_v62 = vld [vmem:[#allocation2 + $0x8c] sm:$0x7]  ;;  %v5822_v52 = vshll.u32 %v11021_v24, 16  ;;  %v6033_v39 = vrot.slane %v5817_v50, 2  ;;  %v6026_v1 = vsel %vm2349_vm2, %v6019_v46, %v6025_v61 }
 0x3ed   : > { %v4832_v44 = vpop.f32.mrb[158].mxu0  ;;  %6363 = vmatprep.mubr.bf16.mxu0 %v6022_v8  ;;  %v7316_v10 = vcombine.low %v11811_v15, %v4042_v62  ;;  %v6006_v59 = vsel %vm2349_vm2, %v6004_v21, %v6005_v31  ;;  %v5925_v46 = vrot.slane %v10993_v6, 1  ;;  %v6031_v15 = vrot.slane %v10974_v27, 2 }
 0x3ee   : > { %v11003_v41 = vadd.f32 %v10951_v29, %v4832_v44  ;;  %v4834_v60 = vpop.f32.mrb[159].mxu0  ;;  %v5919_v29 = vrot.slane %v10937_v16, 1  ;;  %v5918_v16 = vsel %vm670_vm0, %v5915_v35, %v5917_v57  ;;  %v5923_v35 = vrot.slane %v10974_v27, 1 }
 0x3ef   : > { %v6011_v42 = vrot.slane %v5918_v16, 2  ;;  %v5824_v18 = vrot.slane %v5822_v52, 1  ;;  %v6034_v38 = vsel %vm2349_vm2, %v6027_v23, %v6033_v39  ;;  %v5826_v56 = vshrl.u32 %v11021_v24, 16 }
 0x3f0   : > { %v11008_v47 = vpop.f32.mrb[192].mxu1  ;;  %v5920_v28 = vsel %vm670_vm0, %v5917_v57, %v5919_v29  ;;  %v5922_v26 = vsel %vm670_vm0, %v5919_v29, %v5921_v13  ;;  %v5924_v7 = vsel %vm670_vm0, %v5921_v13, %v5923_v35  ;;  %v5926_v16 = vsel %vm670_vm0, %v5923_v35, %v5925_v46 }
 0x3f1   : > { %v11012_v34 = vpop.f32.mrb[193].mxu1  ;;  %v6017_v19 = vrot.slane %v5920_v28, 2  ;;  %v6012_v32 = vsel %vm2349_vm2, %v6005_v31, %v6011_v42  ;;  %v6023_v53 = vrot.slane %v5922_v26, 2  ;;  %v6029_v29 = vrot.slane %v5924_v7, 2 }
 0x3f2   : > { %v11016_v48 = vpop.f32.mrb[194].mxu1  ;;  %5438 = vmatmul.mubr.bf16.gmra.mrb[28].mxu1 %v7316_v10  ;;  %v5828_v14 = vor.u32 %v5826_v56, %v5824_v18  ;;  %v6035_v52 = vrot.slane %v5926_v16, 2 }
 0x3f3   : > { %v4837_v55 = vpop.f32.mrb[160].mxu0  ;;  %v11018_v17 = vpop.f32.mrb[195].mxu1  ;;  %7973 = vmatprep.mubr.bf16.mxu1 %v6006_v59  ;;  %v6018_v45 = vsel %vm2349_vm2, %v6011_v42, %v6017_v19  ;;  %v6024_v21 = vsel %vm2349_vm2, %v6017_v19, %v6023_v53  ;;  %v6030_v27 = vsel %vm2349_vm2, %v6023_v53, %v6029_v29  ;;  %v6032_v59 = vsel %vm2349_vm2, %v6025_v61, %v6031_v15 }
 0x3f4   : > { %v11024_v12 = vadd.f32 %v10969_v40, %v4837_v55  ;;  %v4839_v22 = vpop.f32.mrb[161].mxu0  ;;  %6364 = vmatmul.mubr.bf16.gmra.mrb[8].mxu0 %v6020_v0  ;;  %v6036_v26 = vsel %vm2349_vm2, %v6029_v29, %v6035_v52 }
 0x3f5   : > { %v4840_v4 = vpop.f32.mrb[162].mxu0  ;;  %6371 = vmatprep.mubr.bf16.mxu0 %v6028_v49 }
 0x3f6   : > { %v11032_v5 = vadd.f32 %v10978_v25, %v4840_v4  ;;  %v4842_v40 = vpop.f32.mrb[163].mxu0  ;;  %v5818_v25 = vshrl.u32 %v10993_v6, 16 }
 0x3f8   : > { %v5820_v36 = vor.u32 %v5818_v25, %v5816_v9  ;;  %v5832_v9 = vrot.slane %v5830_v20, 1 }
 0x3fa   : > { %7974 = vmatmul.mubr.bf16.vlgmr.msra.gmra.mrb[32].mxu1 %v6012_v32  ;;  %v5825_v33 = vsel %vm505_vm1, %v5820_v36, %v5824_v18  ;;  %v5833_v13 = vsel %vm505_vm1, %v5828_v14, %v5832_v9  ;;  %v5929_v32 = vrot.slane %v11041_v30, 1 }
 0x3fb   : > { %7977 = vmatprep.mubr.bf16.mxu1 %v6018_v45  ;;  %v6039_v23 = vrot.slane %v5825_v33, 2  ;;  %v6045_v18 = vrot.slane %v5833_v13, 2  ;;  %v5834_v45 = vshrl.u32 %v11041_v30, 16 }
 0x3fc   : > { %v4845_v44 = vpop.f32.mrb[164].mxu0  ;;  %6372 = vmatmul.mubr.bf16.gmra.mrb[12].mxu0 %v6026_v1 }
 0x3fd   : > { %v11049_v8 = vadd.f32 %v10967_v63, %v4845_v44  ;;  %v4847_v60 = vpop.f32.mrb[165].mxu0  ;;  %6379 = vmatprep.mubr.bf16.mxu0 %v6034_v38  ;;  %v5927_v63 = vrot.slane %v11021_v24, 1  ;;  %v6040_v49 = vsel %vm2349_vm2, %v6033_v39, %v6039_v23  ;;  %v6037_v39 = vrot.slane %v10993_v6, 2  ;;  %v11089_v44 = vld [vmem:[#allocation2 + $0x68] sm:$0xff]  }
 0x3fe   : > { %v4848_v62 = vpop.f32.mrb[166].mxu0  ;;  %v5836_v38 = vor.u32 %v5834_v45, %v5832_v9  ;;  %v11095_v60 = vld [vmem:[#allocation2 + $0x70] sm:$0xff]   ;;  %v5846_v29 = vshll.u32 %v11089_v44, 16 }
 0x3ff   : > { %v11054_v57 = vadd.f32 %v10971_v43, %v4848_v62  ;;  %v4850_v31 = vpop.f32.mrb[167].mxu0  ;;  %v11065_v43 = vld [vmem:[#allocation2 + $0x60] sm:$0xff]   ;;  %v5928_v28 = vsel %vm670_vm0, %v5925_v46, %v5927_v63  ;;  %v6038_v7 = vsel %vm2349_vm2, %v6031_v15, %v6037_v39  ;;  %v6046_v62 = vsel %vm2349_vm2, %v6039_v23, %v6045_v18 }
 0x400   : > { %v5838_v19 = vshll.u32 %v11065_v43, 16  ;;  %v6041_v25 = vrot.slane %v5928_v28, 2  ;;  %v6043_v23 = vrot.slane %v11021_v24, 2  ;;  %v5935_v16 = vrot.slane %v11095_v60, 1 }
 0x401   : > { %v11059_v10 = vpop.f32.mrb[196].mxu1 }
 0x402   : > { %v11062_v55 = vpop.f32.mrb[197].mxu1  ;;  %7978 = vmatmul.mubr.bf16.gmra.mrb[36].mxu1 %v6024_v21  ;;  %v5840_v1 = vrot.slane %v5838_v19, 1  ;;  %v6042_v36 = vsel %vm2349_vm2, %v6035_v52, %v6041_v25 }
 0x403   : > { %v11067_v22 = vpop.f32.mrb[198].mxu1  ;;  %7981 = vmatprep.mubr.bf16.mxu1 %v6030_v27 }
 0x404   : > { %v4853_v0 = vpop.f32.mrb[168].mxu0  ;;  %v11072_v4 = vpop.f32.mrb[199].mxu1  ;;  %6380 = vmatmul.mubr.bf16.gmra.mrb[16].mxu0 %v6032_v59  ;;  %v5841_v46 = vsel %vm505_vm1, %v5836_v38, %v5840_v1  ;;  %v5842_v59 = vshrl.u32 %v11065_v43, 16 }
 0x405   : > { %v11077_v40 = vadd.f32 %v11012_v34, %v4853_v0  ;;  %v4855_v42 = vpop.f32.mrb[169].mxu0  ;;  %6387 = vmatprep.mubr.bf16.mxu0 %v6040_v49  ;;  %v5931_v34 = vrot.slane %v11065_v43, 1  ;;  %v5848_v0 = vrot.slane %v5846_v29, 1  ;;  %v11113_v49 = vld [vmem:[#allocation2 + $0x78] sm:$0xff]   ;;  %v11146_v29 = vld [vmem:[#allocation2 + $0x88] sm:$0xff]  }
 0x406   : > { %v4856_v50 = vpop.f32.mrb[170].mxu0  ;;  %v5844_v42 = vor.u32 %v5842_v59, %v5840_v1 }
 0x407   : > { %v11082_v61 = vadd.f32 %v11018_v17, %v4856_v50  ;;  %v4858_v35 = vpop.f32.mrb[171].mxu0  ;;  %v5930_v17 = vsel %vm670_vm0, %v5927_v63, %v5929_v32  ;;  %v5932_v6 = vsel %vm670_vm0, %v5929_v32, %v5931_v34  ;;  %v5933_v63 = vrot.slane %v11089_v44, 1  ;;  %v11117_v50 = vld [vmem:[#allocation2 + $0x80] sm:$0xff]  }
 0x408   : > { %v6047_v31 = vrot.slane %v5930_v17, 2  ;;  %v6053_v21 = vrot.slane %v5932_v6, 2  ;;  %v11121_v19 = vsel %vm505_vm1, %v5844_v42, %v5848_v0  ;;  %v5854_v35 = vshll.u32 %v11095_v60, 16 }
 0x409   : > { %v5934_v14 = vsel %vm670_vm0, %v5931_v34, %v5933_v63  ;;  %v5936_v24 = vsel %vm670_vm0, %v5933_v63, %v5935_v16  ;;  %v5937_v32 = vrot.slane %v11113_v49, 1  ;;  %v5939_v45 = vrot.slane %v11117_v50, 1 }
 0x40a   : > { %7982 = vmatmul.mubr.bf16.gmra.mrb[40].mxu1 %v6036_v26  ;;  %v6048_v27 = vsel %vm2349_vm2, %v6041_v25, %v6047_v31  ;;  %v6054_v28 = vsel %vm2349_vm2, %v6047_v31, %v6053_v21  ;;  %v6059_v13 = vrot.slane %v5934_v14, 2  ;;  %v6065_v25 = vrot.slane %v5936_v24, 2 }
 0x40b   : > { %7985 = vmatprep.mubr.bf16.mxu1 %v6042_v36  ;;  %v6049_v26 = vrot.slane %v11041_v30, 2  ;;  %v6057_v36 = vrot.slane %v11121_v19, 2  ;;  %v5941_v14 = vrot.slane %v11146_v29, 1 }
 0x40c   : > { %6388 = vmatmul.mubr.bf16.gmra.mrb[20].mxu0 %v6038_v7  ;;  %v6060_v6 = vsel %vm2349_vm2, %v6053_v21, %v6059_v13  ;;  %v5940_v21 = vsel %vm670_vm0, %v5937_v32, %v5939_v45 }
 0x40d   : > { %v4861_v53 = vpop.f32.mrb[172].mxu0  ;;  %6395 = vmatprep.mubr.bf16.mxu0 %v6046_v62  ;;  %v5850_v62 = vshrl.u32 %v11089_v44, 16 }
 0x40e   : > { %v11099_v33 = vadd.f32 %v11008_v47, %v4861_v53  ;;  %v4863_v20 = vpop.f32.mrb[173].mxu0  ;;  %v6051_v47 = vrot.slane %v5841_v46, 2  ;;  %v5856_v53 = vrot.slane %v5854_v35, 1  ;;  %v6066_v46 = vsel %vm2349_vm2, %v6059_v13, %v6065_v25 }
 0x40f   : > { %v4864_v15 = vpop.f32.mrb[174].mxu0  ;;  %v5852_v63 = vor.u32 %v5850_v62, %v5848_v0  ;;  %v6055_v0 = vrot.slane %v11065_v43, 2 }
 0x410   : > { %v11105_v56 = vadd.f32 %v11016_v48, %v4864_v15  ;;  %v4866_v9 = vpop.f32.mrb[175].mxu0  ;;  %v6044_v48 = vsel %vm2349_vm2, %v6037_v39, %v6043_v23  ;;  %v6052_v52 = vsel %vm2349_vm2, %v6045_v18, %v6051_v47  ;;  %v6050_v15 = vsel %vm2349_vm2, %v6043_v23, %v6049_v26 }
 0x411   : > { %v11150_v9 = vld [vmem:[#allocation2 + $0x90] sm:$0xff]   ;;  %v5857_v59 = vsel %vm505_vm1, %v5852_v63, %v5856_v53 }
 0x412   : > { %7986 = vmatmul.mubr.bf16.gmra.mrb[44].mxu1 %v6048_v27  ;;  %v5943_v42 = vrot.slane %v11150_v9, 1  ;;  %v6063_v13 = vrot.slane %v5857_v59, 2 }
 0x413   : > { %7989 = vmatprep.mubr.bf16.mxu1 %v6054_v28  ;;  %v6077_v28 = vrot.slane %v5940_v21, 2 }
 0x414   : > { %6396 = vmatmul.mubr.bf16.gmra.mrb[24].mxu0 %v6044_v48 }
 0x415   : > { %6403 = vmatprep.mubr.bf16.mxu0 %v6052_v52 }
 0x417   : > { %v11125_v39 = vpop.f32.mrb[200].mxu1  ;;  %v4869_v34 = vpop.f32.mrb[176].mxu0 }
 0x418   : > { %v11129_v1 = vpop.f32.mrb[201].mxu1  ;;  %v11132_v18 = vadd.f32 %v11062_v55, %v4869_v34  ;;  %v4871_v17 = vpop.f32.mrb[177].mxu0  ;;  %v5938_v55 = vsel %vm670_vm0, %v5935_v16, %v5937_v32  ;;  %v5862_v16 = vshll.u32 %v11113_v49, 16  ;;  %v5858_v34 = vshrl.u32 %v11095_v60, 16 }
 0x419   : > { %v11135_v7 = vpop.f32.mrb[202].mxu1  ;;  %v4872_v38 = vpop.f32.mrb[178].mxu0  ;;  %v6071_v27 = vrot.slane %v5938_v55, 2 }
 0x41a   : > { %v11139_v20 = vpop.f32.mrb[203].mxu1  ;;  %v11142_v30 = vadd.f32 %v11072_v4, %v4872_v38  ;;  %v4874_v31 = vpop.f32.mrb[179].mxu0  ;;  %7990 = vmatmul.mubr.bf16.gmra.mrb[48].mxu1 %v6060_v6  ;;  %v6058_v4 = vsel %vm2349_vm2, %v6051_v47, %v6057_v36  ;;  %v5864_v17 = vrot.slane %v5862_v16, 1  ;;  %v5860_v55 = vor.u32 %v5858_v34, %v5856_v53 }
 0x41b   : > { %7993 = vmatprep.mubr.bf16.mxu1 %v6066_v46  ;;  %v6072_v35 = vsel %vm2349_vm2, %v6065_v25, %v6071_v27  ;;  %v6078_v62 = vsel %vm2349_vm2, %v6071_v27, %v6077_v28  ;;  %v11176_v31 = vld [vmem:[#allocation2 + $0x98] sm:$0xff]   ;;  %v6056_v25 = vsel %vm2349_vm2, %v6049_v26, %v6055_v0  ;;  %v5944_v46 = vsel %vm670_vm0, %v5941_v14, %v5943_v42 }
 0x41c   : > { %6404 = vmatmul.mubr.bf16.gmra.mrb[28].mxu0 %v6050_v15  ;;  %v11180_v15 = vld [vmem:[#allocation2 + $0xa0] ss:$0 sps:$4 sm:$0x33]   ;;  %v5865_v21 = vsel %vm505_vm1, %v5860_v55, %v5864_v17  ;;  %v6089_v27 = vrot.slane %v5944_v46, 2  ;;  %v6061_v26 = vrot.slane %v11089_v44, 2 }
 0x41d   : > { %6411 = vmatprep.mubr.bf16.mxu0 %v6058_v4  ;;  %v5945_v4 = vrot.slane %v11176_v31, 1  ;;  %v5947_v53 = vrot.slane %v11180_v15, 1 }
 0x41f   : > { %v4877_v48 = vpop.f32.mrb[180].mxu0  ;;  %v11156_v23 = vpop.f32.mrb[204].mxu1  ;;  %v5946_v44 = vsel %vm670_vm0, %v5943_v42, %v5945_v4 }
 0x420   : > { %v11161_v24 = vadd.f32 %v11059_v10, %v4877_v48  ;;  %v4879_v47 = vpop.f32.mrb[181].mxu0  ;;  %v11163_v52 = vpop.f32.mrb[205].mxu1  ;;  %v5942_v10 = vsel %vm670_vm0, %v5939_v45, %v5941_v14  ;;  %v5870_v45 = vshll.u32 %v11117_v50, 16  ;;  %v6069_v48 = vrot.slane %v5865_v21, 2 }
 0x421   : > { %v4880_v19 = vpop.f32.mrb[182].mxu0  ;;  %v11166_v32 = vpop.f32.mrb[206].mxu1  ;;  %v6083_v63 = vrot.slane %v5942_v10, 2  ;;  %v6095_v55 = vrot.slane %v5946_v44, 2 }
 0x422   : > { %v11170_v38 = vadd.f32 %v11067_v22, %v4880_v19  ;;  %v4882_v43 = vpop.f32.mrb[183].mxu0  ;;  %v11172_v6 = vpop.f32.mrb[207].mxu1  ;;  %7994 = vmatmul.mubr.bf16.gmra.mrb[52].mxu1 %v6072_v35  ;;  %v6064_v22 = vsel %vm2349_vm2, %v6057_v36, %v6063_v13  ;;  %v5866_v19 = vshrl.u32 %v11113_v49, 16  ;;  %v5872_v35 = vrot.slane %v5870_v45, 1 }
 0x423   : > { %7997 = vmatprep.mubr.bf16.mxu1 %v6078_v62  ;;  %v6084_v47 = vsel %vm2349_vm2, %v6077_v28, %v6083_v63  ;;  %v6090_v10 = vsel %vm2349_vm2, %v6083_v63, %v6089_v27  ;;  %v6070_v28 = vsel %vm2349_vm2, %v6063_v13, %v6069_v48 }
 0x424   : > { %6412 = vmatmul.mubr.bf16.gmra.mrb[32].mxu0 %v6056_v25  ;;  %v5868_v62 = vor.u32 %v5866_v19, %v5864_v17  ;;  %v5948_v25 = vsel %vm670_vm0, %v5945_v4, %v5947_v53  ;;  %vm6777_vm0 = vcmask 1044480  }
 0x425   : > { %6419 = vmatprep.mubr.bf16.mxu0 %v6064_v22  ;;  %v5878_v22 = vshll.u32 %v11146_v29, 16  ;;  %v6101_v63 = vrot.slane %v5948_v25, 2 }
 0x427   : > { %v4885_v59 = vpop.f32.mrb[184].mxu0  ;;  %v5880_v19 = vrot.slane %v5878_v22, 1 }
 0x428   : > { %v11189_v16 = vadd.f32 %v11129_v1, %v4885_v59  ;;  %v4887_v14 = vpop.f32.mrb[185].mxu0  ;;  %v6062_v1 = vsel %vm2349_vm2, %v6055_v0, %v6061_v26  ;;  %v6067_v0 = vrot.slane %v11095_v60, 2  ;;  %v6102_v60 = vsel %vm2349_vm2, %v6095_v55, %v6101_v63 }
 0x429   : > { %v4888_v36 = vpop.f32.mrb[186].mxu0 }
 0x42a   : > { %v11194_v34 = vadd.f32 %v11139_v20, %v4888_v36  ;;  %v4890_v43 = vpop.f32.mrb[187].mxu0  ;;  %7998 = vmatmul.mubr.bf16.gmra.mrb[56].mxu1 %v6084_v47  ;;  %v5873_v20 = vsel %vm505_vm1, %v5868_v62, %v5872_v35  ;;  %v6096_v36 = vsel %vm2349_vm2, %v6089_v27, %v6095_v55  ;;  %v5874_v47 = vshrl.u32 %v11117_v50, 16 }
 0x42b   : > { %8001 = vmatprep.mubr.bf16.mxu1 %v6090_v10  ;;  %v6075_v4 = vrot.slane %v5873_v20, 2  ;;  %v6107_v62 = vrot.slane %v5947_v53, 2  ;;  %v6073_v55 = vrot.slane %v11113_v49, 2 }
 0x42c   : > { %6420 = vmatmul.mubr.bf16.gmra.mrb[36].mxu0 %v6062_v1  ;;  %v5876_v10 = vor.u32 %v5874_v47, %v5872_v35 }
 0x42d   : > { %6427 = vmatprep.mubr.bf16.mxu0 %v6070_v28  ;;  %v11201_v46 = vpop.f32.mrb[208].mxu1  ;;  %v6076_v1 = vsel %vm2349_vm2, %v6069_v48, %v6075_v4  ;;  %v6074_v49 = vsel %vm2349_vm2, %v6067_v0, %v6073_v55 }
 0x42e   : > { %v11205_v42 = vpop.f32.mrb[209].mxu1  ;;  %v5881_v25 = vsel %vm505_vm1, %v5876_v10, %v5880_v19 }
 0x42f   : > { %v4893_v21 = vpop.f32.mrb[188].mxu0  ;;  %v11208_v17 = vpop.f32.mrb[210].mxu1  ;;  %v6081_v48 = vrot.slane %v5881_v25, 2 }
 0x430   : > { %v11211_v45 = vadd.f32 %v11125_v39, %v4893_v21  ;;  %v4895_v13 = vpop.f32.mrb[189].mxu0  ;;  %v11213_v59 = vpop.f32.mrb[211].mxu1  ;;  %v6068_v39 = vsel %vm2349_vm2, %v6061_v26, %v6067_v0  ;;  %v5894_v0 = vshll.u32 %v11176_v31, 16 }
 0x431   : > { %v4896_v14 = vpop.f32.mrb[190].mxu0  ;;  %v6108_v13 = vsel %vm2349_vm2, %v6101_v63, %v6107_v62 }
 0x432   : > { %v11218_v43 = vadd.f32 %v11135_v7, %v4896_v14  ;;  %v4898_v44 = vpop.f32.mrb[191].mxu0  ;;  %8002 = vmatmul.mubr.bf16.gmra.mrb[60].mxu1 %v6096_v36  ;;  %v5886_v7 = vshll.u32 %v11150_v9, 16  ;;  %v5882_v14 = vshrl.u32 %v11146_v29, 16 }
 0x433   : > { %8005 = vmatprep.mubr.bf16.mxu1 %v6102_v60 }
 0x434   : > { %6428 = vmatmul.mubr.bf16.gmra.mrb[40].mxu0 %v6068_v39  ;;  %v5888_v36 = vrot.slane %v5886_v7, 1  ;;  %v5884_v60 = vor.u32 %v5882_v14, %v5880_v19  ;;  %v5890_v7 = vshrl.u32 %v11150_v9, 16 }
 0x435   : > { %6435 = vmatprep.mubr.bf16.mxu0 %v6076_v1  ;;  %v11223_v27 = vpop.f32.mrb[212].mxu1 }
 0x436   : > { %v11227_v28 = vpop.f32.mrb[213].mxu1  ;;  %v5889_v10 = vsel %vm505_vm1, %v5884_v60, %v5888_v36 }
 0x437   : > { %v4901_v20 = vpop.f32.mrb[192].mxu0  ;;  %v11230_v22 = vpop.f32.mrb[214].mxu1 }
 0x438   : > { %v11233_v26 = vadd.f32 %v11163_v52, %v4901_v20  ;;  %v4903_v35 = vpop.f32.mrb[193].mxu0  ;;  %v11235_v21 = vpop.f32.mrb[215].mxu1  ;;  %v6082_v52 = vsel %vm2349_vm2, %v6075_v4, %v6081_v48  ;;  %v6087_v20 = vrot.slane %v5889_v10, 2 }
 0x439   : > { %v4904_v53 = vpop.f32.mrb[194].mxu0 }
 0x43a   : > { %v11240_v47 = vadd.f32 %v11172_v6, %v4904_v53  ;;  %v4906_v44 = vpop.f32.mrb[195].mxu0  ;;  %8006 = vmatmul.mubr.bf16.gmra.mrb[64].mxu1 %v6108_v13  ;;  %v6079_v6 = vrot.slane %v11117_v50, 2  ;;  %v5892_v13 = vor.u32 %v5890_v7, %v5888_v36  ;;  %v6088_v60 = vsel %vm2349_vm2, %v6081_v48, %v6087_v20 }
 0x43c   : > { %6436 = vmatmul.mubr.bf16.gmra.mrb[44].mxu0 %v6074_v49  ;;  %v6080_v44 = vsel %vm2349_vm2, %v6073_v55, %v6079_v6  ;;  %v5896_v49 = vrot.slane %v5894_v0, 1  ;;  %v5898_v55 = vshrl.u32 %v11176_v31, 16 }
 0x43d   : > { %6443 = vmatprep.mubr.bf16.mxu0 %v6082_v52  ;;  %v5303_v39 = vpop.f32.mrb[216].mxu1 }
 0x43e   : > { %v11246_v63 = vadd.f32 %v5303_v39, %v10939_v11  ;;  %v5305_v1 = vpop.f32.mrb[217].mxu1  ;;  %v5897_v52 = vsel %vm505_vm1, %v5892_v13, %v5896_v49 }
 0x43f   : > { %v4909_v62 = vpop.f32.mrb[196].mxu0  ;;  %v5306_v25 = vpop.f32.mrb[218].mxu1 }
 0x440   : > { %v11252_v19 = vadd.f32 %v11156_v23, %v4909_v62  ;;  %v4911_v4 = vpop.f32.mrb[197].mxu0  ;;  %v11255_v35 = vadd.f32 %v5306_v25, %v10945_v37  ;;  %v5308_v53 = vpop.f32.mrb[219].mxu1  ;;  %v5902_v37 = vshll.u32 %v11180_v15, 16  ;;  %v6093_v25 = vrot.slane %v5897_v52, 2 }
 0x441   : > { %v4912_v11 = vpop.f32.mrb[198].mxu0  ;;  %v5900_v53 = vor.u32 %v5898_v55, %v5896_v49  ;;  %v6091_v49 = vrot.slane %v11150_v9, 2 }
 0x442   : > { %v11258_v14 = vadd.f32 %v11166_v32, %v4912_v11  ;;  %v4914_v50 = vpop.f32.mrb[199].mxu0  ;;  %v6085_v32 = vrot.slane %v11146_v29, 2 }
 0x443   : > { %v6094_v50 = vsel %vm2349_vm2, %v6087_v20, %v6093_v25 }
 0x444   : > { %6444 = vmatmul.mubr.bf16.gmra.mrb[48].mxu0 %v6080_v44  ;;  %v6086_v29 = vsel %vm2349_vm2, %v6079_v6, %v6085_v32 }
 0x445   : > { %6451 = vmatprep.mubr.bf16.mxu0 %v6088_v60  ;;  %v5311_v23 = vpop.f32.mrb[220].mxu1 }
 0x446   : > { %v11265_v39 = vadd.f32 %v5311_v23, %v10956_v3  ;;  %v5313_v36 = vpop.f32.mrb[221].mxu1  ;;  %v5904_v3 = vrot.slane %v5902_v37, 1 }
 0x447   : > { %v4917_v10 = vpop.f32.mrb[200].mxu0  ;;  %v5314_v1 = vpop.f32.mrb[222].mxu1 }
 0x448   : > { %v11270_v62 = vadd.f32 %v11205_v42, %v4917_v10  ;;  %v4919_v48 = vpop.f32.mrb[201].mxu0  ;;  %v11273_v7 = vadd.f32 %v5314_v1, %v10962_v58  ;;  %v5316_v0 = vpop.f32.mrb[223].mxu1  ;;  %v5905_v44 = vsel %vm505_vm1, %v5900_v53, %v5904_v3  ;;  %v5906_v10 = vshrl.u32 %v11180_v15, 16 }
 0x449   : > { %v4920_v4 = vpop.f32.mrb[202].mxu0  ;;  %v6099_v6 = vrot.slane %v5905_v44, 2  ;;  %v6092_v48 = vsel %vm2349_vm2, %v6085_v32, %v6091_v49 }
 0x44a   : > { %v11276_v11 = vadd.f32 %v11213_v59, %v4920_v4  ;;  %v4922_v13 = vpop.f32.mrb[203].mxu0 }
 0x44b   : > { %v6100_v9 = vsel %vm2349_vm2, %v6093_v25, %v6099_v6  ;;  %v6097_v13 = vrot.slane %v11176_v31, 2 }
 0x44c   : > { %6452 = vmatmul.mubr.bf16.gmra.mrb[52].mxu0 %v6086_v29 }
 0x44d   : > { %6459 = vmatprep.mubr.bf16.mxu0 %v6094_v50  ;;  %v5319_v42 = vpop.f32.mrb[224].mxu1 }
 0x44e   : > { %v11282_v58 = vadd.f32 %v5319_v42, %v10976_v2  ;;  %v5321_v60 = vpop.f32.mrb[225].mxu1 }
 0x44f   : > { %v4925_v23 = vpop.f32.mrb[204].mxu0  ;;  %v5322_v52 = vpop.f32.mrb[226].mxu1  ;;  %v8353_v60 = vld [vmem:[#allocation2 + $0xa0] ss:$0 sps:$4 sm:$0x11]  }
 0x450   : > { %v11286_v59 = vadd.f32 %v11201_v46, %v4925_v23  ;;  %v4927_v37 = vpop.f32.mrb[205].mxu0  ;;  %v11289_v36 = vadd.f32 %v5322_v52, %v10984_v54  ;;  %v5324_v20 = vpop.f32.mrb[227].mxu1  ;;  %v5908_v46 = vor.u32 %v5906_v10, %v5904_v3 }
 0x451   : > { %v4928_v1 = vpop.f32.mrb[206].mxu0  ;;  %v6103_v20 = vrot.slane %v8353_v60, 2 }
 0x452   : > { %v11293_v2 = vadd.f32 %v11208_v17, %v4928_v1  ;;  %v4930_v55 = vpop.f32.mrb[207].mxu0  ;;  %v6105_v50 = vrot.slane %v5908_v46, 2 }
 0x454   : > { %6460 = vmatmul.mubr.bf16.gmra.mrb[56].mxu0 %v6092_v48  ;;  %v6106_v31 = vsel %vm2349_vm2, %v6099_v6, %v6105_v50 }
 0x455   : > { %6467 = vmatprep.mubr.bf16.mxu0 %v6100_v9  ;;  %v5327_v0 = vpop.f32.mrb[228].mxu1  ;;  %v6104_v9 = vsel %vm2349_vm2, %v6097_v13, %v6103_v20 }
 0x456   : > { %v5328_v4 = vadd.f32 %v5327_v0, %v10995_v51  ;;  %v5329_v54 = vpop.f32.mrb[229].mxu1  ;;  %v6098_v51 = vsel %vm2349_vm2, %v6091_v49, %v6097_v13 }
 0x457   : > { %v4933_v53 = vpop.f32.mrb[208].mxu0  ;;  %v5330_v15 = vpop.f32.mrb[230].mxu1 }
 0x458   : > { %v11300_v29 = vadd.f32 %v11227_v28, %v4933_v53  ;;  %v4935_v17 = vpop.f32.mrb[209].mxu0  ;;  %v5331_v32 = vadd.f32 %v5330_v15, %v11003_v41  ;;  %v5332_v42 = vpop.f32.mrb[231].mxu1 }
 0x459   : > { %v4936_v44 = vpop.f32.mrb[210].mxu0 }
 0x45a   : > { %v11304_v25 = vadd.f32 %v11235_v21, %v4936_v44  ;;  %v4938_v3 = vpop.f32.mrb[211].mxu0 }
 0x45c   : > { %6468 = vmatmul.mubr.bf16.gmra.mrb[60].mxu0 %v6098_v51 }
 0x45d   : > { %6475 = vmatprep.mubr.bf16.mxu0 %v6106_v31  ;;  %v5335_v23 = vpop.f32.mrb[232].mxu1 }
 0x45e   : > { %v5336_v28 = vadd.f32 %v5335_v23, %v11024_v12  ;;  %v5337_v52 = vpop.f32.mrb[233].mxu1 }
 0x45f   : > { %v4941_v37 = vpop.f32.mrb[212].mxu0  ;;  %v5338_v41 = vpop.f32.mrb[234].mxu1 }
 0x460   : > { %v11310_v10 = vadd.f32 %v11223_v27, %v4941_v37  ;;  %v4943_v21 = vpop.f32.mrb[213].mxu0  ;;  %v5339_v1 = vadd.f32 %v5338_v41, %v11032_v5  ;;  %v5340_v55 = vpop.f32.mrb[235].mxu1 }
 0x461   : > { %v4944_v49 = vpop.f32.mrb[214].mxu0 }
 0x462   : > { %v11314_v48 = vadd.f32 %v11230_v22, %v4944_v49  ;;  %v4946_v6 = vpop.f32.mrb[215].mxu0 }
 0x464   : > { %6476 = vmatmul.mubr.bf16.gmra.mrb[64].mxu0 %v6104_v9 }
 0x465   : > { %v5343_v12 = vpop.f32.mrb[236].mxu1 }
 0x466   : > { %v5344_v46 = vadd.f32 %v5343_v12, %v11049_v8  ;;  %v5345_v0 = vpop.f32.mrb[237].mxu1 }
 0x467   : > { %v7923_v54 = vpop.f32.mrb[216].mxu0  ;;  %v5346_v53 = vpop.f32.mrb[238].mxu1 }
 0x468   : > { %v11319_v27 = vadd.f32 %v7923_v54, %v11265_v39  ;;  %v5480_v15 = vpop.f32.mrb[217].mxu0  ;;  %v5347_v5 = vadd.f32 %v5346_v53, %v11054_v57  ;;  %v5348_v17 = vpop.f32.mrb[239].mxu1 }
 0x469   : > { %v11323_v22 = vadd.f32 %v5480_v15, %v11246_v63  ;;  %v7924_v50 = vpop.f32.mrb[218].mxu0 }
 0x46a   : > { %v11326_v13 = vadd.f32 %v7924_v50, %v11273_v7  ;;  %v5483_v42 = vpop.f32.mrb[219].mxu0 }
 0x46b   : > { %v11329_v8 = vadd.f32 %v5483_v42, %v11255_v35 }
 0x46d   : > { %v5351_v44 = vpop.f32.mrb[240].mxu1 }
 0x46e   : > { %v5352_v3 = vadd.f32 %v5351_v44, %v11077_v40  ;;  %v5353_v39 = vpop.f32.mrb[241].mxu1 }
 0x46f   : > { %v7927_v51 = vpop.f32.mrb[220].mxu0  ;;  %v5354_v60 = vpop.f32.mrb[242].mxu1 }
 0x470   : > { %v11332_v31 = vadd.f32 %v7927_v51, %v5328_v4  ;;  %v5496_v57 = vpop.f32.mrb[221].mxu0  ;;  %v5355_v63 = vadd.f32 %v5354_v60, %v11082_v61  ;;  %v5356_v23 = vpop.f32.mrb[243].mxu1 }
 0x471   : > { %v11336_v52 = vadd.f32 %v5496_v57, %v11282_v58  ;;  %v7928_v7 = vpop.f32.mrb[222].mxu0 }
 0x472   : > { %v11338_v37 = vadd.f32 %v7928_v7, %v5331_v32  ;;  %v5499_v35 = vpop.f32.mrb[223].mxu0 }
 0x473   : > { %v11341_v20 = vadd.f32 %v5499_v35, %v11289_v36 }
 0x475   : > { %v5359_v40 = vpop.f32.mrb[244].mxu1 }
 0x476   : > { %v5360_v41 = vadd.f32 %v5359_v40, %v11099_v33  ;;  %v5361_v21 = vpop.f32.mrb[245].mxu1 }
 0x477   : > { %v7931_v4 = vpop.f32.mrb[224].mxu0  ;;  %v5362_v55 = vpop.f32.mrb[246].mxu1 }
 0x478   : > { %v11344_v49 = vadd.f32 %v7931_v4, %v5344_v46  ;;  %v5512_v61 = vpop.f32.mrb[225].mxu0  ;;  %v5363_v6 = vadd.f32 %v5362_v55, %v11105_v56  ;;  %v5364_v58 = vpop.f32.mrb[247].mxu1 }
 0x479   : > { %v11347_v9 = vadd.f32 %v5512_v61, %v5336_v28  ;;  %v7932_v32 = vpop.f32.mrb[226].mxu0 }
 0x47a   : > { %v11349_v12 = vadd.f32 %v7932_v32, %v5347_v5  ;;  %v5515_v0 = vpop.f32.mrb[227].mxu0 }
 0x47b   : > { %v11351_v36 = vadd.f32 %v5515_v0, %v5339_v1 }
 0x47d   : > { %v5367_v54 = vpop.f32.mrb[248].mxu1 }
 0x47e   : > { %v5368_v33 = vadd.f32 %v5367_v54, %v11132_v18  ;;  %v5369_v53 = vpop.f32.mrb[249].mxu1 }
 0x47f   : > { %v7935_v15 = vpop.f32.mrb[228].mxu0  ;;  %v5370_v17 = vpop.f32.mrb[250].mxu1 }
 0x480   : > { %v11354_v46 = vadd.f32 %v7935_v15, %v5360_v41  ;;  %v5528_v50 = vpop.f32.mrb[229].mxu0  ;;  %v5371_v56 = vadd.f32 %v5370_v17, %v11142_v30  ;;  %v5372_v42 = vpop.f32.mrb[251].mxu1 }
 0x481   : > { %v11357_v28 = vadd.f32 %v5528_v50, %v5352_v3  ;;  %v7936_v44 = vpop.f32.mrb[230].mxu0 }
 0x482   : > { %v11359_v5 = vadd.f32 %v7936_v44, %v5363_v6  ;;  %v5531_v39 = vpop.f32.mrb[231].mxu0 }
 0x483   : > { %v11361_v1 = vadd.f32 %v5531_v39, %v5355_v63 }
 0x485   : > { %v5375_v51 = vpop.f32.mrb[252].mxu1 }
 0x486   : > { %v5376_v18 = vadd.f32 %v5375_v51, %v11161_v24  ;;  %v5377_v60 = vpop.f32.mrb[253].mxu1 }
 0x487   : > { %v7939_v57 = vpop.f32.mrb[232].mxu0  ;;  %v5378_v23 = vpop.f32.mrb[254].mxu1 }
 0x488   : > { %v5544_v7 = vpop.f32.mrb[233].mxu0  ;;  %v11364_v35 = vadd.f32 %v7939_v57, %v5376_v18  ;;  %v5379_v30 = vadd.f32 %v5378_v23, %v11170_v38  ;;  %v5380_v40 = vpop.f32.mrb[255].mxu1 }
 0x489   : > { %v11367_v3 = vadd.f32 %v5544_v7, %v5368_v33  ;;  %v7940_v41 = vpop.f32.mrb[234].mxu0 }
 0x48a   : > { %v5547_v21 = vpop.f32.mrb[235].mxu0  ;;  %v11369_v4 = vadd.f32 %v7940_v41, %v5379_v30 }
 0x48b   : > { %v11371_v63 = vadd.f32 %v5547_v21, %v5371_v56 }
 0x48d   : > { %v5383_v55 = vpop.f32.mrb[0].mxu1 }
 0x48e   : > { %v5384_v24 = vadd.f32 %v5383_v55, %v11189_v16  ;;  %v5385_v61 = vpop.f32.mrb[1].mxu1 }
 0x48f   : > { %v7943_v6 = vpop.f32.mrb[236].mxu0  ;;  %v5386_v58 = vpop.f32.mrb[2].mxu1 }
 0x490   : > { %v5560_v32 = vpop.f32.mrb[237].mxu0  ;;  %v5387_v0 = vadd.f32 %v5386_v58, %v11194_v34  ;;  %v5388_v54 = vpop.f32.mrb[3].mxu1 }
 0x491   : > { %v7944_v38 = vpop.f32.mrb[238].mxu0  ;;  %v11375_v53 = vadd.f32 %v5560_v32, %v5384_v24 }
 0x492   : > { %v5563_v33 = vpop.f32.mrb[239].mxu0 }
 0x493   : > { %v11377_v15 = vadd.f32 %v5563_v33, %v5387_v0 }
 0x495   : > { %v5391_v17 = vpop.f32.mrb[4].mxu1 }
 0x496   : > { %v5392_v50 = vadd.f32 %v5391_v17, %v11211_v45  ;;  %v5393_v56 = vpop.f32.mrb[5].mxu1 }
 0x497   : > { %v7947_v42 = vpop.f32.mrb[240].mxu0  ;;  %v5394_v44 = vpop.f32.mrb[6].mxu1 }
 0x498   : > { %v5576_v16 = vpop.f32.mrb[241].mxu0  ;;  %v11380_v39 = vadd.f32 %v7943_v6, %v5392_v50  ;;  %v5395_v51 = vadd.f32 %v5394_v44, %v11218_v43  ;;  %v5396_v18 = vpop.f32.mrb[7].mxu1 }
 0x499   : > { %v7948_v34 = vpop.f32.mrb[242].mxu0 }
 0x49a   : > { %v5579_v60 = vpop.f32.mrb[243].mxu0  ;;  %v11383_v57 = vadd.f32 %v7944_v38, %v5395_v51 }
 0x49d   : > { %v5399_v23 = vpop.f32.mrb[8].mxu1 }
 0x49e   : > { %v5400_v7 = vadd.f32 %v5399_v23, %v11233_v26  ;;  %v5401_v30 = vpop.f32.mrb[9].mxu1 }
 0x49f   : > { %v7951_v40 = vpop.f32.mrb[244].mxu0  ;;  %v5402_v41 = vpop.f32.mrb[10].mxu1 }
 0x4a0   : > { %v5592_v45 = vpop.f32.mrb[245].mxu0  ;;  %v11386_v21 = vadd.f32 %v5576_v16, %v5400_v7  ;;  %v5403_v55 = vadd.f32 %v5402_v41, %v11240_v47  ;;  %v5404_v24 = vpop.f32.mrb[11].mxu1 }
 0x4a1   : > { %v7952_v61 = vpop.f32.mrb[246].mxu0 }
 0x4a2   : > { %v5595_v6 = vpop.f32.mrb[247].mxu0  ;;  %v11389_v43 = vadd.f32 %v5579_v60, %v5403_v55 }
 0x4a5   : > { %v5407_v58 = vpop.f32.mrb[12].mxu1 }
 0x4a6   : > { %v5408_v32 = vadd.f32 %v5407_v58, %v11252_v19  ;;  %v5409_v0 = vpop.f32.mrb[13].mxu1 }
 0x4a7   : > { %v7955_v54 = vpop.f32.mrb[248].mxu0  ;;  %v5410_v38 = vpop.f32.mrb[14].mxu1 }
 0x4a8   : > { %v5608_v26 = vpop.f32.mrb[249].mxu0  ;;  %v11392_v33 = vadd.f32 %v7947_v42, %v5408_v32  ;;  %v5411_v17 = vadd.f32 %v5410_v38, %v11258_v14  ;;  %v5412_v50 = vpop.f32.mrb[15].mxu1 }
 0x4a9   : > { %v7956_v56 = vpop.f32.mrb[250].mxu0 }
 0x4aa   : > { %v5611_v44 = vpop.f32.mrb[251].mxu0  ;;  %v11395_v47 = vadd.f32 %v7948_v34, %v5411_v17 }
 0x4ad   : > { %v5415_v16 = vpop.f32.mrb[16].mxu1 }
 0x4ae   : > { %v5416_v51 = vadd.f32 %v5415_v16, %v11270_v62  ;;  %v5417_v18 = vpop.f32.mrb[17].mxu1 }
 0x4af   : > { %v11398_v60 = vpop.f32.mrb[252].mxu0  ;;  %v5418_v19 = vpop.f32.mrb[18].mxu1 }
 0x4b0   : > { %v6343_v23 = vpop.f32.mrb[253].mxu0  ;;  %v11400_v7 = vadd.f32 %v5592_v45, %v5416_v51  ;;  %v5419_v42 = vadd.f32 %v5418_v19, %v11276_v11  ;;  %v5420_v30 = vpop.f32.mrb[19].mxu1 }
 0x4b1   : > { %v11403_v41 = vpop.f32.mrb[254].mxu0 }
 0x4b2   : > { %v6346_v14 = vpop.f32.mrb[255].mxu0  ;;  %v11405_v55 = vadd.f32 %v5595_v6, %v5419_v42 }
 0x4b5   : > { %v5423_v34 = vpop.f32.mrb[20].mxu1 }
 0x4b6   : > { %v5424_v24 = vadd.f32 %v5423_v34, %v11286_v59  ;;  %v5425_v58 = vpop.f32.mrb[21].mxu1 }
 0x4b7   : > { %v6349_v62 = vpop.f32.mrb[0].mxu0  ;;  %v5426_v32 = vpop.f32.mrb[22].mxu1 }
 0x4b8   : > { %v6351_v0 = vpop.f32.mrb[1].mxu0  ;;  %v11408_v38 = vadd.f32 %v7951_v40, %v5424_v24  ;;  %v5427_v45 = vadd.f32 %v5426_v32, %v11293_v2  ;;  %v5428_v17 = vpop.f32.mrb[23].mxu1 }
 0x4b9   : > { %v6352_v50 = vpop.f32.mrb[2].mxu0 }
 0x4ba   : > { %v6354_v11 = vpop.f32.mrb[3].mxu0  ;;  %v11411_v16 = vadd.f32 %v7952_v61, %v5427_v45  ;;  %v3934_v45 = vld [vmem:[%s8921_s8 + $0xc] sm:$0xf] }
 0x4bc   : > { %11812 = vst [vmem:[#allocation23_spill] sm:$0xff] %v11411_v16 }
 0x4bd   : > { %v5431_v51 = vpop.f32.mrb[24].mxu1 }
 0x4be   : > { %v5432_v6 = vadd.f32 %v5431_v51, %v11300_v29  ;;  %v5433_v18 = vpop.f32.mrb[25].mxu1  ;;  %v7524_v29 = vld [vmem:[%s8921_s8 + $0x10] sm:$0xff]  }
 0x4bf   : > { %v11414_v59 = vpop.f32.mrb[4].mxu0  ;;  %v5434_v19 = vpop.f32.mrb[26].mxu1  ;;  %v7525_v18 = vld [vmem:[%s8921_s8 + $0x18] sm:$0xff]  }
 0x4c0   : > { %v6359_v23 = vpop.f32.mrb[5].mxu0  ;;  %v11416_v40 = vadd.f32 %v5608_v26, %v5432_v6  ;;  %v5435_v2 = vadd.f32 %v5434_v19, %v11304_v25  ;;  %v5436_v42 = vpop.f32.mrb[27].mxu1  ;;  %v3933_v26 = vld [vmem:[%s8921_s8 + $0x8] sm:$0xe]  ;;  %v7458_v6 = vunpack.c.l.bf16 %v7524_v29 }
 0x4c1   : > { %v11419_v30 = vpop.f32.mrb[6].mxu0  ;;  %v7526_v23 = vld [vmem:[%s8921_s8 + $0x20] sm:$0xff]   ;;  %v3970_v42 = vunpack.c.l.bf16 %v3933_v26 }
 0x4c2   : > { %11813 = vst [vmem:[#allocation24_spill] sm:$0xff] %v11416_v40  ;;  %v6362_v14 = vpop.f32.mrb[7].mxu0  ;;  %v11421_v61 = vadd.f32 %v5611_v44, %v5435_v2  ;;  %v7459_v44 = vunpack.c.h.bf16 %v7524_v29 }
 0x4c3   : > { %v3971_v14 = vunpack.c.l.bf16 %v3934_v45  ;;  %v6778_v29 = vrot.slane %v3970_v42, 3 }
 0x4c4   : > { %11814 = vst [vmem:[#allocation27_spill] sm:$0xff] %v11421_v61 }
 0x4c5   : > { %v5439_v34 = vpop.f32.mrb[28].mxu1 }
 0x4c6   : > { %v5440_v24 = vadd.f32 %v5439_v34, %v11310_v10  ;;  %v5441_v58 = vpop.f32.mrb[29].mxu1  ;;  %v7462_v34 = vunpack.c.l.bf16 %v7525_v18 }
 0x4c7   : > { %v11425_v32 = vpop.f32.mrb[8].mxu0  ;;  %v5442_v0 = vpop.f32.mrb[30].mxu1  ;;  %v6781_v58 = vrot.slane %v7458_v6, 3 }
 0x4c8   : > { %v6367_v17 = vpop.f32.mrb[9].mxu0  ;;  %v11429_v25 = vadd.f32 %v7955_v54, %v5440_v24  ;;  %v5443_v11 = vadd.f32 %v5442_v0, %v11314_v48  ;;  %v5444_v51 = vpop.f32.mrb[31].mxu1  ;;  %v7466_v54 = vunpack.c.l.bf16 %v7526_v23  ;;  %v7467_v48 = vunpack.c.h.bf16 %v7526_v23 }
 0x4c9   : > { %v11433_v19 = vpop.f32.mrb[10].mxu0  ;;  %v6783_v17 = vrot.slane %v7459_v44, 3  ;;  %v6785_v45 = vrot.slane %v7462_v34, 3  ;;  %v7463_v34 = vunpack.c.h.bf16 %v7525_v18 }
 0x4ca   : > { %11815 = vst [vmem:[#allocation22_spill] sm:$0xff] %v11429_v25  ;;  %v6370_v2 = vpop.f32.mrb[11].mxu0  ;;  %v11436_v10 = vadd.f32 %v7956_v56, %v5443_v11  ;;  %v6779_v25 = vrot.slane %v3971_v14, 3  ;;  %v11444_v11 = vld [vmem:[%s8921_s8 + $0x28] sm:$0xff]  }
 0x4cb   : > { %v11440_v2 = vld [vmem:[#allocation12] ss:$0 sm:$0xff]  ;;  %v6784_v23 = vsel %vm6777_vm0, %v6781_v58, %v6783_v17 }
 0x4cc   : > { %11816 = vst [vmem:[#allocation26_spill] sm:$0xff] %v11436_v10  ;;  %v6789_v10 = vrot.slane %v7466_v54, 3  ;;  %v6782_v18 = vsel %vm6777_vm0, %v6779_v25, %v6781_v58 }
 0x4cd   : > { %v7975_v24 = vpop.f32.mrb[32].mxu1 }
 0x4ce   : > { %v6527_v0 = vadd.f32 %v7975_v24, %v6349_v62  ;;  %v6518_v51 = vpop.f32.mrb[33].mxu1 }
 0x4cf   : > { %v11438_v61 = vpop.f32.mrb[12].mxu0  ;;  %v6519_v56 = vadd.f32 %v6518_v51, %v11398_v60  ;;  %v7976_v26 = vpop.f32.mrb[34].mxu1  ;;  %v6791_v51 = vrot.slane %v7467_v48, 3 }
 0x4d0   : > { %v6375_v6 = vpop.f32.mrb[13].mxu0  ;;  %v6663_v44 = vadd.f32 %v6527_v0, %v11319_v27  ;;  %v6530_v62 = vadd.f32 %v7976_v26, %v6352_v50  ;;  %v6521_v24 = vpop.f32.mrb[35].mxu1  ;;  %v6780_v27 = vsel %vm6777_vm0, %v6778_v29, %v6779_v25  ;;  %v7470_v50 = vunpack.c.l.bf16 %v11444_v11 }
 0x4d1   : > { %v11448_v42 = vpop.f32.mrb[14].mxu0  ;;  %v6661_v14 = vadd.f32 %v6519_v56, %v11323_v22  ;;  %v6522_v60 = vadd.f32 %v6521_v24, %v11403_v41  ;;  %v6786_v26 = vsel %vm6777_vm0, %v6783_v17, %v6785_v45 }
 0x4d2   : > { %v6378_v40 = vpop.f32.mrb[15].mxu0  ;;  %v6706_v6 = vadd.f32 %v11440_v2, %v6663_v44  ;;  %v6664_v0 = vadd.f32 %v6530_v62, %v11326_v13  ;;  %v6792_v13 = vsel %vm6777_vm0, %v6789_v10, %v6791_v51  ;;  %v6787_v44 = vrot.slane %v7463_v34, 3 }
 0x4d3   : > { %v6704_v54 = vadd.f32 %v11440_v2, %v6661_v14  ;;  %v6662_v16 = vadd.f32 %v6522_v60, %v11329_v8  ;;  %v7528_v40 = vld [vmem:[%s8921_s8 + $0x30] sm:$0xff]   ;;  %v11466_v8 = vrot.slane %v7470_v50, 3 }
 0x4d4   : > { %v6889_v22 = vadd.f32 %v6784_v23, %v6706_v6  ;;  %v6707_v41 = vadd.f32 %v11440_v2, %v6664_v0 }
 0x4d5   : > { %v6887_v48 = vadd.f32 %v6780_v27, %v6704_v54  ;;  %v6705_v29 = vadd.f32 %v11440_v2, %v6662_v16  ;;  %v7979_v56 = vpop.f32.mrb[36].mxu1  ;;  %v7474_v27 = vunpack.c.l.bf16 %v7528_v40  ;;  %v7475_v54 = vunpack.c.h.bf16 %v7528_v40 }
 0x4d6   : > { %v6925_v62 = vmax.f32 %v6889_v22, 0.0  ;;  %v6890_v24 = vadd.f32 %v6786_v26, %v6707_v41  ;;  %v6543_v17 = vadd.f32 %v7979_v56, %v11425_v32  ;;  %v6534_v14 = vpop.f32.mrb[37].mxu1  ;;  %v11477_v26 = vld [vmem:[%s8921_s8 + $0x38] sm:$0xff]   ;;  %v6790_v40 = vsel %vm6777_vm0, %v6787_v44, %v6789_v10 }
 0x4d7   : > { %v6923_v23 = vmax.f32 %v6887_v48, 0.0  ;;  %v6381_v60 = vpop.f32.mrb[16].mxu0  ;;  %v6888_v25 = vadd.f32 %v6782_v18, %v6705_v29  ;;  %v6535_v58 = vadd.f32 %v6534_v14, %v11414_v59  ;;  %v7980_v6 = vpop.f32.mrb[38].mxu1  ;;  %v7471_v48 = vunpack.c.h.bf16 %v11444_v11 }
 0x4d8   : > { %6961 = vst [vmem:[%s11471_s30 + $0x10] sm:$0xff] %v6925_v62  ;;  %v6926_v16 = vmax.f32 %v6890_v24, 0.0  ;;  %v6383_v32 = vpop.f32.mrb[17].mxu0  ;;  %v6667_v34 = vadd.f32 %v6543_v17, %v11332_v31  ;;  %v6546_v0 = vadd.f32 %v7980_v6, %v11433_v19  ;;  %v6537_v50 = vpop.f32.mrb[39].mxu1  ;;  %v6788_v19 = vsel %vm6777_vm0, %v6785_v45, %v6787_v44 }
 0x4d9   : > { %6959 = vst [vmem:[%s11471_s30] sm:$0xff] %v6923_v23  ;;  %v6924_v59 = vmax.f32 %v6888_v25, 0.0  ;;  %v6384_v22 = vpop.f32.mrb[18].mxu0  ;;  %v6665_v41 = vadd.f32 %v6535_v58, %v11336_v52  ;;  %v6538_v18 = vadd.f32 %v6537_v50, %v11419_v30  ;;  %v6794_v52 = vsel %vm6777_vm0, %v6791_v51, %v11466_v8 }
 0x4da   : > { %6962 = vst [vmem:[%s11471_s30 + $0x18] sm:$0xff] %v6926_v16  ;;  %v6386_v29 = vpop.f32.mrb[19].mxu0  ;;  %v6710_v31 = vadd.f32 %v11440_v2, %v6667_v34  ;;  %v6668_v56 = vadd.f32 %v6546_v0, %v11338_v37  ;;  %v7478_v11 = vunpack.c.l.bf16 %v11477_v26  ;;  %v6797_v14 = vrot.slane %v7474_v27, 3  ;;  %v7530_v0 = vld [vmem:[%s8921_s8 + $0x40] sm:$0xff]  }
 0x4db   : > { %6960 = vst [vmem:[%s11471_s30 + $0x8] sm:$0xff] %v6924_v59  ;;  %v6708_v62 = vadd.f32 %v11440_v2, %v6665_v41  ;;  %v6666_v30 = vadd.f32 %v6538_v18, %v11341_v20  ;;  %v6799_v45 = vrot.slane %v7475_v54, 3  ;;  %v6795_v23 = vrot.slane %v7471_v48, 3 }
 0x4dc   : > { %v6893_v24 = vadd.f32 %v6792_v13, %v6710_v31  ;;  %v6711_v17 = vadd.f32 %v11440_v2, %v6668_v56  ;;  %v6801_v27 = vrot.slane %v7478_v11, 3 }
 0x4dd   : > { %v6891_v37 = vadd.f32 %v6788_v19, %v6708_v62  ;;  %v6709_v10 = vadd.f32 %v11440_v2, %v6666_v30  ;;  %v7983_v44 = vpop.f32.mrb[40].mxu1  ;;  %v6800_v41 = vsel %vm6777_vm0, %v6797_v14, %v6799_v45  ;;  %v6796_v31 = vsel %vm6777_vm0, %v11466_v8, %v6795_v23 }
 0x4de   : > { %v6929_v25 = vmax.f32 %v6893_v24, 0.0  ;;  %v6894_v58 = vadd.f32 %v6794_v52, %v6711_v17  ;;  %v6559_v6 = vadd.f32 %v7983_v44, %v6381_v60  ;;  %v6550_v51 = vpop.f32.mrb[41].mxu1  ;;  %v7482_v62 = vunpack.c.l.bf16 %v7530_v0  ;;  %v7531_v52 = vld [vmem:[%s8921_s8 + $0x48] sm:$0xff]  }
 0x4df   : > { %v6927_v20 = vmax.f32 %v6891_v37, 0.0  ;;  %v6389_v16 = vpop.f32.mrb[20].mxu0  ;;  %v6892_v32 = vadd.f32 %v6790_v40, %v6709_v10  ;;  %v6551_v13 = vadd.f32 %v6550_v51, %v11438_v61  ;;  %v7984_v34 = vpop.f32.mrb[42].mxu1  ;;  %v7483_v8 = vunpack.c.h.bf16 %v7530_v0 }
 0x4e0   : > { %6965 = vst [vmem:[%s11471_s30 + $0x30] sm:$0xff] %v6929_v25  ;;  %v6930_v50 = vmax.f32 %v6894_v58, 0.0  ;;  %v6391_v54 = vpop.f32.mrb[21].mxu0  ;;  %v6671_v59 = vadd.f32 %v6559_v6, %v11344_v49  ;;  %v6562_v60 = vadd.f32 %v7984_v34, %v6384_v22  ;;  %v6553_v18 = vpop.f32.mrb[43].mxu1  ;;  %v7479_v22 = vunpack.c.h.bf16 %v11477_v26 }
 0x4e1   : > { %6963 = vst [vmem:[%s11471_s30 + $0x20] sm:$0xff] %v6927_v20  ;;  %v6928_v48 = vmax.f32 %v6892_v32, 0.0  ;;  %v6392_v29 = vpop.f32.mrb[22].mxu0  ;;  %v6669_v61 = vadd.f32 %v6551_v13, %v11347_v9  ;;  %v6554_v19 = vadd.f32 %v6553_v18, %v11448_v42  ;;  %v6802_v9 = vsel %vm6777_vm0, %v6799_v45, %v6801_v27 }
 0x4e2   : > { %6966 = vst [vmem:[%s11471_s30 + $0x38] sm:$0xff] %v6930_v50  ;;  %v6394_v56 = vpop.f32.mrb[23].mxu0  ;;  %v6714_v49 = vadd.f32 %v11440_v2, %v6671_v59  ;;  %v6672_v40 = vadd.f32 %v6562_v60, %v11349_v12  ;;  %v6798_v17 = vsel %vm6777_vm0, %v6795_v23, %v6797_v14  ;;  %v7486_v26 = vunpack.c.l.bf16 %v7531_v52 }
 0x4e3   : > { %6964 = vst [vmem:[%s11471_s30 + $0x28] sm:$0xff] %v6928_v48  ;;  %v6712_v30 = vadd.f32 %v11440_v2, %v6669_v61  ;;  %v6670_v11 = vadd.f32 %v6554_v19, %v11351_v36  ;;  %v6805_v58 = vrot.slane %v7482_v62, 3  ;;  %v6803_v45 = vrot.slane %v7479_v22, 3  ;;  %v7532_v19 = vld [vmem:[%s8921_s8 + $0x50] sm:$0xff]  }
 0x4e4   : > { %v6897_v24 = vadd.f32 %v6800_v41, %v6714_v49  ;;  %v6715_v42 = vadd.f32 %v11440_v2, %v6672_v40  ;;  %v6807_v32 = vrot.slane %v7483_v8, 3  ;;  %v6809_v60 = vrot.slane %v7486_v26, 3 }
 0x4e5   : > { %v6895_v37 = vadd.f32 %v6796_v31, %v6712_v30  ;;  %v6713_v12 = vadd.f32 %v11440_v2, %v6670_v11  ;;  %v7987_v10 = vpop.f32.mrb[44].mxu1  ;;  %v7487_v62 = vunpack.c.h.bf16 %v7531_v52  ;;  %v6806_v22 = vsel %vm6777_vm0, %v6803_v45, %v6805_v58 }
 0x4e6   : > { %v6933_v44 = vmax.f32 %v6897_v24, 0.0  ;;  %v6898_v25 = vadd.f32 %v6802_v9, %v6715_v42  ;;  %v6566_v6 = vpop.f32.mrb[45].mxu1  ;;  %v6808_v56 = vsel %vm6777_vm0, %v6805_v58, %v6807_v32  ;;  %v7490_v11 = vunpack.c.l.bf16 %v7532_v19 }
 0x4e7   : > { %v6931_v51 = vmax.f32 %v6895_v37, 0.0  ;;  %v6397_v36 = vpop.f32.mrb[24].mxu0  ;;  %v6896_v20 = vadd.f32 %v6798_v17, %v6713_v12  ;;  %v6567_v13 = vadd.f32 %v6566_v6, %v6389_v16  ;;  %v7988_v34 = vpop.f32.mrb[46].mxu1  ;;  %v6804_v16 = vsel %vm6777_vm0, %v6801_v27, %v6803_v45 }
 0x4e8   : > { %6969 = vst [vmem:[%s11471_s30 + $0x50] sm:$0xff] %v6933_v44  ;;  %v6934_v14 = vmax.f32 %v6898_v25, 0.0  ;;  %v6399_v23 = vpop.f32.mrb[25].mxu0  ;;  %v6575_v0 = vadd.f32 %v7987_v10, %v6397_v36  ;;  %v6569_v50 = vpop.f32.mrb[47].mxu1  ;;  %v6811_v37 = vrot.slane %v7487_v62, 3  ;;  %v6813_v45 = vrot.slane %v7490_v11, 3 }
 0x4e9   : > { %6967 = vst [vmem:[%s11471_s30 + $0x40] sm:$0xff] %v6931_v51  ;;  %v6932_v54 = vmax.f32 %v6896_v20, 0.0  ;;  %v6400_v59 = vpop.f32.mrb[26].mxu0  ;;  %v6673_v41 = vadd.f32 %v6567_v13, %v11357_v28  ;;  %v6570_v18 = vadd.f32 %v6569_v50, %v6392_v29  ;;  %v7533_v13 = vld [vmem:[%s8921_s8 + $0x58] sm:$0xff]  }
 0x4ea   : > { %6970 = vst [vmem:[%s11471_s30 + $0x58] sm:$0xff] %v6934_v14  ;;  %v6402_v48 = vpop.f32.mrb[27].mxu0  ;;  %v6675_v61 = vadd.f32 %v6575_v0, %v11354_v46  ;;  %v6578_v31 = vadd.f32 %v7988_v34, %v6400_v59  ;;  %v6810_v46 = vsel %vm6777_vm0, %v6807_v32, %v6809_v60  ;;  %v6812_v34 = vsel %vm6777_vm0, %v6809_v60, %v6811_v37 }
 0x4eb   : > { %6968 = vst [vmem:[%s11471_s30 + $0x48] sm:$0xff] %v6932_v54  ;;  %v6716_v49 = vadd.f32 %v11440_v2, %v6673_v41  ;;  %v6674_v40 = vadd.f32 %v6570_v18, %v11361_v1  ;;  %v7491_v14 = vunpack.c.h.bf16 %v7532_v19  ;;  %v6814_v50 = vsel %vm6777_vm0, %v6811_v37, %v6813_v45 }
 0x4ec   : > { %v6718_v28 = vadd.f32 %v11440_v2, %v6675_v61  ;;  %v6676_v29 = vadd.f32 %v6578_v31, %v11359_v5  ;;  %v7494_v54 = vunpack.c.l.bf16 %v7533_v13 }
 0x4ed   : > { %v6899_v30 = vadd.f32 %v6804_v16, %v6716_v49  ;;  %v6717_v27 = vadd.f32 %v11440_v2, %v6674_v40  ;;  %v7991_v9 = vpop.f32.mrb[48].mxu1  ;;  %v6815_v61 = vrot.slane %v7491_v14, 3 }
 0x4ee   : > { %v6901_v8 = vadd.f32 %v6808_v56, %v6718_v28  ;;  %v6719_v24 = vadd.f32 %v11440_v2, %v6676_v29  ;;  %v6582_v1 = vpop.f32.mrb[49].mxu1  ;;  %v6817_v40 = vrot.slane %v7494_v54, 3 }
 0x4ef   : > { %v6935_v52 = vmax.f32 %v6899_v30, 0.0  ;;  %v6405_v42 = vpop.f32.mrb[28].mxu0  ;;  %v6900_v17 = vadd.f32 %v6806_v22, %v6717_v27  ;;  %v7992_v5 = vpop.f32.mrb[50].mxu1  ;;  %v7534_v30 = vld [vmem:[%s8921_s8 + $0x60] sm:$0xff]   ;;  %v7495_v27 = vunpack.c.h.bf16 %v7533_v13 }
 0x4f0   : > { %v6937_v12 = vmax.f32 %v6901_v8, 0.0  ;;  %v6902_v10 = vadd.f32 %v6810_v46, %v6719_v24  ;;  %v6407_v26 = vpop.f32.mrb[29].mxu0  ;;  %v6583_v44 = vadd.f32 %v6582_v1, %v6405_v42  ;;  %v6585_v25 = vpop.f32.mrb[51].mxu1  ;;  %v6816_v46 = vsel %vm6777_vm0, %v6813_v45, %v6815_v61 }
 0x4f1   : > { %6971 = vst [vmem:[%s11471_s30 + $0x60] sm:$0xff] %v6935_v52  ;;  %v6936_v58 = vmax.f32 %v6900_v17, 0.0  ;;  %v6408_v6 = vpop.f32.mrb[30].mxu0  ;;  %v6818_v8 = vsel %vm6777_vm0, %v6815_v61, %v6817_v40  ;;  %v7498_v24 = vunpack.c.l.bf16 %v7534_v30  ;;  %v6819_v37 = vrot.slane %v7495_v27, 3 }
 0x4f2   : > { %6973 = vst [vmem:[%s11471_s30 + $0x70] sm:$0xff] %v6937_v12  ;;  %v6938_v51 = vmax.f32 %v6902_v10, 0.0  ;;  %v6410_v36 = vpop.f32.mrb[31].mxu0  ;;  %v6677_v20 = vadd.f32 %v6583_v44, %v11367_v3  ;;  %v6586_v32 = vadd.f32 %v6585_v25, %v6408_v6  ;;  %v7499_v13 = vunpack.c.h.bf16 %v7534_v30 }
 0x4f3   : > { %6972 = vst [vmem:[%s11471_s30 + $0x68] sm:$0xff] %v6936_v58  ;;  %v6821_v58 = vrot.slane %v7498_v24, 3 }
 0x4f4   : > { %6974 = vst [vmem:[%s11471_s30 + $0x78] sm:$0xff] %v6938_v51  ;;  %v6720_v23 = vadd.f32 %v11440_v2, %v6677_v20  ;;  %v6678_v0 = vadd.f32 %v6586_v32, %v11371_v63  ;;  %v7535_v20 = vld [vmem:[%s8921_s8 + $0x68] sm:$0xff]   ;;  %v6820_v32 = vsel %vm6777_vm0, %v6817_v40, %v6819_v37 }
 0x4f5   : > { %v11545_v59 = vpop.f32.mrb[52].mxu1  ;;  %v7503_v30 = vunpack.c.h.bf16 %v7535_v20 }
 0x4f6   : > { %v6903_v41 = vadd.f32 %v6812_v34, %v6720_v23  ;;  %v6721_v3 = vadd.f32 %v11440_v2, %v6678_v0  ;;  %v6598_v18 = vpop.f32.mrb[53].mxu1  ;;  %v6822_v23 = vsel %vm6777_vm0, %v6819_v37, %v6821_v58  ;;  %v7502_v0 = vunpack.c.l.bf16 %v7535_v20 }
 0x4f7   : > { %v6413_v48 = vpop.f32.mrb[32].mxu0  ;;  %v11548_v60 = vpop.f32.mrb[54].mxu1 }
 0x4f8   : > { %v6939_v16 = vmax.f32 %v6903_v41, 0.0  ;;  %v6591_v31 = vadd.f32 %v7991_v9, %v6413_v48  ;;  %v6904_v19 = vadd.f32 %v6814_v50, %v6721_v3  ;;  %v6415_v63 = vpop.f32.mrb[33].mxu0  ;;  %v6601_v56 = vpop.f32.mrb[55].mxu1 }
 0x4f9   : > { %v6416_v49 = vpop.f32.mrb[34].mxu0 }
 0x4fa   : > { %6975 = vst [vmem:[%s11471_s30 + $0x80] sm:$0xff] %v6939_v16  ;;  %v6679_v62 = vadd.f32 %v6591_v31, %v11364_v35  ;;  %v6940_v28 = vmax.f32 %v6904_v19, 0.0  ;;  %v6594_v29 = vadd.f32 %v7992_v5, %v6416_v49  ;;  %v6418_v22 = vpop.f32.mrb[35].mxu0 }
 0x4fc   : > { %v6722_v11 = vadd.f32 %v11440_v2, %v6679_v62  ;;  %6976 = vst [vmem:[%s11471_s30 + $0x88] sm:$0xff] %v6940_v28  ;;  %v6680_v9 = vadd.f32 %v6594_v29, %v11369_v4  ;;  %v7536_v29 = vld [vmem:[%s8921_s8 + $0x70] sm:$0xff]  }
 0x4fd   : > { %v11558_v1 = vpop.f32.mrb[56].mxu1  ;;  %v7507_v20 = vunpack.c.h.bf16 %v7536_v29 }
 0x4fe   : > { %v6905_v52 = vadd.f32 %v6816_v46, %v6722_v11  ;;  %v6723_v35 = vadd.f32 %v11440_v2, %v6680_v9  ;;  %v6614_v42 = vpop.f32.mrb[57].mxu1  ;;  %v7506_v11 = vunpack.c.l.bf16 %v7536_v29 }
 0x4ff   : > { %v6421_v17 = vpop.f32.mrb[36].mxu0  ;;  %v11561_v5 = vpop.f32.mrb[58].mxu1 }
 0x500   : > { %v6941_v12 = vmax.f32 %v6905_v52, 0.0  ;;  %v6906_v10 = vadd.f32 %v6818_v8, %v6723_v35  ;;  %v6599_v26 = vadd.f32 %v6598_v18, %v6421_v17  ;;  %v6423_v4 = vpop.f32.mrb[37].mxu0  ;;  %v6617_v44 = vpop.f32.mrb[59].mxu1  ;;  %v6823_v18 = vrot.slane %v7499_v13, 3 }
 0x501   : > { %v6424_v25 = vpop.f32.mrb[38].mxu0  ;;  %v6827_v52 = vrot.slane %v7503_v30, 3  ;;  %v6829_v4 = vrot.slane %v7506_v11, 3 }
 0x502   : > { %6977 = vst [vmem:[%s11471_s30 + $0x90] sm:$0xff] %v6941_v12  ;;  %v6942_v6 = vmax.f32 %v6906_v10, 0.0  ;;  %v6681_v45 = vadd.f32 %v6599_v26, %v11375_v53  ;;  %v6602_v51 = vadd.f32 %v6601_v56, %v6424_v25  ;;  %v6426_v36 = vpop.f32.mrb[39].mxu0  ;;  %v6825_v56 = vrot.slane %v7502_v0, 3 }
 0x503   : > { %v6824_v22 = vsel %vm6777_vm0, %v6821_v58, %v6823_v18  ;;  %v6830_v13 = vsel %vm6777_vm0, %v6827_v52, %v6829_v4 }
 0x504   : > { %6978 = vst [vmem:[%s11471_s30 + $0x98] sm:$0xff] %v6942_v6  ;;  %v6724_v34 = vadd.f32 %v11440_v2, %v6681_v45  ;;  %v6682_v14 = vadd.f32 %v6602_v51, %v11377_v15  ;;  %v6826_v27 = vsel %vm6777_vm0, %v6823_v18, %v6825_v56  ;;  %v7537_v51 = vld [vmem:[%s8921_s8 + $0x78] sm:$0xff]   ;;  %v6828_v36 = vsel %vm6777_vm0, %v6825_v56, %v6827_v52 }
 0x505   : > { %v11571_v50 = vpop.f32.mrb[60].mxu1 }
 0x506   : > { %v6907_v54 = vadd.f32 %v6820_v32, %v6724_v34  ;;  %v6725_v53 = vadd.f32 %v11440_v2, %v6682_v14  ;;  %v11574_v41 = vpop.f32.mrb[61].mxu1  ;;  %v7510_v34 = vunpack.c.l.bf16 %v7537_v51 }
 0x507   : > { %v6429_v3 = vpop.f32.mrb[40].mxu0  ;;  %v11576_v48 = vpop.f32.mrb[62].mxu1 }
 0x508   : > { %v6943_v61 = vmax.f32 %v6907_v54, 0.0  ;;  %v6908_v16 = vadd.f32 %v6822_v23, %v6725_v53  ;;  %v6607_v15 = vadd.f32 %v11545_v59, %v6429_v3  ;;  %v6431_v31 = vpop.f32.mrb[41].mxu0  ;;  %v11579_v19 = vpop.f32.mrb[63].mxu1 }
 0x509   : > { %v6432_v63 = vpop.f32.mrb[42].mxu0 }
 0x50a   : > { %6979 = vst [vmem:[%s11471_s30 + $0xa0] sm:$0xff] %v6943_v61  ;;  %v6944_v49 = vmax.f32 %v6908_v16, 0.0  ;;  %v6683_v40 = vadd.f32 %v6607_v15, %v11380_v39  ;;  %v6610_v62 = vadd.f32 %v11548_v60, %v6432_v63  ;;  %v6434_v28 = vpop.f32.mrb[43].mxu0  ;;  %v6833_v61 = vrot.slane %v7510_v34, 3  ;;  %v7538_v63 = vld [vmem:[%s8921_s8 + $0x80] sm:$0xff]  }
 0x50b   : > { %v7514_v28 = vunpack.c.l.bf16 %v7538_v63 }
 0x50c   : > { %6980 = vst [vmem:[%s11471_s30 + $0xa8] sm:$0xff] %v6944_v49  ;;  %v6726_v46 = vadd.f32 %v11440_v2, %v6683_v40  ;;  %v6684_v59 = vadd.f32 %v6610_v62, %v11383_v57  ;;  %v7511_v49 = vunpack.c.h.bf16 %v7537_v51 }
 0x50d   : > { %v11590_v9 = vpop.f32.mrb[64].mxu1 }
 0x50e   : > { %v6909_v8 = vadd.f32 %v6824_v22, %v6726_v46  ;;  %v6727_v39 = vadd.f32 %v11440_v2, %v6684_v59  ;;  %v11593_v60 = vpop.f32.mrb[65].mxu1 }
 0x50f   : > { %v6437_v24 = vpop.f32.mrb[44].mxu0  ;;  %v11595_v35 = vpop.f32.mrb[66].mxu1 }
 0x510   : > { %v6945_v17 = vmax.f32 %v6909_v8, 0.0  ;;  %v6910_v37 = vadd.f32 %v6826_v27, %v6727_v39  ;;  %v6615_v57 = vadd.f32 %v6614_v42, %v6437_v24  ;;  %v6439_v12 = vpop.f32.mrb[45].mxu0  ;;  %v11597_v10 = vpop.f32.mrb[67].mxu1  ;;  %v6837_v8 = vrot.slane %v7514_v28, 3  ;;  %v3969_v28 = vld [vmem:[%s8921_s8 + $0x98] sm:$0x1] }
 0x511   : > { %v6440_v26 = vpop.f32.mrb[46].mxu0 }
 0x512   : > { %6981 = vst [vmem:[%s11471_s30 + $0xb0] sm:$0xff] %v6945_v17  ;;  %v6946_v25 = vmax.f32 %v6910_v37, 0.0  ;;  %v6685_v58 = vadd.f32 %v6615_v57, %v11386_v21  ;;  %v6618_v6 = vadd.f32 %v6617_v44, %v6440_v26  ;;  %v6442_v45 = vpop.f32.mrb[47].mxu0  ;;  %v6831_v44 = vrot.slane %v7507_v20, 3  ;;  %v7539_v17 = vld [vmem:[%s8921_s8 + $0x88] sm:$0xff]  }
 0x513   : > { %v7515_v57 = vunpack.c.h.bf16 %v7538_v63 }
 0x514   : > { %6982 = vst [vmem:[%s11471_s30 + $0xb8] sm:$0xff] %v6946_v25  ;;  %v6728_v32 = vadd.f32 %v11440_v2, %v6685_v58  ;;  %v6686_v42 = vadd.f32 %v6618_v6, %v11389_v43  ;;  %v6832_v56 = vsel %vm6777_vm0, %v6829_v4, %v6831_v44  ;;  %v6834_v62 = vsel %vm6777_vm0, %v6831_v44, %v6833_v61 }
 0x515   : > { %v7518_v4 = vunpack.c.l.bf16 %v7539_v17 }
 0x516   : > { %v6911_v14 = vadd.f32 %v6828_v36, %v6728_v32  ;;  %v6729_v23 = vadd.f32 %v11440_v2, %v6686_v42 }
 0x517   : > { %v6445_v21 = vpop.f32.mrb[48].mxu0  ;;  %v6841_v32 = vrot.slane %v7518_v4, 3 }
 0x518   : > { %v6947_v0 = vmax.f32 %v6911_v14, 0.0  ;;  %v6912_v54 = vadd.f32 %v6830_v13, %v6729_v23  ;;  %v6623_v53 = vadd.f32 %v11558_v1, %v6445_v21  ;;  %v6447_v3 = vpop.f32.mrb[49].mxu0  ;;  %v7540_v14 = vld [vmem:[%s8921_s8 + $0x90] sm:$0xff]   ;;  %v7519_v21 = vunpack.c.h.bf16 %v7539_v17 }
 0x519   : > { %v6448_v18 = vpop.f32.mrb[50].mxu0 }
 0x51a   : > { %6983 = vst [vmem:[%s11471_s30 + $0xc0] sm:$0xff] %v6947_v0  ;;  %v6948_v16 = vmax.f32 %v6912_v54, 0.0  ;;  %v6687_v43 = vadd.f32 %v6623_v53, %v11392_v33  ;;  %v6626_v15 = vadd.f32 %v11561_v5, %v6448_v18  ;;  %v6450_v31 = vpop.f32.mrb[51].mxu0  ;;  %v6835_v5 = vrot.slane %v7511_v49, 3  ;;  %v11817_v0 = vld [vmem:[#allocation23_spill] sm:$0xff]  ;;  %v11818_v49 = vld [vmem:[#allocation24_spill] sm:$0xff] }
 0x51b   : > { %v7522_v53 = vunpack.c.l.bf16 %v7540_v14 }
 0x51c   : > { %6984 = vst [vmem:[%s11471_s30 + $0xc8] sm:$0xff] %v6948_v16  ;;  %v6730_v40 = vadd.f32 %v11440_v2, %v6687_v43  ;;  %v6688_v1 = vadd.f32 %v6626_v15, %v11395_v47  ;;  %v6836_v37 = vsel %vm6777_vm0, %v6833_v61, %v6835_v5  ;;  %v6838_v26 = vsel %vm6777_vm0, %v6835_v5, %v6837_v8  ;;  %v11819_v5 = vld [vmem:[#allocation27_spill] sm:$0xff] }
 0x51d   : > { %v6845_v63 = vrot.slane %v7522_v53, 3 }
 0x51e   : > { %v6913_v29 = vadd.f32 %v6832_v56, %v6730_v40  ;;  %v6731_v33 = vadd.f32 %v11440_v2, %v6688_v1 }
 0x51f   : > { %v6453_v22 = vpop.f32.mrb[52].mxu0 }
 0x520   : > { %v6949_v30 = vmax.f32 %v6913_v29, 0.0  ;;  %v6914_v46 = vadd.f32 %v6834_v62, %v6731_v33  ;;  %v6631_v59 = vadd.f32 %v11574_v41, %v6453_v22  ;;  %v6455_v27 = vpop.f32.mrb[53].mxu0  ;;  %v7523_v33 = vunpack.c.h.bf16 %v7540_v14 }
 0x521   : > { %v6456_v11 = vpop.f32.mrb[54].mxu0 }
 0x522   : > { %6985 = vst [vmem:[%s11471_s30 + $0xd0] sm:$0xff] %v6949_v30  ;;  %v6950_v39 = vmax.f32 %v6914_v46, 0.0  ;;  %v6689_v47 = vadd.f32 %v6631_v59, %v11400_v7  ;;  %v6634_v24 = vadd.f32 %v11579_v19, %v6456_v11  ;;  %v6458_v52 = vpop.f32.mrb[55].mxu0  ;;  %v6839_v19 = vrot.slane %v7515_v57, 3  ;;  %v11820_v57 = vld [vmem:[#allocation22_spill] sm:$0xff] }
 0x523   : > { %v4006_v46 = vunpack.c.l.bf16 %v3969_v28 }
 0x524   : > { %6986 = vst [vmem:[%s11471_s30 + $0xd8] sm:$0xff] %v6950_v39  ;;  %v6732_v12 = vadd.f32 %v11440_v2, %v6689_v47  ;;  %v6690_v41 = vadd.f32 %v6634_v24, %v11405_v55  ;;  %v6840_v23 = vsel %vm6777_vm0, %v6837_v8, %v6839_v19  ;;  %v6842_v54 = vsel %vm6777_vm0, %v6839_v19, %v6841_v32 }
 0x525   : > { %v6849_v17 = vrot.slane %v4006_v46, 3 }
 0x526   : > { %v6915_v25 = vadd.f32 %v6836_v37, %v6732_v12  ;;  %v6733_v7 = vadd.f32 %v11440_v2, %v6690_v41 }
 0x527   : > { %v6461_v58 = vpop.f32.mrb[56].mxu0 }
 0x528   : > { %v6951_v6 = vmax.f32 %v6915_v25, 0.0  ;;  %v6916_v45 = vadd.f32 %v6838_v26, %v6733_v7  ;;  %v6639_v51 = vadd.f32 %v11571_v50, %v6461_v58  ;;  %v6463_v36 = vpop.f32.mrb[57].mxu0 }
 0x529   : > { %v6464_v20 = vpop.f32.mrb[58].mxu0 }
 0x52a   : > { %6987 = vst [vmem:[%s11471_s30 + $0xe0] sm:$0xff] %v6951_v6  ;;  %v6952_v42 = vmax.f32 %v6916_v45, 0.0  ;;  %v6691_v55 = vadd.f32 %v6639_v51, %v11408_v38  ;;  %v6642_v13 = vadd.f32 %v11576_v48, %v6464_v20  ;;  %v6466_v34 = vpop.f32.mrb[59].mxu0  ;;  %v6843_v48 = vrot.slane %v7519_v21, 3 }
 0x52c   : > { %6988 = vst [vmem:[%s11471_s30 + $0xe8] sm:$0xff] %v6952_v42  ;;  %v6734_v44 = vadd.f32 %v11440_v2, %v6691_v55  ;;  %v6692_v50 = vadd.f32 %v6642_v13, %v11817_v0  ;;  %v6844_v29 = vsel %vm6777_vm0, %v6841_v32, %v6843_v48  ;;  %v6846_v30 = vsel %vm6777_vm0, %v6843_v48, %v6845_v63 }
 0x52e   : > { %v6917_v3 = vadd.f32 %v6840_v23, %v6734_v44  ;;  %v6735_v38 = vadd.f32 %v11440_v2, %v6692_v50 }
 0x52f   : > { %v6469_v18 = vpop.f32.mrb[60].mxu0 }
 0x530   : > { %v6953_v61 = vmax.f32 %v6917_v3, 0.0  ;;  %v6918_v16 = vadd.f32 %v6842_v54, %v6735_v38  ;;  %v6647_v43 = vadd.f32 %v11593_v60, %v6469_v18  ;;  %v6471_v15 = vpop.f32.mrb[61].mxu0 }
 0x531   : > { %v6472_v31 = vpop.f32.mrb[62].mxu0 }
 0x532   : > { %6989 = vst [vmem:[%s11471_s30 + $0xf0] sm:$0xff] %v6953_v61  ;;  %v6954_v56 = vmax.f32 %v6918_v16, 0.0  ;;  %v6693_v40 = vadd.f32 %v6647_v43, %v11818_v49  ;;  %v6650_v1 = vadd.f32 %v11597_v10, %v6472_v31  ;;  %v6474_v62 = vpop.f32.mrb[63].mxu0  ;;  %v6847_v10 = vrot.slane %v7523_v33, 3 }
 0x534   : > { %6990 = vst [vmem:[%s11471_s30 + $0xf8] sm:$0xff] %v6954_v56  ;;  %v6736_v22 = vadd.f32 %v11440_v2, %v6693_v40  ;;  %v6694_v60 = vadd.f32 %v6650_v1, %v11819_v5  ;;  %v6848_v4 = vsel %vm6777_vm0, %v6845_v63, %v6847_v10  ;;  %v6850_v58 = vsel %vm6777_vm0, %v6847_v10, %v6849_v17 }
 0x536   : > { %v6919_v59 = vadd.f32 %v6844_v29, %v6736_v22  ;;  %v6737_v27 = vadd.f32 %v11440_v2, %v6694_v60 }
 0x537   : > { %v6477_v11 = vpop.f32.mrb[64].mxu0 }
 0x538   : > { %v6955_v8 = vmax.f32 %v6919_v59, 0.0  ;;  %v6920_v39 = vadd.f32 %v6846_v30, %v6737_v27  ;;  %v6655_v47 = vadd.f32 %v11590_v9, %v6477_v11  ;;  %v6479_v24 = vpop.f32.mrb[65].mxu0  ;;  %v11821_v9 = vld [vmem:[#allocation26_spill] sm:$0xff] }
 0x539   : > { %v6480_v52 = vpop.f32.mrb[66].mxu0 }
 0x53a   : > { %6991 = vst [vmem:[%s11471_s30 + $0x100] sm:$0xff] %v6955_v8  ;;  %v6956_v37 = vmax.f32 %v6920_v39, 0.0  ;;  %v6695_v12 = vadd.f32 %v6655_v47, %v11820_v57  ;;  %v6658_v41 = vadd.f32 %v11595_v35, %v6480_v52  ;;  %v6482_v26 = vpop.f32.mrb[67].mxu0 }
 0x53c   : > { %6992 = vst [vmem:[%s11471_s30 + $0x108] sm:$0xff] %v6956_v37  ;;  %v6738_v25 = vadd.f32 %v11440_v2, %v6695_v12  ;;  %v6696_v7 = vadd.f32 %v6658_v41, %v11821_v9 }
 0x53e   : > { %v6921_v19 = vadd.f32 %v6848_v4, %v6738_v25  ;;  %v6739_v6 = vadd.f32 %v11440_v2, %v6696_v7 }
 0x540   : > { %v6957_v45 = vmax.f32 %v6921_v19, 0.0  ;;  %v6922_v35 = vadd.f32 %v6850_v58, %v6739_v6 }
 0x542   : > { %6993 = vst [vmem:[%s11471_s30 + $0x110] sm:$0xff] %v6957_v45  ;;  %v6958_v51 = vmax.f32 %v6922_v35, 0.0 }
 0x544   : > { %6994 = vst [vmem:[%s11471_s30 + $0x118] sm:$0x3f] %v6958_v51 }
 0x545   : > { %8565 = shalt.err (!%p8562_p8)
}
 0x546   : > { %s8566_s14 = scalar_lea.hbm %s11667_s11, 4608  ;;  %s8570_s28 = scalar_lea.hbm %s11721_s6, 9216 }
 0x547   : > { %p8567_p6 = scmp.ne.s32.totalorder %s11667_s11, %s8566_s14  ;;  %p8571_p3 = scmp.lt.u32.totalorder %s11667_s11, %s11721_s6 }
 0x548   : > { %p8572_p0 = scmp.lt.u32.totalorder %s8570_s28, %s8566_s14  ;;  %p8574_p2 = scmp.lt.u32.totalorder %s8566_s14, %s11667_s11 }
 0x549   : > { %p8568_p9 = pnand %p8567_p6, %p11822_p7 }
 0x54a   : > { %p8573_p5 = por %p8572_p0, %p8571_p3 }
 0x54b   : > { %p8569_p4 = pneg %p8568_p9 }
 0x54c   : > { %p8575_p10 = por %p8574_p2, %p8573_p5 }
 0x54e   : > { %p8576_p1 = pnand %p8575_p10, %p8569_p4 }
 0x550   : > { %8579 = shalt.err (!%p8576_p1)
}
 0x551   : > { %s8644_s15 = smov 128   ;;  %s8645_s16 = smov 8  }
 0x552   : > { %8036 = dma.vmem_to_hbm [thread:$0]  (%p11822_p7), %s11670_s9, 4608, %s11667_s11, %s6996_s27, %s8644_s15, %s8644_s15, %s8645_s16  }
 0x553 PF: > { %s7024_s7 = sand.u32 1, %s8618_s21   ;;  %p11823_p11 = scmp.ne.s32.totalorder %s11744_s10, 0 }
 0x554   : > { %p11824_p12 = scmp.ge.s32.totalorder %s8630_s24, 2  ;;  %s7025_s17 = scalar_lea.sflag [#allocation5], %s7024_s7 }
 0x556   : > { %p8059_p13 = pnand %p11824_p12, %p11823_p11 }
 0x558   : > { %8613 = dma.done.wait (!%p8059_p13), %s7025_s17, 4608  }
 0x559   : > { %8615 = vsyncadd (!%p8059_p13), %s7025_s17, 4294962688  ;;  %p22_p8 = scmp.ge.s32.totalorder %s8841_s29, 4   ;;  %s11825_s21 = smov %s8622_s22 }
 0x55a   : > { %s11826_s22 = smov %s8626_s23  ;;  %s11827_s23 = smov %s8853_s20 }
 0x55b   : > { %s11828_s24 = smov %s8841_s29  ;;  %24 = sbr.rel (!%p22_p8) target bundleno = 8 (0x8), region = 113 }
 0x562   :  { %7030 = vsyncpa [#allocation4], 1 }
 0x563   :  { %7032 = vsyncpa [#allocation4 + $0x1], 1 }
 0x564   :  { %7033 = vsyncpa [#allocation7], 1 }
 0x565   :  { %7034 = vsyncpa [#allocation10], 1 }
 0x566   :  { %7035 = vsyncpa [#allocation13], 1 }
 0x567   :  { %7036 = vsyncpa [#allocation5], 1 }
 0x568   :  { %7038 = vsyncpa [#allocation5 + $0x1], 1 }

</bundles_post_ra>
